<compile_context>
chip_gen: v7x
topology: tpu7x:2x2x1
jax: 0.10.0
libtpu: 0.0.40
codegen_flags: <defaults>
</compile_context>

<pallas_src>
import functools

import jax
import jax.numpy as jnp
import numpy as np
from jax.experimental import pallas as pl
from jax.experimental.pallas import tpu as pltpu

K = 7          # spatial conv kernel size
PAD = 3        # same padding for k=7, stride=1, dilation=1


def _largest_divisor_leq(n, cap):
    """Largest divisor of n that is <= cap (>= 1)."""
    cap = int(max(1, min(n, cap)))
    for d in range(cap, 0, -1):
        if n % d == 0:
            return d
    return 1


def _pick_channel_tile(c, cap):
    """Channel tile: full C if it fits, else the largest multiple-of-8 divisor
    (keeps the second-to-last block dim (8,128)-legal)."""
    if c <= cap:
        return c
    best = 0
    d = 8
    while d <= cap:
        if c % d == 0:
            best = d
        d += 8
    # TODO(synk): pad C / masked remainder block for awkward channel counts
    # instead of falling back to an untiled channel block.
    return best if best > 0 else c


def sam_kernel(x_ref, w_ref, bn_ref, o_ref, max_sc, sum_sc, pp_sc, *, c_total):
    """Grid = (N/NB, C/CT); the C axis must stay the innermost ("arbitrary") axis.

    x_ref : (NB, CT, H*W)      VMEM  lane-dense NCHW input block, native dtype
    w_ref : (2*7*7,)           SMEM  conv weight flattened as (c_in, kh, kw)
    bn_ref: (2,)               SMEM  folded BatchNorm [scale, bias]
    o_ref : (NB, 1, H, W)      VMEM  output block (written on the last C step)
    max_sc: (NB, 8, H*W) f32   running channel max, kept as 8 sublane partials
    sum_sc: (NB, 8, H*W) f32   running channel sum, kept as 8 sublane partials
    pp_sc : (2, H+6, W+6) f32  zero-padded pooled maps (reused per image)
    """
    NB, CT, HW = x_ref.shape
    H, W = o_ref.shape[2], o_ref.shape[3]
    Hp, Wp = pp_sc.shape[1], pp_sc.shape[2]
    ci = pl.program_id(1)
    n_grp = CT // 8
    rem = CT - 8 * n_grp

    # ---- ChannelPool: running max/sum over C as 8 sublane partials (VPU) ----
    @pl.when(ci == 0)
    def _init():
        max_sc[...] = jnp.full(max_sc.shape, -jnp.inf, max_sc.dtype)
        sum_sc[...] = jnp.zeros(sum_sc.shape, sum_sc.dtype)

    for nb in range(NB):
        if n_grp > 0:
            def grp_step(off, carry):
                cmax, csum = carry
                xg = x_ref[nb, pl.ds(off, 8), :].astype(jnp.float32)   # (8, HW)
                return jnp.maximum(cmax, xg), csum + xg

            x0 = x_ref[nb, 0:8, :].astype(jnp.float32)
            if n_grp <= 8:
                cmax, csum = x0, x0
                for g in range(1, n_grp):
                    cmax, csum = grp_step(g * 8, (cmax, csum))
            else:
                # Bounded unroll keeps code size and vreg live ranges in check.
                def body(g, carry):
                    return grp_step(pl.multiple_of(g * 8, 8), carry)
                cmax, csum = jax.lax.fori_loop(1, n_grp, body, (x0, x0), unroll=4)
            max_sc[nb] = jnp.maximum(max_sc[nb], cmax)
            sum_sc[nb] = sum_sc[nb] + csum

        if rem > 0:
            xr = x_ref[nb, 8 * n_grp:CT, :].astype(jnp.float32)        # (rem, HW)
            max_sc[nb, :rem] = jnp.maximum(max_sc[nb, :rem], xr)
            sum_sc[nb, :rem] = sum_sc[nb, :rem] + xr

    # ---- Conv(2->1, 7x7, pad=3) + folded BN + sigmoid on the last C step ----
    @pl.when(ci == pl.num_programs(1) - 1)
    def _finalize():
        scale = bn_ref[0]
        bias = bn_ref[1]
        inv_c = jnp.float32(1.0 / c_total)
        wgt = [w_ref[i] for i in range(2 * K * K)]          # hoisted scalar reads

        # Zero only the halo border strips of the tiny padded scratch (the
        # interior is fully overwritten per image).  Correct regardless of how
        # the parallel N axis is sharded across TensorCores, and much cheaper
        # than a full memset per grid step.
        zrow = jnp.zeros((PAD, Wp), jnp.float32)
        zcol = jnp.zeros((Hp, PAD), jnp.float32)
        for c in range(2):
            pp_sc[c, 0:PAD, :] = zrow
            pp_sc[c, PAD + H:Hp, :] = zrow
            pp_sc[c, :, 0:PAD] = zcol
            pp_sc[c, :, PAD + W:Wp] = zcol

        for nb in range(NB):
            # 8-way sublane reduce (XLU) of the running partials, deposited
            # row-by-row into the 2-D padded scratch (lane-dense -> (H, W)).
            for hh in range(H):
                seg_max = max_sc[nb, :, pl.ds(hh * W, W)]              # (8, W)
                seg_sum = sum_sc[nb, :, pl.ds(hh * W, W)]
                pp_sc[0, PAD + hh, PAD:PAD + W] = jnp.max(seg_max, axis=0)
                pp_sc[1, PAD + hh, PAD:PAD + W] = jnp.sum(seg_sum, axis=0) * inv_c

            # 98-tap conv: direct VMEM tap loads + 4 independent accumulator
            # chains for VALU ILP (no f32 FMA on v5e/v6e).
            acc = [jnp.zeros((H, W), jnp.float32) for _ in range(4)]
            for c in range(2):
                for kh in range(K):
                    a = 2 * c + (kh & 1)
                    for kw in range(K):
                        tap = pp_sc[c, kh:kh + H, kw:kw + W]
                        acc[a] = acc[a] + tap * wgt[c * K * K + kh * K + kw]
            y = (acc[0] + acc[1]) + (acc[2] + acc[3])
            o_ref[nb, 0] = jax.nn.sigmoid(y * scale + bias).astype(o_ref.dtype)


def sam_forward(x, conv_w, gamma, beta, running_mean, running_var, eps=1e-5,
                block_budget_bytes=8 * 1024 * 1024):
    """x: (N, C, H, W) float array (f32 or bf16). Returns (N, 1, H, W) f32."""
    N, C, H, W = x.shape
    HW = H * W
    Hp, Wp = H + 2 * PAD, W + 2 * PAD

    # Lane-dense view of the NCHW input: collapsing the trailing (H, W) dims is
    # free and puts the whole spatial extent on the 128-lane axis.
    xf = x.reshape(N, C, HW)

    w_flat = conv_w.reshape(-1).astype(jnp.float32)                  # (98,), (c, kh, kw)
    scale = gamma / jnp.sqrt(running_var + eps)
    bias = beta - running_mean * scale
    bn_params = jnp.stack([scale[0], bias[0]]).astype(jnp.float32)   # (2,)

    itemsize = jnp.dtype(x.dtype).itemsize
    # Block selection: batch images when maps are tiny, tile channels when one
    # image's channels blow the budget.  NB is capped at N//2 so the parallel
    # N axis always has >= 2 blocks (both v7x TensorCores get work) and at 8 to
    # bound static unrolling of the per-image loops.
    nb_cap = min(max(1, N // 2), 8,
                 max(1, block_budget_bytes // max(C * HW * itemsize, 1)))
    NB = _largest_divisor_leq(N, nb_cap)
    ct_cap = max(1, block_budget_bytes // max(NB * HW * itemsize, 1))
    CT = _pick_channel_tile(C, ct_cap)
    # TODO(synk): for N == 1 a spatially tiled parallel axis (with halo handling)
    # would be needed to keep both v7x TensorCores busy.

    # Explicit scoped-VMEM budget: double-buffered in/out blocks + scratch,
    # clamped to a v7x-safe ceiling (64 MiB physical per TensorCore).
    in_block = NB * CT * HW * itemsize
    out_block = NB * HW * 4
    scratch = 2 * NB * 8 * HW * 4 + 2 * Hp * Wp * 4
    vmem_need = 2 * in_block + 2 * out_block + scratch + (2 << 20)
    vmem_limit = int(min(max(vmem_need, 32 << 20), 56 << 20))

    cost = pl.CostEstimate(
        flops=2 * N * C * HW + 2 * (2 * K * K) * N * HW,
        transcendentals=N * HW,
        bytes_accessed=N * C * HW * itemsize + N * HW * 4)

    # NOTE: the accumulator (init at ci==0 / finalize at last ci) pattern relies
    # on the C axis being the innermost grid axis and on out_specs returning the
    # same block index across it.  Keep it that way if the grid is ever changed.
    out = pl.pallas_call(
        functools.partial(sam_kernel, c_total=C),
        out_shape=jax.ShapeDtypeStruct((N, 1, H, W), jnp.float32),
        grid=(N // NB, C // CT),
        in_specs=[
            pl.BlockSpec((NB, CT, HW), lambda i, j: (i, j, 0)),
            pl.BlockSpec(memory_space=pltpu.MemorySpace.SMEM),
            pl.BlockSpec(memory_space=pltpu.MemorySpace.SMEM),
        ],
        out_specs=pl.BlockSpec((NB, 1, H, W), lambda i, j: (i, 0, 0, 0)),
        scratch_shapes=[
            pltpu.VMEM((NB, 8, HW), jnp.float32),   # running channel max (8 partials)
            pltpu.VMEM((NB, 8, HW), jnp.float32),   # running channel sum (8 partials)
            pltpu.VMEM((2, Hp, Wp), jnp.float32),   # zero-padded pooled maps
        ],
        compiler_params=pltpu.CompilerParams(
            dimension_semantics=("parallel", "arbitrary"),
            vmem_limit_bytes=vmem_limit),
        cost_estimate=cost,
    )(xf, w_flat, bn_params)
    return out


def sam_reference(x, conv_w, gamma, beta, running_mean, running_var, eps=1e-5):
    """Pure-JAX reference (NCHW), mirrors the PyTorch forward in eval mode."""
    mx = jnp.max(x, axis=1, keepdims=True)
    mn = jnp.mean(x, axis=1, keepdims=True)
    pooled = jnp.concatenate([mx, mn], axis=1)                       # (N, 2, H, W)
    conv = jax.lax.conv_general_dilated(
        pooled, conv_w, window_strides=(1, 1),
        padding=[(PAD, PAD), (PAD, PAD)],
        dimension_numbers=("NCHW", "OIHW", "NCHW"))
    scale = (gamma / jnp.sqrt(running_var + eps)).reshape(1, -1, 1, 1)
    bias = (beta - running_mean * gamma / jnp.sqrt(running_var + eps)).reshape(1, -1, 1, 1)
    return jax.nn.sigmoid(conv * scale + bias)


if __name__ == "__main__":
    key = jax.random.PRNGKey(0)
    k_x, k_w, k_g, k_b, k_m, k_v, k_x2 = jax.random.split(key, 7)

    # Small shapes consistent with the module's forward.
    N, C, H, W = 2, 4, 16, 16
    x = jax.random.normal(k_x, (N, C, H, W), dtype=jnp.float32)

    # Deterministic parameter init (synthetic; shapes from module __init__).
    conv_w = jax.random.normal(k_w, (1, 2, K, K), dtype=jnp.float32) * 0.1   # Conv2d(2,1,7)
    gamma = 1.0 + 0.1 * jax.random.normal(k_g, (1,), dtype=jnp.float32)      # BatchNorm2d(1)
    beta = 0.1 * jax.random.normal(k_b, (1,), dtype=jnp.float32)
    running_mean = 0.1 * jax.random.normal(k_m, (1,), dtype=jnp.float32)
    running_var = 1.0 + 0.1 * jax.random.uniform(k_v, (1,), dtype=jnp.float32)

    out = jax.block_until_ready(
        sam_forward(x, conv_w, gamma, beta, running_mean, running_var))
    ref = sam_reference(x, conv_w, gamma, beta, running_mean, running_var)
    np.testing.assert_allclose(np.asarray(out), np.asarray(ref), atol=1e-5, rtol=1e-5)
    assert out.shape == (N, 1, H, W)

    # Second config: bf16 input with more channels, exercising the grouped
    # sublane channel-pool path and the bounded-unroll fori_loop.
    N2, C2, H2, W2 = 2, 96, 28, 28
    x2 = jax.random.normal(k_x2, (N2, C2, H2, W2), dtype=jnp.bfloat16)
    out2 = jax.block_until_ready(
        sam_forward(x2, conv_w, gamma, beta, running_mean, running_var))
    ref2 = sam_reference(x2.astype(jnp.float32), conv_w, gamma, beta,
                         running_mean, running_var)
    np.testing.assert_allclose(np.asarray(out2), np.asarray(ref2), atol=2e-5, rtol=2e-5)

    print("KERNEL_OK")
</pallas_src>

<mosaic_0001>
module attributes {stable_mosaic.version = 11 : i64} {
  func.func @sam_kernel(%arg0: i32, %arg1: i32, %arg2: memref<1x4x256xf32, #tpu.memory_space<vmem>>, %arg3: memref<98xf32, #tpu.memory_space<smem>>, %arg4: memref<2xf32, #tpu.memory_space<smem>>, %arg5: memref<1x1x16x16xf32, #tpu.memory_space<vmem>>, %arg6: memref<1x8x256xf32, #tpu.memory_space<vmem>>, %arg7: memref<1x8x256xf32, #tpu.memory_space<vmem>>, %arg8: memref<2x22x22xf32, #tpu.memory_space<vmem>>) attributes {dimension_semantics = [#tpu.dimension_semantics<parallel>, #tpu.dimension_semantics<arbitrary>], iteration_bounds = array<i64: 2, 1>, scalar_prefetch = 0 : i64, scratch_operands = 3 : i64, tpu.core_type = #tpu.core_type<tc>, window_params = [{transform_indices = @transform_0, window_bounds = array<i64: 1, 4, 256>}, {transform_indices = @transform_1, window_bounds = array<i64: 98>}, {transform_indices = @transform_2, window_bounds = array<i64: 2>}, {transform_indices = @transform_3, window_bounds = array<i64: 1, 1, 16, 16>}]} {
    %c0_i32 = arith.constant 0 : i32
    %0 = arith.cmpi eq, %arg1, %c0_i32 : i32
    %1 = arith.extui %0 : i1 to i32
    %c0_i32_0 = arith.constant 0 : i32
    %2 = arith.cmpi ne, %1, %c0_i32_0 : i32
    scf.if %2 {
      %cst = arith.constant 0xFF800000 : f32
      %20 = vector.broadcast %cst : f32 to vector<1x8x256xf32>
      %c0_17 = arith.constant 0 : index
      %c0_18 = arith.constant 0 : index
      %c0_19 = arith.constant 0 : index
      %21 = vector.load %arg6[%c0_17, %c0_18, %c0_19] : memref<1x8x256xf32, #tpu.memory_space<vmem>>, vector<1x8x256xf32>
      tpu.vector_store %arg6[%c0_17, %c0_18, %c0_19], %20 {strides = array<i32>} : memref<1x8x256xf32, #tpu.memory_space<vmem>>, vector<1x8x256xf32>,
      %cst_20 = arith.constant 0.000000e+00 : f32
      %22 = vector.broadcast %cst_20 : f32 to vector<1x8x256xf32>
      %c0_21 = arith.constant 0 : index
      %c0_22 = arith.constant 0 : index
      %c0_23 = arith.constant 0 : index
      %23 = vector.load %arg7[%c0_21, %c0_22, %c0_23] : memref<1x8x256xf32, #tpu.memory_space<vmem>>, vector<1x8x256xf32>
      tpu.vector_store %arg7[%c0_21, %c0_22, %c0_23], %22 {strides = array<i32>} : memref<1x8x256xf32, #tpu.memory_space<vmem>>, vector<1x8x256xf32>,
    } else {
    }
    %c0 = arith.constant 0 : index
    %c0_1 = arith.constant 0 : index
    %c0_2 = arith.constant 0 : index
    %3 = vector.load %arg2[%c0, %c0_1, %c0_2] : memref<1x4x256xf32, #tpu.memory_space<vmem>>, vector<1x4x256xf32>
    %4 = vector.shape_cast %3 : vector<1x4x256xf32> to vector<4x256xf32>
    %c0_3 = arith.constant 0 : index
    %c0_4 = arith.constant 0 : index
    %c0_5 = arith.constant 0 : index
    %5 = vector.load %arg6[%c0_3, %c0_4, %c0_5] : memref<1x8x256xf32, #tpu.memory_space<vmem>>, vector<1x4x256xf32>
    %6 = vector.shape_cast %5 : vector<1x4x256xf32> to vector<4x256xf32>
    %7 = arith.maximumf %6, %4 : vector<4x256xf32>
    %c0_6 = arith.constant 0 : index
    %c0_7 = arith.constant 0 : index
    %c0_8 = arith.constant 0 : index
    %8 = vector.load %arg6[%c0_6, %c0_7, %c0_8] : memref<1x8x256xf32, #tpu.memory_space<vmem>>, vector<1x4x256xf32>
    %9 = vector.shape_cast %8 : vector<1x4x256xf32> to vector<4x256xf32>
    %10 = vector.shape_cast %7 : vector<4x256xf32> to vector<1x4x256xf32>
    tpu.vector_store %arg6[%c0_6, %c0_7, %c0_8], %10 {strides = array<i32>} : memref<1x8x256xf32, #tpu.memory_space<vmem>>, vector<1x4x256xf32>,
    %c0_9 = arith.constant 0 : index
    %c0_10 = arith.constant 0 : index
    %c0_11 = arith.constant 0 : index
    %11 = vector.load %arg7[%c0_9, %c0_10, %c0_11] : memref<1x8x256xf32, #tpu.memory_space<vmem>>, vector<1x4x256xf32>
    %12 = vector.shape_cast %11 : vector<1x4x256xf32> to vector<4x256xf32>
    %13 = arith.addf %12, %4 : vector<4x256xf32>
    %c0_12 = arith.constant 0 : index
    %c0_13 = arith.constant 0 : index
    %c0_14 = arith.constant 0 : index
    %14 = vector.load %arg7[%c0_12, %c0_13, %c0_14] : memref<1x8x256xf32, #tpu.memory_space<vmem>>, vector<1x4x256xf32>
    %15 = vector.shape_cast %14 : vector<1x4x256xf32> to vector<4x256xf32>
    %16 = vector.shape_cast %13 : vector<4x256xf32> to vector<1x4x256xf32>
    tpu.vector_store %arg7[%c0_12, %c0_13, %c0_14], %16 {strides = array<i32>} : memref<1x8x256xf32, #tpu.memory_space<vmem>>, vector<1x4x256xf32>,
    %c0_i32_15 = arith.constant 0 : i32
    %17 = arith.cmpi eq, %arg1, %c0_i32_15 : i32
    %18 = arith.extui %17 : i1 to i32
    %c0_i32_16 = arith.constant 0 : i32
    %19 = arith.cmpi ne, %18, %c0_i32_16 : i32
    scf.if %19 {
      %c0_17 = arith.constant 0 : index
      %20 = memref.load %arg4[%c0_17] : memref<2xf32, #tpu.memory_space<smem>>
      %c1 = arith.constant 1 : index
      %21 = memref.load %arg4[%c1] : memref<2xf32, #tpu.memory_space<smem>>
      %c0_18 = arith.constant 0 : index
      %22 = memref.load %arg3[%c0_18] : memref<98xf32, #tpu.memory_space<smem>>
      %c1_19 = arith.constant 1 : index
      %23 = memref.load %arg3[%c1_19] : memref<98xf32, #tpu.memory_space<smem>>
      %c2 = arith.constant 2 : index
      %24 = memref.load %arg3[%c2] : memref<98xf32, #tpu.memory_space<smem>>
      %c3 = arith.constant 3 : index
      %25 = memref.load %arg3[%c3] : memref<98xf32, #tpu.memory_space<smem>>
      %c4 = arith.constant 4 : index
      %26 = memref.load %arg3[%c4] : memref<98xf32, #tpu.memory_space<smem>>
      %c5 = arith.constant 5 : index
      %27 = memref.load %arg3[%c5] : memref<98xf32, #tpu.memory_space<smem>>
      %c6 = arith.constant 6 : index
      %28 = memref.load %arg3[%c6] : memref<98xf32, #tpu.memory_space<smem>>
      %c7 = arith.constant 7 : index
      %29 = memref.load %arg3[%c7] : memref<98xf32, #tpu.memory_space<smem>>
      %c8 = arith.constant 8 : index
      %30 = memref.load %arg3[%c8] : memref<98xf32, #tpu.memory_space<smem>>
      %c9 = arith.constant 9 : index
      %31 = memref.load %arg3[%c9] : memref<98xf32, #tpu.memory_space<smem>>
      %c10 = arith.constant 10 : index
      %32 = memref.load %arg3[%c10] : memref<98xf32, #tpu.memory_space<smem>>
      %c11 = arith.constant 11 : index
      %33 = memref.load %arg3[%c11] : memref<98xf32, #tpu.memory_space<smem>>
      %c12 = arith.constant 12 : index
      %34 = memref.load %arg3[%c12] : memref<98xf32, #tpu.memory_space<smem>>
      %c13 = arith.constant 13 : index
      %35 = memref.load %arg3[%c13] : memref<98xf32, #tpu.memory_space<smem>>
      %c14 = arith.constant 14 : index
      %36 = memref.load %arg3[%c14] : memref<98xf32, #tpu.memory_space<smem>>
      %c15 = arith.constant 15 : index
      %37 = memref.load %arg3[%c15] : memref<98xf32, #tpu.memory_space<smem>>
      %c16 = arith.constant 16 : index
      %38 = memref.load %arg3[%c16] : memref<98xf32, #tpu.memory_space<smem>>
      %c17 = arith.constant 17 : index
      %39 = memref.load %arg3[%c17] : memref<98xf32, #tpu.memory_space<smem>>
      %c18 = arith.constant 18 : index
      %40 = memref.load %arg3[%c18] : memref<98xf32, #tpu.memory_space<smem>>
      %c19 = arith.constant 19 : index
      %41 = memref.load %arg3[%c19] : memref<98xf32, #tpu.memory_space<smem>>
      %c20 = arith.constant 20 : index
      %42 = memref.load %arg3[%c20] : memref<98xf32, #tpu.memory_space<smem>>
      %c21 = arith.constant 21 : index
      %43 = memref.load %arg3[%c21] : memref<98xf32, #tpu.memory_space<smem>>
      %c22 = arith.constant 22 : index
      %44 = memref.load %arg3[%c22] : memref<98xf32, #tpu.memory_space<smem>>
      %c23 = arith.constant 23 : index
      %45 = memref.load %arg3[%c23] : memref<98xf32, #tpu.memory_space<smem>>
      %c24 = arith.constant 24 : index
      %46 = memref.load %arg3[%c24] : memref<98xf32, #tpu.memory_space<smem>>
      %c25 = arith.constant 25 : index
      %47 = memref.load %arg3[%c25] : memref<98xf32, #tpu.memory_space<smem>>
      %c26 = arith.constant 26 : index
      %48 = memref.load %arg3[%c26] : memref<98xf32, #tpu.memory_space<smem>>
      %c27 = arith.constant 27 : index
      %49 = memref.load %arg3[%c27] : memref<98xf32, #tpu.memory_space<smem>>
      %c28 = arith.constant 28 : index
      %50 = memref.load %arg3[%c28] : memref<98xf32, #tpu.memory_space<smem>>
      %c29 = arith.constant 29 : index
      %51 = memref.load %arg3[%c29] : memref<98xf32, #tpu.memory_space<smem>>
      %c30 = arith.constant 30 : index
      %52 = memref.load %arg3[%c30] : memref<98xf32, #tpu.memory_space<smem>>
      %c31 = arith.constant 31 : index
      %53 = memref.load %arg3[%c31] : memref<98xf32, #tpu.memory_space<smem>>
      %c32 = arith.constant 32 : index
      %54 = memref.load %arg3[%c32] : memref<98xf32, #tpu.memory_space<smem>>
      %c33 = arith.constant 33 : index
      %55 = memref.load %arg3[%c33] : memref<98xf32, #tpu.memory_space<smem>>
      %c34 = arith.constant 34 : index
      %56 = memref.load %arg3[%c34] : memref<98xf32, #tpu.memory_space<smem>>
      %c35 = arith.constant 35 : index
      %57 = memref.load %arg3[%c35] : memref<98xf32, #tpu.memory_space<smem>>
      %c36 = arith.constant 36 : index
      %58 = memref.load %arg3[%c36] : memref<98xf32, #tpu.memory_space<smem>>
      %c37 = arith.constant 37 : index
      %59 = memref.load %arg3[%c37] : memref<98xf32, #tpu.memory_space<smem>>
      %c38 = arith.constant 38 : index
      %60 = memref.load %arg3[%c38] : memref<98xf32, #tpu.memory_space<smem>>
      %c39 = arith.constant 39 : index
      %61 = memref.load %arg3[%c39] : memref<98xf32, #tpu.memory_space<smem>>
      %c40 = arith.constant 40 : index
      %62 = memref.load %arg3[%c40] : memref<98xf32, #tpu.memory_space<smem>>
      %c41 = arith.constant 41 : index
      %63 = memref.load %arg3[%c41] : memref<98xf32, #tpu.memory_space<smem>>
      %c42 = arith.constant 42 : index
      %64 = memref.load %arg3[%c42] : memref<98xf32, #tpu.memory_space<smem>>
      %c43 = arith.constant 43 : index
      %65 = memref.load %arg3[%c43] : memref<98xf32, #tpu.memory_space<smem>>
      %c44 = arith.constant 44 : index
      %66 = memref.load %arg3[%c44] : memref<98xf32, #tpu.memory_space<smem>>
      %c45 = arith.constant 45 : index
      %67 = memref.load %arg3[%c45] : memref<98xf32, #tpu.memory_space<smem>>
      %c46 = arith.constant 46 : index
      %68 = memref.load %arg3[%c46] : memref<98xf32, #tpu.memory_space<smem>>
      %c47 = arith.constant 47 : index
      %69 = memref.load %arg3[%c47] : memref<98xf32, #tpu.memory_space<smem>>
      %c48 = arith.constant 48 : index
      %70 = memref.load %arg3[%c48] : memref<98xf32, #tpu.memory_space<smem>>
      %c49 = arith.constant 49 : index
      %71 = memref.load %arg3[%c49] : memref<98xf32, #tpu.memory_space<smem>>
      %c50 = arith.constant 50 : index
      %72 = memref.load %arg3[%c50] : memref<98xf32, #tpu.memory_space<smem>>
      %c51 = arith.constant 51 : index
      %73 = memref.load %arg3[%c51] : memref<98xf32, #tpu.memory_space<smem>>
      %c52 = arith.constant 52 : index
      %74 = memref.load %arg3[%c52] : memref<98xf32, #tpu.memory_space<smem>>
      %c53 = arith.constant 53 : index
      %75 = memref.load %arg3[%c53] : memref<98xf32, #tpu.memory_space<smem>>
      %c54 = arith.constant 54 : index
      %76 = memref.load %arg3[%c54] : memref<98xf32, #tpu.memory_space<smem>>
      %c55 = arith.constant 55 : index
      %77 = memref.load %arg3[%c55] : memref<98xf32, #tpu.memory_space<smem>>
      %c56 = arith.constant 56 : index
      %78 = memref.load %arg3[%c56] : memref<98xf32, #tpu.memory_space<smem>>
      %c57 = arith.constant 57 : index
      %79 = memref.load %arg3[%c57] : memref<98xf32, #tpu.memory_space<smem>>
      %c58 = arith.constant 58 : index
      %80 = memref.load %arg3[%c58] : memref<98xf32, #tpu.memory_space<smem>>
      %c59 = arith.constant 59 : index
      %81 = memref.load %arg3[%c59] : memref<98xf32, #tpu.memory_space<smem>>
      %c60 = arith.constant 60 : index
      %82 = memref.load %arg3[%c60] : memref<98xf32, #tpu.memory_space<smem>>
      %c61 = arith.constant 61 : index
      %83 = memref.load %arg3[%c61] : memref<98xf32, #tpu.memory_space<smem>>
      %c62 = arith.constant 62 : index
      %84 = memref.load %arg3[%c62] : memref<98xf32, #tpu.memory_space<smem>>
      %c63 = arith.constant 63 : index
      %85 = memref.load %arg3[%c63] : memref<98xf32, #tpu.memory_space<smem>>
      %c64 = arith.constant 64 : index
      %86 = memref.load %arg3[%c64] : memref<98xf32, #tpu.memory_space<smem>>
      %c65 = arith.constant 65 : index
      %87 = memref.load %arg3[%c65] : memref<98xf32, #tpu.memory_space<smem>>
      %c66 = arith.constant 66 : index
      %88 = memref.load %arg3[%c66] : memref<98xf32, #tpu.memory_space<smem>>
      %c67 = arith.constant 67 : index
      %89 = memref.load %arg3[%c67] : memref<98xf32, #tpu.memory_space<smem>>
      %c68 = arith.constant 68 : index
      %90 = memref.load %arg3[%c68] : memref<98xf32, #tpu.memory_space<smem>>
      %c69 = arith.constant 69 : index
      %91 = memref.load %arg3[%c69] : memref<98xf32, #tpu.memory_space<smem>>
      %c70 = arith.constant 70 : index
      %92 = memref.load %arg3[%c70] : memref<98xf32, #tpu.memory_space<smem>>
      %c71 = arith.constant 71 : index
      %93 = memref.load %arg3[%c71] : memref<98xf32, #tpu.memory_space<smem>>
      %c72 = arith.constant 72 : index
      %94 = memref.load %arg3[%c72] : memref<98xf32, #tpu.memory_space<smem>>
      %c73 = arith.constant 73 : index
      %95 = memref.load %arg3[%c73] : memref<98xf32, #tpu.memory_space<smem>>
      %c74 = arith.constant 74 : index
      %96 = memref.load %arg3[%c74] : memref<98xf32, #tpu.memory_space<smem>>
      %c75 = arith.constant 75 : index
      %97 = memref.load %arg3[%c75] : memref<98xf32, #tpu.memory_space<smem>>
      %c76 = arith.constant 76 : index
      %98 = memref.load %arg3[%c76] : memref<98xf32, #tpu.memory_space<smem>>
      %c77 = arith.constant 77 : index
      %99 = memref.load %arg3[%c77] : memref<98xf32, #tpu.memory_space<smem>>
      %c78 = arith.constant 78 : index
      %100 = memref.load %arg3[%c78] : memref<98xf32, #tpu.memory_space<smem>>
      %c79 = arith.constant 79 : index
      %101 = memref.load %arg3[%c79] : memref<98xf32, #tpu.memory_space<smem>>
      %c80 = arith.constant 80 : index
      %102 = memref.load %arg3[%c80] : memref<98xf32, #tpu.memory_space<smem>>
      %c81 = arith.constant 81 : index
      %103 = memref.load %arg3[%c81] : memref<98xf32, #tpu.memory_space<smem>>
      %c82 = arith.constant 82 : index
      %104 = memref.load %arg3[%c82] : memref<98xf32, #tpu.memory_space<smem>>
      %c83 = arith.constant 83 : index
      %105 = memref.load %arg3[%c83] : memref<98xf32, #tpu.memory_space<smem>>
      %c84 = arith.constant 84 : index
      %106 = memref.load %arg3[%c84] : memref<98xf32, #tpu.memory_space<smem>>
      %c85 = arith.constant 85 : index
      %107 = memref.load %arg3[%c85] : memref<98xf32, #tpu.memory_space<smem>>
      %c86 = arith.constant 86 : index
      %108 = memref.load %arg3[%c86] : memref<98xf32, #tpu.memory_space<smem>>
      %c87 = arith.constant 87 : index
      %109 = memref.load %arg3[%c87] : memref<98xf32, #tpu.memory_space<smem>>
      %c88 = arith.constant 88 : index
      %110 = memref.load %arg3[%c88] : memref<98xf32, #tpu.memory_space<smem>>
      %c89 = arith.constant 89 : index
      %111 = memref.load %arg3[%c89] : memref<98xf32, #tpu.memory_space<smem>>
      %c90 = arith.constant 90 : index
      %112 = memref.load %arg3[%c90] : memref<98xf32, #tpu.memory_space<smem>>
      %c91 = arith.constant 91 : index
      %113 = memref.load %arg3[%c91] : memref<98xf32, #tpu.memory_space<smem>>
      %c92 = arith.constant 92 : index
      %114 = memref.load %arg3[%c92] : memref<98xf32, #tpu.memory_space<smem>>
      %c93 = arith.constant 93 : index
      %115 = memref.load %arg3[%c93] : memref<98xf32, #tpu.memory_space<smem>>
      %c94 = arith.constant 94 : index
      %116 = memref.load %arg3[%c94] : memref<98xf32, #tpu.memory_space<smem>>
      %c95 = arith.constant 95 : index
      %117 = memref.load %arg3[%c95] : memref<98xf32, #tpu.memory_space<smem>>
      %c96 = arith.constant 96 : index
      %118 = memref.load %arg3[%c96] : memref<98xf32, #tpu.memory_space<smem>>
      %c97 = arith.constant 97 : index
      %119 = memref.load %arg3[%c97] : memref<98xf32, #tpu.memory_space<smem>>
      %cst = arith.constant 0.000000e+00 : f32
      %120 = vector.broadcast %cst : f32 to vector<3x22xf32>
      %cst_20 = arith.constant 0.000000e+00 : f32
      %121 = vector.broadcast %cst_20 : f32 to vector<22x3xf32>
      %c0_21 = arith.constant 0 : index
      %c0_22 = arith.constant 0 : index
      %c0_23 = arith.constant 0 : index
      %122 = vector.load %arg8[%c0_21, %c0_22, %c0_23] : memref<2x22x22xf32, #tpu.memory_space<vmem>>, vector<1x3x22xf32>
      %123 = vector.shape_cast %122 : vector<1x3x22xf32> to vector<3x22xf32>
      %124 = vector.shape_cast %120 : vector<3x22xf32> to vector<1x3x22xf32>
      tpu.vector_store %arg8[%c0_21, %c0_22, %c0_23], %124 {strides = array<i32>} : memref<2x22x22xf32, #tpu.memory_space<vmem>>, vector<1x3x22xf32>,
      %c0_24 = arith.constant 0 : index
      %c19_25 = arith.constant 19 : index
      %c0_26 = arith.constant 0 : index
      %125 = vector.load %arg8[%c0_24, %c19_25, %c0_26] : memref<2x22x22xf32, #tpu.memory_space<vmem>>, vector<1x3x22xf32>
      %126 = vector.shape_cast %125 : vector<1x3x22xf32> to vector<3x22xf32>
      %127 = vector.shape_cast %120 : vector<3x22xf32> to vector<1x3x22xf32>
      tpu.vector_store %arg8[%c0_24, %c19_25, %c0_26], %127 {strides = array<i32>} : memref<2x22x22xf32, #tpu.memory_space<vmem>>, vector<1x3x22xf32>,
      %c0_27 = arith.constant 0 : index
      %c0_28 = arith.constant 0 : index
      %c0_29 = arith.constant 0 : index
      %128 = vector.load %arg8[%c0_27, %c0_28, %c0_29] : memref<2x22x22xf32, #tpu.memory_space<vmem>>, vector<1x22x3xf32>
      %129 = vector.shape_cast %128 : vector<1x22x3xf32> to vector<22x3xf32>
      %130 = vector.shape_cast %121 : vector<22x3xf32> to vector<1x22x3xf32>
      tpu.vector_store %arg8[%c0_27, %c0_28, %c0_29], %130 {strides = array<i32>} : memref<2x22x22xf32, #tpu.memory_space<vmem>>, vector<1x22x3xf32>,
      %c0_30 = arith.constant 0 : index
      %c0_31 = arith.constant 0 : index
      %c19_32 = arith.constant 19 : index
      %131 = vector.load %arg8[%c0_30, %c0_31, %c19_32] : memref<2x22x22xf32, #tpu.memory_space<vmem>>, vector<1x22x3xf32>
      %132 = vector.shape_cast %131 : vector<1x22x3xf32> to vector<22x3xf32>
      %133 = vector.shape_cast %121 : vector<22x3xf32> to vector<1x22x3xf32>
      tpu.vector_store %arg8[%c0_30, %c0_31, %c19_32], %133 {strides = array<i32>} : memref<2x22x22xf32, #tpu.memory_space<vmem>>, vector<1x22x3xf32>,
      %c1_33 = arith.constant 1 : index
      %c0_34 = arith.constant 0 : index
      %c0_35 = arith.constant 0 : index
      %134 = vector.load %arg8[%c1_33, %c0_34, %c0_35] : memref<2x22x22xf32, #tpu.memory_space<vmem>>, vector<1x3x22xf32>
      %135 = vector.shape_cast %134 : vector<1x3x22xf32> to vector<3x22xf32>
      %136 = vector.shape_cast %120 : vector<3x22xf32> to vector<1x3x22xf32>
      tpu.vector_store %arg8[%c1_33, %c0_34, %c0_35], %136 {strides = array<i32>} : memref<2x22x22xf32, #tpu.memory_space<vmem>>, vector<1x3x22xf32>,
      %c1_36 = arith.constant 1 : index
      %c19_37 = arith.constant 19 : index
      %c0_38 = arith.constant 0 : index
      %137 = vector.load %arg8[%c1_36, %c19_37, %c0_38] : memref<2x22x22xf32, #tpu.memory_space<vmem>>, vector<1x3x22xf32>
      %138 = vector.shape_cast %137 : vector<1x3x22xf32> to vector<3x22xf32>
      %139 = vector.shape_cast %120 : vector<3x22xf32> to vector<1x3x22xf32>
      tpu.vector_store %arg8[%c1_36, %c19_37, %c0_38], %139 {strides = array<i32>} : memref<2x22x22xf32, #tpu.memory_space<vmem>>, vector<1x3x22xf32>,
      %c1_39 = arith.constant 1 : index
      %c0_40 = arith.constant 0 : index
      %c0_41 = arith.constant 0 : index
      %140 = vector.load %arg8[%c1_39, %c0_40, %c0_41] : memref<2x22x22xf32, #tpu.memory_space<vmem>>, vector<1x22x3xf32>
      %141 = vector.shape_cast %140 : vector<1x22x3xf32> to vector<22x3xf32>
      %142 = vector.shape_cast %121 : vector<22x3xf32> to vector<1x22x3xf32>
      tpu.vector_store %arg8[%c1_39, %c0_40, %c0_41], %142 {strides = array<i32>} : memref<2x22x22xf32, #tpu.memory_space<vmem>>, vector<1x22x3xf32>,
      %c1_42 = arith.constant 1 : index
      %c0_43 = arith.constant 0 : index
      %c19_44 = arith.constant 19 : index
      %143 = vector.load %arg8[%c1_42, %c0_43, %c19_44] : memref<2x22x22xf32, #tpu.memory_space<vmem>>, vector<1x22x3xf32>
      %144 = vector.shape_cast %143 : vector<1x22x3xf32> to vector<22x3xf32>
      %145 = vector.shape_cast %121 : vector<22x3xf32> to vector<1x22x3xf32>
      tpu.vector_store %arg8[%c1_42, %c0_43, %c19_44], %145 {strides = array<i32>} : memref<2x22x22xf32, #tpu.memory_space<vmem>>, vector<1x22x3xf32>,
      %c0_45 = arith.constant 0 : index
      %c0_46 = arith.constant 0 : index
      %c0_47 = arith.constant 0 : index
      %146 = vector.load %arg6[%c0_45, %c0_46, %c0_47] : memref<1x8x256xf32, #tpu.memory_space<vmem>>, vector<1x8x16xf32>
      %147 = vector.shape_cast %146 : vector<1x8x16xf32> to vector<8x16xf32>
      %c0_48 = arith.constant 0 : index
      %c0_49 = arith.constant 0 : index
      %c0_50 = arith.constant 0 : index
      %148 = vector.load %arg7[%c0_48, %c0_49, %c0_50] : memref<1x8x256xf32, #tpu.memory_space<vmem>>, vector<1x8x16xf32>
      %149 = vector.shape_cast %148 : vector<1x8x16xf32> to vector<8x16xf32>
      %cst_51 = arith.constant dense<0xFF800000> : vector<16xf32>
      %150 = vector.multi_reduction <maximumf>, %147, %cst_51 [0] : vector<8x16xf32> to vector<16xf32>
      %c0_52 = arith.constant 0 : index
      %c3_53 = arith.constant 3 : index
      %c3_54 = arith.constant 3 : index
      %151 = vector.load %arg8[%c0_52, %c3_53, %c3_54] : memref<2x22x22xf32, #tpu.memory_space<vmem>>, vector<1x1x16xf32>
      %152 = vector.shape_cast %151 : vector<1x1x16xf32> to vector<16xf32>
      %153 = vector.shape_cast %150 : vector<16xf32> to vector<1x1x16xf32>
      tpu.vector_store %arg8[%c0_52, %c3_53, %c3_54], %153 {strides = array<i32>} : memref<2x22x22xf32, #tpu.memory_space<vmem>>, vector<1x1x16xf32>,
      %cst_55 = arith.constant dense<0.000000e+00> : vector<16xf32>
      %154 = vector.multi_reduction <add>, %149, %cst_55 [0] : vector<8x16xf32> to vector<16xf32>
      %cst_56 = arith.constant 2.500000e-01 : f32
      %155 = vector.broadcast %cst_56 : f32 to vector<16xf32>
      %156 = arith.mulf %154, %155 : vector<16xf32>
      %c1_57 = arith.constant 1 : index
      %c3_58 = arith.constant 3 : index
      %c3_59 = arith.constant 3 : index
      %157 = vector.load %arg8[%c1_57, %c3_58, %c3_59] : memref<2x22x22xf32, #tpu.memory_space<vmem>>, vector<1x1x16xf32>
      %158 = vector.shape_cast %157 : vector<1x1x16xf32> to vector<16xf32>
      %159 = vector.shape_cast %156 : vector<16xf32> to vector<1x1x16xf32>
      tpu.vector_store %arg8[%c1_57, %c3_58, %c3_59], %159 {strides = array<i32>} : memref<2x22x22xf32, #tpu.memory_space<vmem>>, vector<1x1x16xf32>,
      %c0_60 = arith.constant 0 : index
      %c0_61 = arith.constant 0 : index
      %c16_62 = arith.constant 16 : index
      %160 = vector.load %arg6[%c0_60, %c0_61, %c16_62] : memref<1x8x256xf32, #tpu.memory_space<vmem>>, vector<1x8x16xf32>
      %161 = vector.shape_cast %160 : vector<1x8x16xf32> to vector<8x16xf32>
      %c0_63 = arith.constant 0 : index
      %c0_64 = arith.constant 0 : index
      %c16_65 = arith.constant 16 : index
      %162 = vector.load %arg7[%c0_63, %c0_64, %c16_65] : memref<1x8x256xf32, #tpu.memory_space<vmem>>, vector<1x8x16xf32>
      %163 = vector.shape_cast %162 : vector<1x8x16xf32> to vector<8x16xf32>
      %cst_66 = arith.constant dense<0xFF800000> : vector<16xf32>
      %164 = vector.multi_reduction <maximumf>, %161, %cst_66 [0] : vector<8x16xf32> to vector<16xf32>
      %c0_67 = arith.constant 0 : index
      %c4_68 = arith.constant 4 : index
      %c3_69 = arith.constant 3 : index
      %165 = vector.load %arg8[%c0_67, %c4_68, %c3_69] : memref<2x22x22xf32, #tpu.memory_space<vmem>>, vector<1x1x16xf32>
      %166 = vector.shape_cast %165 : vector<1x1x16xf32> to vector<16xf32>
      %167 = vector.shape_cast %164 : vector<16xf32> to vector<1x1x16xf32>
      tpu.vector_store %arg8[%c0_67, %c4_68, %c3_69], %167 {strides = array<i32>} : memref<2x22x22xf32, #tpu.memory_space<vmem>>, vector<1x1x16xf32>,
      %cst_70 = arith.constant dense<0.000000e+00> : vector<16xf32>
      %168 = vector.multi_reduction <add>, %163, %cst_70 [0] : vector<8x16xf32> to vector<16xf32>
      %cst_71 = arith.constant 2.500000e-01 : f32
      %169 = vector.broadcast %cst_71 : f32 to vector<16xf32>
      %170 = arith.mulf %168, %169 : vector<16xf32>
      %c1_72 = arith.constant 1 : index
      %c4_73 = arith.constant 4 : index
      %c3_74 = arith.constant 3 : index
      %171 = vector.load %arg8[%c1_72, %c4_73, %c3_74] : memref<2x22x22xf32, #tpu.memory_space<vmem>>, vector<1x1x16xf32>
      %172 = vector.shape_cast %171 : vector<1x1x16xf32> to vector<16xf32>
      %173 = vector.shape_cast %170 : vector<16xf32> to vector<1x1x16xf32>
      tpu.vector_store %arg8[%c1_72, %c4_73, %c3_74], %173 {strides = array<i32>} : memref<2x22x22xf32, #tpu.memory_space<vmem>>, vector<1x1x16xf32>,
      %c0_75 = arith.constant 0 : index
      %c0_76 = arith.constant 0 : index
      %c32_77 = arith.constant 32 : index
      %174 = vector.load %arg6[%c0_75, %c0_76, %c32_77] : memref<1x8x256xf32, #tpu.memory_space<vmem>>, vector<1x8x16xf32>
      %175 = vector.shape_cast %174 : vector<1x8x16xf32> to vector<8x16xf32>
      %c0_78 = arith.constant 0 : index
      %c0_79 = arith.constant 0 : index
      %c32_80 = arith.constant 32 : index
      %176 = vector.load %arg7[%c0_78, %c0_79, %c32_80] : memref<1x8x256xf32, #tpu.memory_space<vmem>>, vector<1x8x16xf32>
      %177 = vector.shape_cast %176 : vector<1x8x16xf32> to vector<8x16xf32>
      %cst_81 = arith.constant dense<0xFF800000> : vector<16xf32>
      %178 = vector.multi_reduction <maximumf>, %175, %cst_81 [0] : vector<8x16xf32> to vector<16xf32>
      %c0_82 = arith.constant 0 : index
      %c5_83 = arith.constant 5 : index
      %c3_84 = arith.constant 3 : index
      %179 = vector.load %arg8[%c0_82, %c5_83, %c3_84] : memref<2x22x22xf32, #tpu.memory_space<vmem>>, vector<1x1x16xf32>
      %180 = vector.shape_cast %179 : vector<1x1x16xf32> to vector<16xf32>
      %181 = vector.shape_cast %178 : vector<16xf32> to vector<1x1x16xf32>
      tpu.vector_store %arg8[%c0_82, %c5_83, %c3_84], %181 {strides = array<i32>} : memref<2x22x22xf32, #tpu.memory_space<vmem>>, vector<1x1x16xf32>,
      %cst_85 = arith.constant dense<0.000000e+00> : vector<16xf32>
      %182 = vector.multi_reduction <add>, %177, %cst_85 [0] : vector<8x16xf32> to vector<16xf32>
      %cst_86 = arith.constant 2.500000e-01 : f32
      %183 = vector.broadcast %cst_86 : f32 to vector<16xf32>
      %184 = arith.mulf %182, %183 : vector<16xf32>
      %c1_87 = arith.constant 1 : index
      %c5_88 = arith.constant 5 : index
      %c3_89 = arith.constant 3 : index
      %185 = vector.load %arg8[%c1_87, %c5_88, %c3_89] : memref<2x22x22xf32, #tpu.memory_space<vmem>>, vector<1x1x16xf32>
      %186 = vector.shape_cast %185 : vector<1x1x16xf32> to vector<16xf32>
      %187 = vector.shape_cast %184 : vector<16xf32> to vector<1x1x16xf32>
      tpu.vector_store %arg8[%c1_87, %c5_88, %c3_89], %187 {strides = array<i32>} : memref<2x22x22xf32, #tpu.memory_space<vmem>>, vector<1x1x16xf32>,
      %c0_90 = arith.constant 0 : index
      %c0_91 = arith.constant 0 : index
      %c48_92 = arith.constant 48 : index
      %188 = vector.load %arg6[%c0_90, %c0_91, %c48_92] : memref<1x8x256xf32, #tpu.memory_space<vmem>>, vector<1x8x16xf32>
      %189 = vector.shape_cast %188 : vector<1x8x16xf32> to vector<8x16xf32>
      %c0_93 = arith.constant 0 : index
      %c0_94 = arith.constant 0 : index
      %c48_95 = arith.constant 48 : index
      %190 = vector.load %arg7[%c0_93, %c0_94, %c48_95] : memref<1x8x256xf32, #tpu.memory_space<vmem>>, vector<1x8x16xf32>
      %191 = vector.shape_cast %190 : vector<1x8x16xf32> to vector<8x16xf32>
      %cst_96 = arith.constant dense<0xFF800000> : vector<16xf32>
      %192 = vector.multi_reduction <maximumf>, %189, %cst_96 [0] : vector<8x16xf32> to vector<16xf32>
      %c0_97 = arith.constant 0 : index
      %c6_98 = arith.constant 6 : index
      %c3_99 = arith.constant 3 : index
      %193 = vector.load %arg8[%c0_97, %c6_98, %c3_99] : memref<2x22x22xf32, #tpu.memory_space<vmem>>, vector<1x1x16xf32>
      %194 = vector.shape_cast %193 : vector<1x1x16xf32> to vector<16xf32>
      %195 = vector.shape_cast %192 : vector<16xf32> to vector<1x1x16xf32>
      tpu.vector_store %arg8[%c0_97, %c6_98, %c3_99], %195 {strides = array<i32>} : memref<2x22x22xf32, #tpu.memory_space<vmem>>, vector<1x1x16xf32>,
      %cst_100 = arith.constant dense<0.000000e+00> : vector<16xf32>
      %196 = vector.multi_reduction <add>, %191, %cst_100 [0] : vector<8x16xf32> to vector<16xf32>
      %cst_101 = arith.constant 2.500000e-01 : f32
      %197 = vector.broadcast %cst_101 : f32 to vector<16xf32>
      %198 = arith.mulf %196, %197 : vector<16xf32>
      %c1_102 = arith.constant 1 : index
      %c6_103 = arith.constant 6 : index
      %c3_104 = arith.constant 3 : index
      %199 = vector.load %arg8[%c1_102, %c6_103, %c3_104] : memref<2x22x22xf32, #tpu.memory_space<vmem>>, vector<1x1x16xf32>
      %200 = vector.shape_cast %199 : vector<1x1x16xf32> to vector<16xf32>
      %201 = vector.shape_cast %198 : vector<16xf32> to vector<1x1x16xf32>
      tpu.vector_store %arg8[%c1_102, %c6_103, %c3_104], %201 {strides = array<i32>} : memref<2x22x22xf32, #tpu.memory_space<vmem>>, vector<1x1x16xf32>,
      %c0_105 = arith.constant 0 : index
      %c0_106 = arith.constant 0 : index
      %c64_107 = arith.constant 64 : index
      %202 = vector.load %arg6[%c0_105, %c0_106, %c64_107] : memref<1x8x256xf32, #tpu.memory_space<vmem>>, vector<1x8x16xf32>
      %203 = vector.shape_cast %202 : vector<1x8x16xf32> to vector<8x16xf32>
      %c0_108 = arith.constant 0 : index
      %c0_109 = arith.constant 0 : index
      %c64_110 = arith.constant 64 : index
      %204 = vector.load %arg7[%c0_108, %c0_109, %c64_110] : memref<1x8x256xf32, #tpu.memory_space<vmem>>, vector<1x8x16xf32>
      %205 = vector.shape_cast %204 : vector<1x8x16xf32> to vector<8x16xf32>
      %cst_111 = arith.constant dense<0xFF800000> : vector<16xf32>
      %206 = vector.multi_reduction <maximumf>, %203, %cst_111 [0] : vector<8x16xf32> to vector<16xf32>
      %c0_112 = arith.constant 0 : index
      %c7_113 = arith.constant 7 : index
      %c3_114 = arith.constant 3 : index
      %207 = vector.load %arg8[%c0_112, %c7_113, %c3_114] : memref<2x22x22xf32, #tpu.memory_space<vmem>>, vector<1x1x16xf32>
      %208 = vector.shape_cast %207 : vector<1x1x16xf32> to vector<16xf32>
      %209 = vector.shape_cast %206 : vector<16xf32> to vector<1x1x16xf32>
      tpu.vector_store %arg8[%c0_112, %c7_113, %c3_114], %209 {strides = array<i32>} : memref<2x22x22xf32, #tpu.memory_space<vmem>>, vector<1x1x16xf32>,
      %cst_115 = arith.constant dense<0.000000e+00> : vector<16xf32>
      %210 = vector.multi_reduction <add>, %205, %cst_115 [0] : vector<8x16xf32> to vector<16xf32>
      %cst_116 = arith.constant 2.500000e-01 : f32
      %211 = vector.broadcast %cst_116 : f32 to vector<16xf32>
      %212 = arith.mulf %210, %211 : vector<16xf32>
      %c1_117 = arith.constant 1 : index
      %c7_118 = arith.constant 7 : index
      %c3_119 = arith.constant 3 : index
      %213 = vector.load %arg8[%c1_117, %c7_118, %c3_119] : memref<2x22x22xf32, #tpu.memory_space<vmem>>, vector<1x1x16xf32>
      %214 = vector.shape_cast %213 : vector<1x1x16xf32> to vector<16xf32>
      %215 = vector.shape_cast %212 : vector<16xf32> to vector<1x1x16xf32>
      tpu.vector_store %arg8[%c1_117, %c7_118, %c3_119], %215 {strides = array<i32>} : memref<2x22x22xf32, #tpu.memory_space<vmem>>, vector<1x1x16xf32>,
      %c0_120 = arith.constant 0 : index
      %c0_121 = arith.constant 0 : index
      %c80_122 = arith.constant 80 : index
      %216 = vector.load %arg6[%c0_120, %c0_121, %c80_122] : memref<1x8x256xf32, #tpu.memory_space<vmem>>, vector<1x8x16xf32>
      %217 = vector.shape_cast %216 : vector<1x8x16xf32> to vector<8x16xf32>
      %c0_123 = arith.constant 0 : index
      %c0_124 = arith.constant 0 : index
      %c80_125 = arith.constant 80 : index
      %218 = vector.load %arg7[%c0_123, %c0_124, %c80_125] : memref<1x8x256xf32, #tpu.memory_space<vmem>>, vector<1x8x16xf32>
      %219 = vector.shape_cast %218 : vector<1x8x16xf32> to vector<8x16xf32>
      %cst_126 = arith.constant dense<0xFF800000> : vector<16xf32>
      %220 = vector.multi_reduction <maximumf>, %217, %cst_126 [0] : vector<8x16xf32> to vector<16xf32>
      %c0_127 = arith.constant 0 : index
      %c8_128 = arith.constant 8 : index
      %c3_129 = arith.constant 3 : index
      %221 = vector.load %arg8[%c0_127, %c8_128, %c3_129] : memref<2x22x22xf32, #tpu.memory_space<vmem>>, vector<1x1x16xf32>
      %222 = vector.shape_cast %221 : vector<1x1x16xf32> to vector<16xf32>
      %223 = vector.shape_cast %220 : vector<16xf32> to vector<1x1x16xf32>
      tpu.vector_store %arg8[%c0_127, %c8_128, %c3_129], %223 {strides = array<i32>} : memref<2x22x22xf32, #tpu.memory_space<vmem>>, vector<1x1x16xf32>,
      %cst_130 = arith.constant dense<0.000000e+00> : vector<16xf32>
      %224 = vector.multi_reduction <add>, %219, %cst_130 [0] : vector<8x16xf32> to vector<16xf32>
      %cst_131 = arith.constant 2.500000e-01 : f32
      %225 = vector.broadcast %cst_131 : f32 to vector<16xf32>
      %226 = arith.mulf %224, %225 : vector<16xf32>
      %c1_132 = arith.constant 1 : index
      %c8_133 = arith.constant 8 : index
      %c3_134 = arith.constant 3 : index
      %227 = vector.load %arg8[%c1_132, %c8_133, %c3_134] : memref<2x22x22xf32, #tpu.memory_space<vmem>>, vector<1x1x16xf32>
      %228 = vector.shape_cast %227 : vector<1x1x16xf32> to vector<16xf32>
      %229 = vector.shape_cast %226 : vector<16xf32> to vector<1x1x16xf32>
      tpu.vector_store %arg8[%c1_132, %c8_133, %c3_134], %229 {strides = array<i32>} : memref<2x22x22xf32, #tpu.memory_space<vmem>>, vector<1x1x16xf32>,
      %c0_135 = arith.constant 0 : index
      %c0_136 = arith.constant 0 : index
      %c96_137 = arith.constant 96 : index
      %230 = vector.load %arg6[%c0_135, %c0_136, %c96_137] : memref<1x8x256xf32, #tpu.memory_space<vmem>>, vector<1x8x16xf32>
      %231 = vector.shape_cast %230 : vector<1x8x16xf32> to vector<8x16xf32>
      %c0_138 = arith.constant 0 : index
      %c0_139 = arith.constant 0 : index
      %c96_140 = arith.constant 96 : index
      %232 = vector.load %arg7[%c0_138, %c0_139, %c96_140] : memref<1x8x256xf32, #tpu.memory_space<vmem>>, vector<1x8x16xf32>
      %233 = vector.shape_cast %232 : vector<1x8x16xf32> to vector<8x16xf32>
      %cst_141 = arith.constant dense<0xFF800000> : vector<16xf32>
      %234 = vector.multi_reduction <maximumf>, %231, %cst_141 [0] : vector<8x16xf32> to vector<16xf32>
      %c0_142 = arith.constant 0 : index
      %c9_143 = arith.constant 9 : index
      %c3_144 = arith.constant 3 : index
      %235 = vector.load %arg8[%c0_142, %c9_143, %c3_144] : memref<2x22x22xf32, #tpu.memory_space<vmem>>, vector<1x1x16xf32>
      %236 = vector.shape_cast %235 : vector<1x1x16xf32> to vector<16xf32>
      %237 = vector.shape_cast %234 : vector<16xf32> to vector<1x1x16xf32>
      tpu.vector_store %arg8[%c0_142, %c9_143, %c3_144], %237 {strides = array<i32>} : memref<2x22x22xf32, #tpu.memory_space<vmem>>, vector<1x1x16xf32>,
      %cst_145 = arith.constant dense<0.000000e+00> : vector<16xf32>
      %238 = vector.multi_reduction <add>, %233, %cst_145 [0] : vector<8x16xf32> to vector<16xf32>
      %cst_146 = arith.constant 2.500000e-01 : f32
      %239 = vector.broadcast %cst_146 : f32 to vector<16xf32>
      %240 = arith.mulf %238, %239 : vector<16xf32>
      %c1_147 = arith.constant 1 : index
      %c9_148 = arith.constant 9 : index
      %c3_149 = arith.constant 3 : index
      %241 = vector.load %arg8[%c1_147, %c9_148, %c3_149] : memref<2x22x22xf32, #tpu.memory_space<vmem>>, vector<1x1x16xf32>
      %242 = vector.shape_cast %241 : vector<1x1x16xf32> to vector<16xf32>
      %243 = vector.shape_cast %240 : vector<16xf32> to vector<1x1x16xf32>
      tpu.vector_store %arg8[%c1_147, %c9_148, %c3_149], %243 {strides = array<i32>} : memref<2x22x22xf32, #tpu.memory_space<vmem>>, vector<1x1x16xf32>,
      %c0_150 = arith.constant 0 : index
      %c0_151 = arith.constant 0 : index
      %c112 = arith.constant 112 : index
      %244 = vector.load %arg6[%c0_150, %c0_151, %c112] : memref<1x8x256xf32, #tpu.memory_space<vmem>>, vector<1x8x16xf32>
      %245 = vector.shape_cast %244 : vector<1x8x16xf32> to vector<8x16xf32>
      %c0_152 = arith.constant 0 : index
      %c0_153 = arith.constant 0 : index
      %c112_154 = arith.constant 112 : index
      %246 = vector.load %arg7[%c0_152, %c0_153, %c112_154] : memref<1x8x256xf32, #tpu.memory_space<vmem>>, vector<1x8x16xf32>
      %247 = vector.shape_cast %246 : vector<1x8x16xf32> to vector<8x16xf32>
      %cst_155 = arith.constant dense<0xFF800000> : vector<16xf32>
      %248 = vector.multi_reduction <maximumf>, %245, %cst_155 [0] : vector<8x16xf32> to vector<16xf32>
      %c0_156 = arith.constant 0 : index
      %c10_157 = arith.constant 10 : index
      %c3_158 = arith.constant 3 : index
      %249 = vector.load %arg8[%c0_156, %c10_157, %c3_158] : memref<2x22x22xf32, #tpu.memory_space<vmem>>, vector<1x1x16xf32>
      %250 = vector.shape_cast %249 : vector<1x1x16xf32> to vector<16xf32>
      %251 = vector.shape_cast %248 : vector<16xf32> to vector<1x1x16xf32>
      tpu.vector_store %arg8[%c0_156, %c10_157, %c3_158], %251 {strides = array<i32>} : memref<2x22x22xf32, #tpu.memory_space<vmem>>, vector<1x1x16xf32>,
      %cst_159 = arith.constant dense<0.000000e+00> : vector<16xf32>
      %252 = vector.multi_reduction <add>, %247, %cst_159 [0] : vector<8x16xf32> to vector<16xf32>
      %cst_160 = arith.constant 2.500000e-01 : f32
      %253 = vector.broadcast %cst_160 : f32 to vector<16xf32>
      %254 = arith.mulf %252, %253 : vector<16xf32>
      %c1_161 = arith.constant 1 : index
      %c10_162 = arith.constant 10 : index
      %c3_163 = arith.constant 3 : index
      %255 = vector.load %arg8[%c1_161, %c10_162, %c3_163] : memref<2x22x22xf32, #tpu.memory_space<vmem>>, vector<1x1x16xf32>
      %256 = vector.shape_cast %255 : vector<1x1x16xf32> to vector<16xf32>
      %257 = vector.shape_cast %254 : vector<16xf32> to vector<1x1x16xf32>
      tpu.vector_store %arg8[%c1_161, %c10_162, %c3_163], %257 {strides = array<i32>} : memref<2x22x22xf32, #tpu.memory_space<vmem>>, vector<1x1x16xf32>,
      %c0_164 = arith.constant 0 : index
      %c0_165 = arith.constant 0 : index
      %c128 = arith.constant 128 : index
      %258 = vector.load %arg6[%c0_164, %c0_165, %c128] : memref<1x8x256xf32, #tpu.memory_space<vmem>>, vector<1x8x16xf32>
      %259 = vector.shape_cast %258 : vector<1x8x16xf32> to vector<8x16xf32>
      %c0_166 = arith.constant 0 : index
      %c0_167 = arith.constant 0 : index
      %c128_168 = arith.constant 128 : index
      %260 = vector.load %arg7[%c0_166, %c0_167, %c128_168] : memref<1x8x256xf32, #tpu.memory_space<vmem>>, vector<1x8x16xf32>
      %261 = vector.shape_cast %260 : vector<1x8x16xf32> to vector<8x16xf32>
      %cst_169 = arith.constant dense<0xFF800000> : vector<16xf32>
      %262 = vector.multi_reduction <maximumf>, %259, %cst_169 [0] : vector<8x16xf32> to vector<16xf32>
      %c0_170 = arith.constant 0 : index
      %c11_171 = arith.constant 11 : index
      %c3_172 = arith.constant 3 : index
      %263 = vector.load %arg8[%c0_170, %c11_171, %c3_172] : memref<2x22x22xf32, #tpu.memory_space<vmem>>, vector<1x1x16xf32>
      %264 = vector.shape_cast %263 : vector<1x1x16xf32> to vector<16xf32>
      %265 = vector.shape_cast %262 : vector<16xf32> to vector<1x1x16xf32>
      tpu.vector_store %arg8[%c0_170, %c11_171, %c3_172], %265 {strides = array<i32>} : memref<2x22x22xf32, #tpu.memory_space<vmem>>, vector<1x1x16xf32>,
      %cst_173 = arith.constant dense<0.000000e+00> : vector<16xf32>
      %266 = vector.multi_reduction <add>, %261, %cst_173 [0] : vector<8x16xf32> to vector<16xf32>
      %cst_174 = arith.constant 2.500000e-01 : f32
      %267 = vector.broadcast %cst_174 : f32 to vector<16xf32>
      %268 = arith.mulf %266, %267 : vector<16xf32>
      %c1_175 = arith.constant 1 : index
      %c11_176 = arith.constant 11 : index
      %c3_177 = arith.constant 3 : index
      %269 = vector.load %arg8[%c1_175, %c11_176, %c3_177] : memref<2x22x22xf32, #tpu.memory_space<vmem>>, vector<1x1x16xf32>
      %270 = vector.shape_cast %269 : vector<1x1x16xf32> to vector<16xf32>
      %271 = vector.shape_cast %268 : vector<16xf32> to vector<1x1x16xf32>
      tpu.vector_store %arg8[%c1_175, %c11_176, %c3_177], %271 {strides = array<i32>} : memref<2x22x22xf32, #tpu.memory_space<vmem>>, vector<1x1x16xf32>,
      %c0_178 = arith.constant 0 : index
      %c0_179 = arith.constant 0 : index
      %c144 = arith.constant 144 : index
      %272 = vector.load %arg6[%c0_178, %c0_179, %c144] : memref<1x8x256xf32, #tpu.memory_space<vmem>>, vector<1x8x16xf32>
      %273 = vector.shape_cast %272 : vector<1x8x16xf32> to vector<8x16xf32>
      %c0_180 = arith.constant 0 : index
      %c0_181 = arith.constant 0 : index
      %c144_182 = arith.constant 144 : index
      %274 = vector.load %arg7[%c0_180, %c0_181, %c144_182] : memref<1x8x256xf32, #tpu.memory_space<vmem>>, vector<1x8x16xf32>
      %275 = vector.shape_cast %274 : vector<1x8x16xf32> to vector<8x16xf32>
      %cst_183 = arith.constant dense<0xFF800000> : vector<16xf32>
      %276 = vector.multi_reduction <maximumf>, %273, %cst_183 [0] : vector<8x16xf32> to vector<16xf32>
      %c0_184 = arith.constant 0 : index
      %c12_185 = arith.constant 12 : index
      %c3_186 = arith.constant 3 : index
      %277 = vector.load %arg8[%c0_184, %c12_185, %c3_186] : memref<2x22x22xf32, #tpu.memory_space<vmem>>, vector<1x1x16xf32>
      %278 = vector.shape_cast %277 : vector<1x1x16xf32> to vector<16xf32>
      %279 = vector.shape_cast %276 : vector<16xf32> to vector<1x1x16xf32>
      tpu.vector_store %arg8[%c0_184, %c12_185, %c3_186], %279 {strides = array<i32>} : memref<2x22x22xf32, #tpu.memory_space<vmem>>, vector<1x1x16xf32>,
      %cst_187 = arith.constant dense<0.000000e+00> : vector<16xf32>
      %280 = vector.multi_reduction <add>, %275, %cst_187 [0] : vector<8x16xf32> to vector<16xf32>
      %cst_188 = arith.constant 2.500000e-01 : f32
      %281 = vector.broadcast %cst_188 : f32 to vector<16xf32>
      %282 = arith.mulf %280, %281 : vector<16xf32>
      %c1_189 = arith.constant 1 : index
      %c12_190 = arith.constant 12 : index
      %c3_191 = arith.constant 3 : index
      %283 = vector.load %arg8[%c1_189, %c12_190, %c3_191] : memref<2x22x22xf32, #tpu.memory_space<vmem>>, vector<1x1x16xf32>
      %284 = vector.shape_cast %283 : vector<1x1x16xf32> to vector<16xf32>
      %285 = vector.shape_cast %282 : vector<16xf32> to vector<1x1x16xf32>
      tpu.vector_store %arg8[%c1_189, %c12_190, %c3_191], %285 {strides = array<i32>} : memref<2x22x22xf32, #tpu.memory_space<vmem>>, vector<1x1x16xf32>,
      %c0_192 = arith.constant 0 : index
      %c0_193 = arith.constant 0 : index
      %c160 = arith.constant 160 : index
      %286 = vector.load %arg6[%c0_192, %c0_193, %c160] : memref<1x8x256xf32, #tpu.memory_space<vmem>>, vector<1x8x16xf32>
      %287 = vector.shape_cast %286 : vector<1x8x16xf32> to vector<8x16xf32>
      %c0_194 = arith.constant 0 : index
      %c0_195 = arith.constant 0 : index
      %c160_196 = arith.constant 160 : index
      %288 = vector.load %arg7[%c0_194, %c0_195, %c160_196] : memref<1x8x256xf32, #tpu.memory_space<vmem>>, vector<1x8x16xf32>
      %289 = vector.shape_cast %288 : vector<1x8x16xf32> to vector<8x16xf32>
      %cst_197 = arith.constant dense<0xFF800000> : vector<16xf32>
      %290 = vector.multi_reduction <maximumf>, %287, %cst_197 [0] : vector<8x16xf32> to vector<16xf32>
      %c0_198 = arith.constant 0 : index
      %c13_199 = arith.constant 13 : index
      %c3_200 = arith.constant 3 : index
      %291 = vector.load %arg8[%c0_198, %c13_199, %c3_200] : memref<2x22x22xf32, #tpu.memory_space<vmem>>, vector<1x1x16xf32>
      %292 = vector.shape_cast %291 : vector<1x1x16xf32> to vector<16xf32>
      %293 = vector.shape_cast %290 : vector<16xf32> to vector<1x1x16xf32>
      tpu.vector_store %arg8[%c0_198, %c13_199, %c3_200], %293 {strides = array<i32>} : memref<2x22x22xf32, #tpu.memory_space<vmem>>, vector<1x1x16xf32>,
      %cst_201 = arith.constant dense<0.000000e+00> : vector<16xf32>
      %294 = vector.multi_reduction <add>, %289, %cst_201 [0] : vector<8x16xf32> to vector<16xf32>
      %cst_202 = arith.constant 2.500000e-01 : f32
      %295 = vector.broadcast %cst_202 : f32 to vector<16xf32>
      %296 = arith.mulf %294, %295 : vector<16xf32>
      %c1_203 = arith.constant 1 : index
      %c13_204 = arith.constant 13 : index
      %c3_205 = arith.constant 3 : index
      %297 = vector.load %arg8[%c1_203, %c13_204, %c3_205] : memref<2x22x22xf32, #tpu.memory_space<vmem>>, vector<1x1x16xf32>
      %298 = vector.shape_cast %297 : vector<1x1x16xf32> to vector<16xf32>
      %299 = vector.shape_cast %296 : vector<16xf32> to vector<1x1x16xf32>
      tpu.vector_store %arg8[%c1_203, %c13_204, %c3_205], %299 {strides = array<i32>} : memref<2x22x22xf32, #tpu.memory_space<vmem>>, vector<1x1x16xf32>,
      %c0_206 = arith.constant 0 : index
      %c0_207 = arith.constant 0 : index
      %c176 = arith.constant 176 : index
      %300 = vector.load %arg6[%c0_206, %c0_207, %c176] : memref<1x8x256xf32, #tpu.memory_space<vmem>>, vector<1x8x16xf32>
      %301 = vector.shape_cast %300 : vector<1x8x16xf32> to vector<8x16xf32>
      %c0_208 = arith.constant 0 : index
      %c0_209 = arith.constant 0 : index
      %c176_210 = arith.constant 176 : index
      %302 = vector.load %arg7[%c0_208, %c0_209, %c176_210] : memref<1x8x256xf32, #tpu.memory_space<vmem>>, vector<1x8x16xf32>
      %303 = vector.shape_cast %302 : vector<1x8x16xf32> to vector<8x16xf32>
      %cst_211 = arith.constant dense<0xFF800000> : vector<16xf32>
      %304 = vector.multi_reduction <maximumf>, %301, %cst_211 [0] : vector<8x16xf32> to vector<16xf32>
      %c0_212 = arith.constant 0 : index
      %c14_213 = arith.constant 14 : index
      %c3_214 = arith.constant 3 : index
      %305 = vector.load %arg8[%c0_212, %c14_213, %c3_214] : memref<2x22x22xf32, #tpu.memory_space<vmem>>, vector<1x1x16xf32>
      %306 = vector.shape_cast %305 : vector<1x1x16xf32> to vector<16xf32>
      %307 = vector.shape_cast %304 : vector<16xf32> to vector<1x1x16xf32>
      tpu.vector_store %arg8[%c0_212, %c14_213, %c3_214], %307 {strides = array<i32>} : memref<2x22x22xf32, #tpu.memory_space<vmem>>, vector<1x1x16xf32>,
      %cst_215 = arith.constant dense<0.000000e+00> : vector<16xf32>
      %308 = vector.multi_reduction <add>, %303, %cst_215 [0] : vector<8x16xf32> to vector<16xf32>
      %cst_216 = arith.constant 2.500000e-01 : f32
      %309 = vector.broadcast %cst_216 : f32 to vector<16xf32>
      %310 = arith.mulf %308, %309 : vector<16xf32>
      %c1_217 = arith.constant 1 : index
      %c14_218 = arith.constant 14 : index
      %c3_219 = arith.constant 3 : index
      %311 = vector.load %arg8[%c1_217, %c14_218, %c3_219] : memref<2x22x22xf32, #tpu.memory_space<vmem>>, vector<1x1x16xf32>
      %312 = vector.shape_cast %311 : vector<1x1x16xf32> to vector<16xf32>
      %313 = vector.shape_cast %310 : vector<16xf32> to vector<1x1x16xf32>
      tpu.vector_store %arg8[%c1_217, %c14_218, %c3_219], %313 {strides = array<i32>} : memref<2x22x22xf32, #tpu.memory_space<vmem>>, vector<1x1x16xf32>,
      %c0_220 = arith.constant 0 : index
      %c0_221 = arith.constant 0 : index
      %c192 = arith.constant 192 : index
      %314 = vector.load %arg6[%c0_220, %c0_221, %c192] : memref<1x8x256xf32, #tpu.memory_space<vmem>>, vector<1x8x16xf32>
      %315 = vector.shape_cast %314 : vector<1x8x16xf32> to vector<8x16xf32>
      %c0_222 = arith.constant 0 : index
      %c0_223 = arith.constant 0 : index
      %c192_224 = arith.constant 192 : index
      %316 = vector.load %arg7[%c0_222, %c0_223, %c192_224] : memref<1x8x256xf32, #tpu.memory_space<vmem>>, vector<1x8x16xf32>
      %317 = vector.shape_cast %316 : vector<1x8x16xf32> to vector<8x16xf32>
      %cst_225 = arith.constant dense<0xFF800000> : vector<16xf32>
      %318 = vector.multi_reduction <maximumf>, %315, %cst_225 [0] : vector<8x16xf32> to vector<16xf32>
      %c0_226 = arith.constant 0 : index
      %c15_227 = arith.constant 15 : index
      %c3_228 = arith.constant 3 : index
      %319 = vector.load %arg8[%c0_226, %c15_227, %c3_228] : memref<2x22x22xf32, #tpu.memory_space<vmem>>, vector<1x1x16xf32>
      %320 = vector.shape_cast %319 : vector<1x1x16xf32> to vector<16xf32>
      %321 = vector.shape_cast %318 : vector<16xf32> to vector<1x1x16xf32>
      tpu.vector_store %arg8[%c0_226, %c15_227, %c3_228], %321 {strides = array<i32>} : memref<2x22x22xf32, #tpu.memory_space<vmem>>, vector<1x1x16xf32>,
      %cst_229 = arith.constant dense<0.000000e+00> : vector<16xf32>
      %322 = vector.multi_reduction <add>, %317, %cst_229 [0] : vector<8x16xf32> to vector<16xf32>
      %cst_230 = arith.constant 2.500000e-01 : f32
      %323 = vector.broadcast %cst_230 : f32 to vector<16xf32>
      %324 = arith.mulf %322, %323 : vector<16xf32>
      %c1_231 = arith.constant 1 : index
      %c15_232 = arith.constant 15 : index
      %c3_233 = arith.constant 3 : index
      %325 = vector.load %arg8[%c1_231, %c15_232, %c3_233] : memref<2x22x22xf32, #tpu.memory_space<vmem>>, vector<1x1x16xf32>
      %326 = vector.shape_cast %325 : vector<1x1x16xf32> to vector<16xf32>
      %327 = vector.shape_cast %324 : vector<16xf32> to vector<1x1x16xf32>
      tpu.vector_store %arg8[%c1_231, %c15_232, %c3_233], %327 {strides = array<i32>} : memref<2x22x22xf32, #tpu.memory_space<vmem>>, vector<1x1x16xf32>,
      %c0_234 = arith.constant 0 : index
      %c0_235 = arith.constant 0 : index
      %c208 = arith.constant 208 : index
      %328 = vector.load %arg6[%c0_234, %c0_235, %c208] : memref<1x8x256xf32, #tpu.memory_space<vmem>>, vector<1x8x16xf32>
      %329 = vector.shape_cast %328 : vector<1x8x16xf32> to vector<8x16xf32>
      %c0_236 = arith.constant 0 : index
      %c0_237 = arith.constant 0 : index
      %c208_238 = arith.constant 208 : index
      %330 = vector.load %arg7[%c0_236, %c0_237, %c208_238] : memref<1x8x256xf32, #tpu.memory_space<vmem>>, vector<1x8x16xf32>
      %331 = vector.shape_cast %330 : vector<1x8x16xf32> to vector<8x16xf32>
      %cst_239 = arith.constant dense<0xFF800000> : vector<16xf32>
      %332 = vector.multi_reduction <maximumf>, %329, %cst_239 [0] : vector<8x16xf32> to vector<16xf32>
      %c0_240 = arith.constant 0 : index
      %c16_241 = arith.constant 16 : index
      %c3_242 = arith.constant 3 : index
      %333 = vector.load %arg8[%c0_240, %c16_241, %c3_242] : memref<2x22x22xf32, #tpu.memory_space<vmem>>, vector<1x1x16xf32>
      %334 = vector.shape_cast %333 : vector<1x1x16xf32> to vector<16xf32>
      %335 = vector.shape_cast %332 : vector<16xf32> to vector<1x1x16xf32>
      tpu.vector_store %arg8[%c0_240, %c16_241, %c3_242], %335 {strides = array<i32>} : memref<2x22x22xf32, #tpu.memory_space<vmem>>, vector<1x1x16xf32>,
      %cst_243 = arith.constant dense<0.000000e+00> : vector<16xf32>
      %336 = vector.multi_reduction <add>, %331, %cst_243 [0] : vector<8x16xf32> to vector<16xf32>
      %cst_244 = arith.constant 2.500000e-01 : f32
      %337 = vector.broadcast %cst_244 : f32 to vector<16xf32>
      %338 = arith.mulf %336, %337 : vector<16xf32>
      %c1_245 = arith.constant 1 : index
      %c16_246 = arith.constant 16 : index
      %c3_247 = arith.constant 3 : index
      %339 = vector.load %arg8[%c1_245, %c16_246, %c3_247] : memref<2x22x22xf32, #tpu.memory_space<vmem>>, vector<1x1x16xf32>
      %340 = vector.shape_cast %339 : vector<1x1x16xf32> to vector<16xf32>
      %341 = vector.shape_cast %338 : vector<16xf32> to vector<1x1x16xf32>
      tpu.vector_store %arg8[%c1_245, %c16_246, %c3_247], %341 {strides = array<i32>} : memref<2x22x22xf32, #tpu.memory_space<vmem>>, vector<1x1x16xf32>,
      %c0_248 = arith.constant 0 : index
      %c0_249 = arith.constant 0 : index
      %c224 = arith.constant 224 : index
      %342 = vector.load %arg6[%c0_248, %c0_249, %c224] : memref<1x8x256xf32, #tpu.memory_space<vmem>>, vector<1x8x16xf32>
      %343 = vector.shape_cast %342 : vector<1x8x16xf32> to vector<8x16xf32>
      %c0_250 = arith.constant 0 : index
      %c0_251 = arith.constant 0 : index
      %c224_252 = arith.constant 224 : index
      %344 = vector.load %arg7[%c0_250, %c0_251, %c224_252] : memref<1x8x256xf32, #tpu.memory_space<vmem>>, vector<1x8x16xf32>
      %345 = vector.shape_cast %344 : vector<1x8x16xf32> to vector<8x16xf32>
      %cst_253 = arith.constant dense<0xFF800000> : vector<16xf32>
      %346 = vector.multi_reduction <maximumf>, %343, %cst_253 [0] : vector<8x16xf32> to vector<16xf32>
      %c0_254 = arith.constant 0 : index
      %c17_255 = arith.constant 17 : index
      %c3_256 = arith.constant 3 : index
      %347 = vector.load %arg8[%c0_254, %c17_255, %c3_256] : memref<2x22x22xf32, #tpu.memory_space<vmem>>, vector<1x1x16xf32>
      %348 = vector.shape_cast %347 : vector<1x1x16xf32> to vector<16xf32>
      %349 = vector.shape_cast %346 : vector<16xf32> to vector<1x1x16xf32>
      tpu.vector_store %arg8[%c0_254, %c17_255, %c3_256], %349 {strides = array<i32>} : memref<2x22x22xf32, #tpu.memory_space<vmem>>, vector<1x1x16xf32>,
      %cst_257 = arith.constant dense<0.000000e+00> : vector<16xf32>
      %350 = vector.multi_reduction <add>, %345, %cst_257 [0] : vector<8x16xf32> to vector<16xf32>
      %cst_258 = arith.constant 2.500000e-01 : f32
      %351 = vector.broadcast %cst_258 : f32 to vector<16xf32>
      %352 = arith.mulf %350, %351 : vector<16xf32>
      %c1_259 = arith.constant 1 : index
      %c17_260 = arith.constant 17 : index
      %c3_261 = arith.constant 3 : index
      %353 = vector.load %arg8[%c1_259, %c17_260, %c3_261] : memref<2x22x22xf32, #tpu.memory_space<vmem>>, vector<1x1x16xf32>
      %354 = vector.shape_cast %353 : vector<1x1x16xf32> to vector<16xf32>
      %355 = vector.shape_cast %352 : vector<16xf32> to vector<1x1x16xf32>
      tpu.vector_store %arg8[%c1_259, %c17_260, %c3_261], %355 {strides = array<i32>} : memref<2x22x22xf32, #tpu.memory_space<vmem>>, vector<1x1x16xf32>,
      %c0_262 = arith.constant 0 : index
      %c0_263 = arith.constant 0 : index
      %c240 = arith.constant 240 : index
      %356 = vector.load %arg6[%c0_262, %c0_263, %c240] : memref<1x8x256xf32, #tpu.memory_space<vmem>>, vector<1x8x16xf32>
      %357 = vector.shape_cast %356 : vector<1x8x16xf32> to vector<8x16xf32>
      %c0_264 = arith.constant 0 : index
      %c0_265 = arith.constant 0 : index
      %c240_266 = arith.constant 240 : index
      %358 = vector.load %arg7[%c0_264, %c0_265, %c240_266] : memref<1x8x256xf32, #tpu.memory_space<vmem>>, vector<1x8x16xf32>
      %359 = vector.shape_cast %358 : vector<1x8x16xf32> to vector<8x16xf32>
      %cst_267 = arith.constant dense<0xFF800000> : vector<16xf32>
      %360 = vector.multi_reduction <maximumf>, %357, %cst_267 [0] : vector<8x16xf32> to vector<16xf32>
      %c0_268 = arith.constant 0 : index
      %c18_269 = arith.constant 18 : index
      %c3_270 = arith.constant 3 : index
      %361 = vector.load %arg8[%c0_268, %c18_269, %c3_270] : memref<2x22x22xf32, #tpu.memory_space<vmem>>, vector<1x1x16xf32>
      %362 = vector.shape_cast %361 : vector<1x1x16xf32> to vector<16xf32>
      %363 = vector.shape_cast %360 : vector<16xf32> to vector<1x1x16xf32>
      tpu.vector_store %arg8[%c0_268, %c18_269, %c3_270], %363 {strides = array<i32>} : memref<2x22x22xf32, #tpu.memory_space<vmem>>, vector<1x1x16xf32>,
      %cst_271 = arith.constant dense<0.000000e+00> : vector<16xf32>
      %364 = vector.multi_reduction <add>, %359, %cst_271 [0] : vector<8x16xf32> to vector<16xf32>
      %cst_272 = arith.constant 2.500000e-01 : f32
      %365 = vector.broadcast %cst_272 : f32 to vector<16xf32>
      %366 = arith.mulf %364, %365 : vector<16xf32>
      %c1_273 = arith.constant 1 : index
      %c18_274 = arith.constant 18 : index
      %c3_275 = arith.constant 3 : index
      %367 = vector.load %arg8[%c1_273, %c18_274, %c3_275] : memref<2x22x22xf32, #tpu.memory_space<vmem>>, vector<1x1x16xf32>
      %368 = vector.shape_cast %367 : vector<1x1x16xf32> to vector<16xf32>
      %369 = vector.shape_cast %366 : vector<16xf32> to vector<1x1x16xf32>
      tpu.vector_store %arg8[%c1_273, %c18_274, %c3_275], %369 {strides = array<i32>} : memref<2x22x22xf32, #tpu.memory_space<vmem>>, vector<1x1x16xf32>,
      %cst_276 = arith.constant 0.000000e+00 : f32
      %370 = vector.broadcast %cst_276 : f32 to vector<16x16xf32>
      %cst_277 = arith.constant 0.000000e+00 : f32
      %371 = vector.broadcast %cst_277 : f32 to vector<16x16xf32>
      %cst_278 = arith.constant 0.000000e+00 : f32
      %372 = vector.broadcast %cst_278 : f32 to vector<16x16xf32>
      %cst_279 = arith.constant 0.000000e+00 : f32
      %373 = vector.broadcast %cst_279 : f32 to vector<16x16xf32>
      %c0_280 = arith.constant 0 : index
      %c0_281 = arith.constant 0 : index
      %c0_282 = arith.constant 0 : index
      %374 = vector.load %arg8[%c0_280, %c0_281, %c0_282] : memref<2x22x22xf32, #tpu.memory_space<vmem>>, vector<1x16x16xf32>
      %375 = vector.shape_cast %374 : vector<1x16x16xf32> to vector<16x16xf32>
      %376 = vector.broadcast %22 : f32 to vector<16x16xf32>
      %377 = arith.mulf %375, %376 : vector<16x16xf32>
      %378 = arith.addf %370, %377 : vector<16x16xf32>
      %c0_283 = arith.constant 0 : index
      %c0_284 = arith.constant 0 : index
      %c1_285 = arith.constant 1 : index
      %379 = vector.load %arg8[%c0_283, %c0_284, %c1_285] : memref<2x22x22xf32, #tpu.memory_space<vmem>>, vector<1x16x16xf32>
      %380 = vector.shape_cast %379 : vector<1x16x16xf32> to vector<16x16xf32>
      %381 = vector.broadcast %23 : f32 to vector<16x16xf32>
      %382 = arith.mulf %380, %381 : vector<16x16xf32>
      %383 = arith.addf %378, %382 : vector<16x16xf32>
      %c0_286 = arith.constant 0 : index
      %c0_287 = arith.constant 0 : index
      %c2_288 = arith.constant 2 : index
      %384 = vector.load %arg8[%c0_286, %c0_287, %c2_288] : memref<2x22x22xf32, #tpu.memory_space<vmem>>, vector<1x16x16xf32>
      %385 = vector.shape_cast %384 : vector<1x16x16xf32> to vector<16x16xf32>
      %386 = vector.broadcast %24 : f32 to vector<16x16xf32>
      %387 = arith.mulf %385, %386 : vector<16x16xf32>
      %388 = arith.addf %383, %387 : vector<16x16xf32>
      %c0_289 = arith.constant 0 : index
      %c0_290 = arith.constant 0 : index
      %c3_291 = arith.constant 3 : index
      %389 = vector.load %arg8[%c0_289, %c0_290, %c3_291] : memref<2x22x22xf32, #tpu.memory_space<vmem>>, vector<1x16x16xf32>
      %390 = vector.shape_cast %389 : vector<1x16x16xf32> to vector<16x16xf32>
      %391 = vector.broadcast %25 : f32 to vector<16x16xf32>
      %392 = arith.mulf %390, %391 : vector<16x16xf32>
      %393 = arith.addf %388, %392 : vector<16x16xf32>
      %c0_292 = arith.constant 0 : index
      %c0_293 = arith.constant 0 : index
      %c4_294 = arith.constant 4 : index
      %394 = vector.load %arg8[%c0_292, %c0_293, %c4_294] : memref<2x22x22xf32, #tpu.memory_space<vmem>>, vector<1x16x16xf32>
      %395 = vector.shape_cast %394 : vector<1x16x16xf32> to vector<16x16xf32>
      %396 = vector.broadcast %26 : f32 to vector<16x16xf32>
      %397 = arith.mulf %395, %396 : vector<16x16xf32>
      %398 = arith.addf %393, %397 : vector<16x16xf32>
      %c0_295 = arith.constant 0 : index
      %c0_296 = arith.constant 0 : index
      %c5_297 = arith.constant 5 : index
      %399 = vector.load %arg8[%c0_295, %c0_296, %c5_297] : memref<2x22x22xf32, #tpu.memory_space<vmem>>, vector<1x16x16xf32>
      %400 = vector.shape_cast %399 : vector<1x16x16xf32> to vector<16x16xf32>
      %401 = vector.broadcast %27 : f32 to vector<16x16xf32>
      %402 = arith.mulf %400, %401 : vector<16x16xf32>
      %403 = arith.addf %398, %402 : vector<16x16xf32>
      %c0_298 = arith.constant 0 : index
      %c0_299 = arith.constant 0 : index
      %c6_300 = arith.constant 6 : index
      %404 = vector.load %arg8[%c0_298, %c0_299, %c6_300] : memref<2x22x22xf32, #tpu.memory_space<vmem>>, vector<1x16x16xf32>
      %405 = vector.shape_cast %404 : vector<1x16x16xf32> to vector<16x16xf32>
      %406 = vector.broadcast %28 : f32 to vector<16x16xf32>
      %407 = arith.mulf %405, %406 : vector<16x16xf32>
      %408 = arith.addf %403, %407 : vector<16x16xf32>
      %c0_301 = arith.constant 0 : index
      %c1_302 = arith.constant 1 : index
      %c0_303 = arith.constant 0 : index
      %409 = vector.load %arg8[%c0_301, %c1_302, %c0_303] : memref<2x22x22xf32, #tpu.memory_space<vmem>>, vector<1x16x16xf32>
      %410 = vector.shape_cast %409 : vector<1x16x16xf32> to vector<16x16xf32>
      %411 = vector.broadcast %29 : f32 to vector<16x16xf32>
      %412 = arith.mulf %410, %411 : vector<16x16xf32>
      %413 = arith.addf %371, %412 : vector<16x16xf32>
      %c0_304 = arith.constant 0 : index
      %c1_305 = arith.constant 1 : index
      %c1_306 = arith.constant 1 : index
      %414 = vector.load %arg8[%c0_304, %c1_305, %c1_306] : memref<2x22x22xf32, #tpu.memory_space<vmem>>, vector<1x16x16xf32>
      %415 = vector.shape_cast %414 : vector<1x16x16xf32> to vector<16x16xf32>
      %416 = vector.broadcast %30 : f32 to vector<16x16xf32>
      %417 = arith.mulf %415, %416 : vector<16x16xf32>
      %418 = arith.addf %413, %417 : vector<16x16xf32>
      %c0_307 = arith.constant 0 : index
      %c1_308 = arith.constant 1 : index
      %c2_309 = arith.constant 2 : index
      %419 = vector.load %arg8[%c0_307, %c1_308, %c2_309] : memref<2x22x22xf32, #tpu.memory_space<vmem>>, vector<1x16x16xf32>
      %420 = vector.shape_cast %419 : vector<1x16x16xf32> to vector<16x16xf32>
      %421 = vector.broadcast %31 : f32 to vector<16x16xf32>
      %422 = arith.mulf %420, %421 : vector<16x16xf32>
      %423 = arith.addf %418, %422 : vector<16x16xf32>
      %c0_310 = arith.constant 0 : index
      %c1_311 = arith.constant 1 : index
      %c3_312 = arith.constant 3 : index
      %424 = vector.load %arg8[%c0_310, %c1_311, %c3_312] : memref<2x22x22xf32, #tpu.memory_space<vmem>>, vector<1x16x16xf32>
      %425 = vector.shape_cast %424 : vector<1x16x16xf32> to vector<16x16xf32>
      %426 = vector.broadcast %32 : f32 to vector<16x16xf32>
      %427 = arith.mulf %425, %426 : vector<16x16xf32>
      %428 = arith.addf %423, %427 : vector<16x16xf32>
      %c0_313 = arith.constant 0 : index
      %c1_314 = arith.constant 1 : index
      %c4_315 = arith.constant 4 : index
      %429 = vector.load %arg8[%c0_313, %c1_314, %c4_315] : memref<2x22x22xf32, #tpu.memory_space<vmem>>, vector<1x16x16xf32>
      %430 = vector.shape_cast %429 : vector<1x16x16xf32> to vector<16x16xf32>
      %431 = vector.broadcast %33 : f32 to vector<16x16xf32>
      %432 = arith.mulf %430, %431 : vector<16x16xf32>
      %433 = arith.addf %428, %432 : vector<16x16xf32>
      %c0_316 = arith.constant 0 : index
      %c1_317 = arith.constant 1 : index
      %c5_318 = arith.constant 5 : index
      %434 = vector.load %arg8[%c0_316, %c1_317, %c5_318] : memref<2x22x22xf32, #tpu.memory_space<vmem>>, vector<1x16x16xf32>
      %435 = vector.shape_cast %434 : vector<1x16x16xf32> to vector<16x16xf32>
      %436 = vector.broadcast %34 : f32 to vector<16x16xf32>
      %437 = arith.mulf %435, %436 : vector<16x16xf32>
      %438 = arith.addf %433, %437 : vector<16x16xf32>
      %c0_319 = arith.constant 0 : index
      %c1_320 = arith.constant 1 : index
      %c6_321 = arith.constant 6 : index
      %439 = vector.load %arg8[%c0_319, %c1_320, %c6_321] : memref<2x22x22xf32, #tpu.memory_space<vmem>>, vector<1x16x16xf32>
      %440 = vector.shape_cast %439 : vector<1x16x16xf32> to vector<16x16xf32>
      %441 = vector.broadcast %35 : f32 to vector<16x16xf32>
      %442 = arith.mulf %440, %441 : vector<16x16xf32>
      %443 = arith.addf %438, %442 : vector<16x16xf32>
      %c0_322 = arith.constant 0 : index
      %c2_323 = arith.constant 2 : index
      %c0_324 = arith.constant 0 : index
      %444 = vector.load %arg8[%c0_322, %c2_323, %c0_324] : memref<2x22x22xf32, #tpu.memory_space<vmem>>, vector<1x16x16xf32>
      %445 = vector.shape_cast %444 : vector<1x16x16xf32> to vector<16x16xf32>
      %446 = vector.broadcast %36 : f32 to vector<16x16xf32>
      %447 = arith.mulf %445, %446 : vector<16x16xf32>
      %448 = arith.addf %408, %447 : vector<16x16xf32>
      %c0_325 = arith.constant 0 : index
      %c2_326 = arith.constant 2 : index
      %c1_327 = arith.constant 1 : index
      %449 = vector.load %arg8[%c0_325, %c2_326, %c1_327] : memref<2x22x22xf32, #tpu.memory_space<vmem>>, vector<1x16x16xf32>
      %450 = vector.shape_cast %449 : vector<1x16x16xf32> to vector<16x16xf32>
      %451 = vector.broadcast %37 : f32 to vector<16x16xf32>
      %452 = arith.mulf %450, %451 : vector<16x16xf32>
      %453 = arith.addf %448, %452 : vector<16x16xf32>
      %c0_328 = arith.constant 0 : index
      %c2_329 = arith.constant 2 : index
      %c2_330 = arith.constant 2 : index
      %454 = vector.load %arg8[%c0_328, %c2_329, %c2_330] : memref<2x22x22xf32, #tpu.memory_space<vmem>>, vector<1x16x16xf32>
      %455 = vector.shape_cast %454 : vector<1x16x16xf32> to vector<16x16xf32>
      %456 = vector.broadcast %38 : f32 to vector<16x16xf32>
      %457 = arith.mulf %455, %456 : vector<16x16xf32>
      %458 = arith.addf %453, %457 : vector<16x16xf32>
      %c0_331 = arith.constant 0 : index
      %c2_332 = arith.constant 2 : index
      %c3_333 = arith.constant 3 : index
      %459 = vector.load %arg8[%c0_331, %c2_332, %c3_333] : memref<2x22x22xf32, #tpu.memory_space<vmem>>, vector<1x16x16xf32>
      %460 = vector.shape_cast %459 : vector<1x16x16xf32> to vector<16x16xf32>
      %461 = vector.broadcast %39 : f32 to vector<16x16xf32>
      %462 = arith.mulf %460, %461 : vector<16x16xf32>
      %463 = arith.addf %458, %462 : vector<16x16xf32>
      %c0_334 = arith.constant 0 : index
      %c2_335 = arith.constant 2 : index
      %c4_336 = arith.constant 4 : index
      %464 = vector.load %arg8[%c0_334, %c2_335, %c4_336] : memref<2x22x22xf32, #tpu.memory_space<vmem>>, vector<1x16x16xf32>
      %465 = vector.shape_cast %464 : vector<1x16x16xf32> to vector<16x16xf32>
      %466 = vector.broadcast %40 : f32 to vector<16x16xf32>
      %467 = arith.mulf %465, %466 : vector<16x16xf32>
      %468 = arith.addf %463, %467 : vector<16x16xf32>
      %c0_337 = arith.constant 0 : index
      %c2_338 = arith.constant 2 : index
      %c5_339 = arith.constant 5 : index
      %469 = vector.load %arg8[%c0_337, %c2_338, %c5_339] : memref<2x22x22xf32, #tpu.memory_space<vmem>>, vector<1x16x16xf32>
      %470 = vector.shape_cast %469 : vector<1x16x16xf32> to vector<16x16xf32>
      %471 = vector.broadcast %41 : f32 to vector<16x16xf32>
      %472 = arith.mulf %470, %471 : vector<16x16xf32>
      %473 = arith.addf %468, %472 : vector<16x16xf32>
      %c0_340 = arith.constant 0 : index
      %c2_341 = arith.constant 2 : index
      %c6_342 = arith.constant 6 : index
      %474 = vector.load %arg8[%c0_340, %c2_341, %c6_342] : memref<2x22x22xf32, #tpu.memory_space<vmem>>, vector<1x16x16xf32>
      %475 = vector.shape_cast %474 : vector<1x16x16xf32> to vector<16x16xf32>
      %476 = vector.broadcast %42 : f32 to vector<16x16xf32>
      %477 = arith.mulf %475, %476 : vector<16x16xf32>
      %478 = arith.addf %473, %477 : vector<16x16xf32>
      %c0_343 = arith.constant 0 : index
      %c3_344 = arith.constant 3 : index
      %c0_345 = arith.constant 0 : index
      %479 = vector.load %arg8[%c0_343, %c3_344, %c0_345] : memref<2x22x22xf32, #tpu.memory_space<vmem>>, vector<1x16x16xf32>
      %480 = vector.shape_cast %479 : vector<1x16x16xf32> to vector<16x16xf32>
      %481 = vector.broadcast %43 : f32 to vector<16x16xf32>
      %482 = arith.mulf %480, %481 : vector<16x16xf32>
      %483 = arith.addf %443, %482 : vector<16x16xf32>
      %c0_346 = arith.constant 0 : index
      %c3_347 = arith.constant 3 : index
      %c1_348 = arith.constant 1 : index
      %484 = vector.load %arg8[%c0_346, %c3_347, %c1_348] : memref<2x22x22xf32, #tpu.memory_space<vmem>>, vector<1x16x16xf32>
      %485 = vector.shape_cast %484 : vector<1x16x16xf32> to vector<16x16xf32>
      %486 = vector.broadcast %44 : f32 to vector<16x16xf32>
      %487 = arith.mulf %485, %486 : vector<16x16xf32>
      %488 = arith.addf %483, %487 : vector<16x16xf32>
      %c0_349 = arith.constant 0 : index
      %c3_350 = arith.constant 3 : index
      %c2_351 = arith.constant 2 : index
      %489 = vector.load %arg8[%c0_349, %c3_350, %c2_351] : memref<2x22x22xf32, #tpu.memory_space<vmem>>, vector<1x16x16xf32>
      %490 = vector.shape_cast %489 : vector<1x16x16xf32> to vector<16x16xf32>
      %491 = vector.broadcast %45 : f32 to vector<16x16xf32>
      %492 = arith.mulf %490, %491 : vector<16x16xf32>
      %493 = arith.addf %488, %492 : vector<16x16xf32>
      %c0_352 = arith.constant 0 : index
      %c3_353 = arith.constant 3 : index
      %c3_354 = arith.constant 3 : index
      %494 = vector.load %arg8[%c0_352, %c3_353, %c3_354] : memref<2x22x22xf32, #tpu.memory_space<vmem>>, vector<1x16x16xf32>
      %495 = vector.shape_cast %494 : vector<1x16x16xf32> to vector<16x16xf32>
      %496 = vector.broadcast %46 : f32 to vector<16x16xf32>
      %497 = arith.mulf %495, %496 : vector<16x16xf32>
      %498 = arith.addf %493, %497 : vector<16x16xf32>
      %c0_355 = arith.constant 0 : index
      %c3_356 = arith.constant 3 : index
      %c4_357 = arith.constant 4 : index
      %499 = vector.load %arg8[%c0_355, %c3_356, %c4_357] : memref<2x22x22xf32, #tpu.memory_space<vmem>>, vector<1x16x16xf32>
      %500 = vector.shape_cast %499 : vector<1x16x16xf32> to vector<16x16xf32>
      %501 = vector.broadcast %47 : f32 to vector<16x16xf32>
      %502 = arith.mulf %500, %501 : vector<16x16xf32>
      %503 = arith.addf %498, %502 : vector<16x16xf32>
      %c0_358 = arith.constant 0 : index
      %c3_359 = arith.constant 3 : index
      %c5_360 = arith.constant 5 : index
      %504 = vector.load %arg8[%c0_358, %c3_359, %c5_360] : memref<2x22x22xf32, #tpu.memory_space<vmem>>, vector<1x16x16xf32>
      %505 = vector.shape_cast %504 : vector<1x16x16xf32> to vector<16x16xf32>
      %506 = vector.broadcast %48 : f32 to vector<16x16xf32>
      %507 = arith.mulf %505, %506 : vector<16x16xf32>
      %508 = arith.addf %503, %507 : vector<16x16xf32>
      %c0_361 = arith.constant 0 : index
      %c3_362 = arith.constant 3 : index
      %c6_363 = arith.constant 6 : index
      %509 = vector.load %arg8[%c0_361, %c3_362, %c6_363] : memref<2x22x22xf32, #tpu.memory_space<vmem>>, vector<1x16x16xf32>
      %510 = vector.shape_cast %509 : vector<1x16x16xf32> to vector<16x16xf32>
      %511 = vector.broadcast %49 : f32 to vector<16x16xf32>
      %512 = arith.mulf %510, %511 : vector<16x16xf32>
      %513 = arith.addf %508, %512 : vector<16x16xf32>
      %c0_364 = arith.constant 0 : index
      %c4_365 = arith.constant 4 : index
      %c0_366 = arith.constant 0 : index
      %514 = vector.load %arg8[%c0_364, %c4_365, %c0_366] : memref<2x22x22xf32, #tpu.memory_space<vmem>>, vector<1x16x16xf32>
      %515 = vector.shape_cast %514 : vector<1x16x16xf32> to vector<16x16xf32>
      %516 = vector.broadcast %50 : f32 to vector<16x16xf32>
      %517 = arith.mulf %515, %516 : vector<16x16xf32>
      %518 = arith.addf %478, %517 : vector<16x16xf32>
      %c0_367 = arith.constant 0 : index
      %c4_368 = arith.constant 4 : index
      %c1_369 = arith.constant 1 : index
      %519 = vector.load %arg8[%c0_367, %c4_368, %c1_369] : memref<2x22x22xf32, #tpu.memory_space<vmem>>, vector<1x16x16xf32>
      %520 = vector.shape_cast %519 : vector<1x16x16xf32> to vector<16x16xf32>
      %521 = vector.broadcast %51 : f32 to vector<16x16xf32>
      %522 = arith.mulf %520, %521 : vector<16x16xf32>
      %523 = arith.addf %518, %522 : vector<16x16xf32>
      %c0_370 = arith.constant 0 : index
      %c4_371 = arith.constant 4 : index
      %c2_372 = arith.constant 2 : index
      %524 = vector.load %arg8[%c0_370, %c4_371, %c2_372] : memref<2x22x22xf32, #tpu.memory_space<vmem>>, vector<1x16x16xf32>
      %525 = vector.shape_cast %524 : vector<1x16x16xf32> to vector<16x16xf32>
      %526 = vector.broadcast %52 : f32 to vector<16x16xf32>
      %527 = arith.mulf %525, %526 : vector<16x16xf32>
      %528 = arith.addf %523, %527 : vector<16x16xf32>
      %c0_373 = arith.constant 0 : index
      %c4_374 = arith.constant 4 : index
      %c3_375 = arith.constant 3 : index
      %529 = vector.load %arg8[%c0_373, %c4_374, %c3_375] : memref<2x22x22xf32, #tpu.memory_space<vmem>>, vector<1x16x16xf32>
      %530 = vector.shape_cast %529 : vector<1x16x16xf32> to vector<16x16xf32>
      %531 = vector.broadcast %53 : f32 to vector<16x16xf32>
      %532 = arith.mulf %530, %531 : vector<16x16xf32>
      %533 = arith.addf %528, %532 : vector<16x16xf32>
      %c0_376 = arith.constant 0 : index
      %c4_377 = arith.constant 4 : index
      %c4_378 = arith.constant 4 : index
      %534 = vector.load %arg8[%c0_376, %c4_377, %c4_378] : memref<2x22x22xf32, #tpu.memory_space<vmem>>, vector<1x16x16xf32>
      %535 = vector.shape_cast %534 : vector<1x16x16xf32> to vector<16x16xf32>
      %536 = vector.broadcast %54 : f32 to vector<16x16xf32>
      %537 = arith.mulf %535, %536 : vector<16x16xf32>
      %538 = arith.addf %533, %537 : vector<16x16xf32>
      %c0_379 = arith.constant 0 : index
      %c4_380 = arith.constant 4 : index
      %c5_381 = arith.constant 5 : index
      %539 = vector.load %arg8[%c0_379, %c4_380, %c5_381] : memref<2x22x22xf32, #tpu.memory_space<vmem>>, vector<1x16x16xf32>
      %540 = vector.shape_cast %539 : vector<1x16x16xf32> to vector<16x16xf32>
      %541 = vector.broadcast %55 : f32 to vector<16x16xf32>
      %542 = arith.mulf %540, %541 : vector<16x16xf32>
      %543 = arith.addf %538, %542 : vector<16x16xf32>
      %c0_382 = arith.constant 0 : index
      %c4_383 = arith.constant 4 : index
      %c6_384 = arith.constant 6 : index
      %544 = vector.load %arg8[%c0_382, %c4_383, %c6_384] : memref<2x22x22xf32, #tpu.memory_space<vmem>>, vector<1x16x16xf32>
      %545 = vector.shape_cast %544 : vector<1x16x16xf32> to vector<16x16xf32>
      %546 = vector.broadcast %56 : f32 to vector<16x16xf32>
      %547 = arith.mulf %545, %546 : vector<16x16xf32>
      %548 = arith.addf %543, %547 : vector<16x16xf32>
      %c0_385 = arith.constant 0 : index
      %c5_386 = arith.constant 5 : index
      %c0_387 = arith.constant 0 : index
      %549 = vector.load %arg8[%c0_385, %c5_386, %c0_387] : memref<2x22x22xf32, #tpu.memory_space<vmem>>, vector<1x16x16xf32>
      %550 = vector.shape_cast %549 : vector<1x16x16xf32> to vector<16x16xf32>
      %551 = vector.broadcast %57 : f32 to vector<16x16xf32>
      %552 = arith.mulf %550, %551 : vector<16x16xf32>
      %553 = arith.addf %513, %552 : vector<16x16xf32>
      %c0_388 = arith.constant 0 : index
      %c5_389 = arith.constant 5 : index
      %c1_390 = arith.constant 1 : index
      %554 = vector.load %arg8[%c0_388, %c5_389, %c1_390] : memref<2x22x22xf32, #tpu.memory_space<vmem>>, vector<1x16x16xf32>
      %555 = vector.shape_cast %554 : vector<1x16x16xf32> to vector<16x16xf32>
      %556 = vector.broadcast %58 : f32 to vector<16x16xf32>
      %557 = arith.mulf %555, %556 : vector<16x16xf32>
      %558 = arith.addf %553, %557 : vector<16x16xf32>
      %c0_391 = arith.constant 0 : index
      %c5_392 = arith.constant 5 : index
      %c2_393 = arith.constant 2 : index
      %559 = vector.load %arg8[%c0_391, %c5_392, %c2_393] : memref<2x22x22xf32, #tpu.memory_space<vmem>>, vector<1x16x16xf32>
      %560 = vector.shape_cast %559 : vector<1x16x16xf32> to vector<16x16xf32>
      %561 = vector.broadcast %59 : f32 to vector<16x16xf32>
      %562 = arith.mulf %560, %561 : vector<16x16xf32>
      %563 = arith.addf %558, %562 : vector<16x16xf32>
      %c0_394 = arith.constant 0 : index
      %c5_395 = arith.constant 5 : index
      %c3_396 = arith.constant 3 : index
      %564 = vector.load %arg8[%c0_394, %c5_395, %c3_396] : memref<2x22x22xf32, #tpu.memory_space<vmem>>, vector<1x16x16xf32>
      %565 = vector.shape_cast %564 : vector<1x16x16xf32> to vector<16x16xf32>
      %566 = vector.broadcast %60 : f32 to vector<16x16xf32>
      %567 = arith.mulf %565, %566 : vector<16x16xf32>
      %568 = arith.addf %563, %567 : vector<16x16xf32>
      %c0_397 = arith.constant 0 : index
      %c5_398 = arith.constant 5 : index
      %c4_399 = arith.constant 4 : index
      %569 = vector.load %arg8[%c0_397, %c5_398, %c4_399] : memref<2x22x22xf32, #tpu.memory_space<vmem>>, vector<1x16x16xf32>
      %570 = vector.shape_cast %569 : vector<1x16x16xf32> to vector<16x16xf32>
      %571 = vector.broadcast %61 : f32 to vector<16x16xf32>
      %572 = arith.mulf %570, %571 : vector<16x16xf32>
      %573 = arith.addf %568, %572 : vector<16x16xf32>
      %c0_400 = arith.constant 0 : index
      %c5_401 = arith.constant 5 : index
      %c5_402 = arith.constant 5 : index
      %574 = vector.load %arg8[%c0_400, %c5_401, %c5_402] : memref<2x22x22xf32, #tpu.memory_space<vmem>>, vector<1x16x16xf32>
      %575 = vector.shape_cast %574 : vector<1x16x16xf32> to vector<16x16xf32>
      %576 = vector.broadcast %62 : f32 to vector<16x16xf32>
      %577 = arith.mulf %575, %576 : vector<16x16xf32>
      %578 = arith.addf %573, %577 : vector<16x16xf32>
      %c0_403 = arith.constant 0 : index
      %c5_404 = arith.constant 5 : index
      %c6_405 = arith.constant 6 : index
      %579 = vector.load %arg8[%c0_403, %c5_404, %c6_405] : memref<2x22x22xf32, #tpu.memory_space<vmem>>, vector<1x16x16xf32>
      %580 = vector.shape_cast %579 : vector<1x16x16xf32> to vector<16x16xf32>
      %581 = vector.broadcast %63 : f32 to vector<16x16xf32>
      %582 = arith.mulf %580, %581 : vector<16x16xf32>
      %583 = arith.addf %578, %582 : vector<16x16xf32>
      %c0_406 = arith.constant 0 : index
      %c6_407 = arith.constant 6 : index
      %c0_408 = arith.constant 0 : index
      %584 = vector.load %arg8[%c0_406, %c6_407, %c0_408] : memref<2x22x22xf32, #tpu.memory_space<vmem>>, vector<1x16x16xf32>
      %585 = vector.shape_cast %584 : vector<1x16x16xf32> to vector<16x16xf32>
      %586 = vector.broadcast %64 : f32 to vector<16x16xf32>
      %587 = arith.mulf %585, %586 : vector<16x16xf32>
      %588 = arith.addf %548, %587 : vector<16x16xf32>
      %c0_409 = arith.constant 0 : index
      %c6_410 = arith.constant 6 : index
      %c1_411 = arith.constant 1 : index
      %589 = vector.load %arg8[%c0_409, %c6_410, %c1_411] : memref<2x22x22xf32, #tpu.memory_space<vmem>>, vector<1x16x16xf32>
      %590 = vector.shape_cast %589 : vector<1x16x16xf32> to vector<16x16xf32>
      %591 = vector.broadcast %65 : f32 to vector<16x16xf32>
      %592 = arith.mulf %590, %591 : vector<16x16xf32>
      %593 = arith.addf %588, %592 : vector<16x16xf32>
      %c0_412 = arith.constant 0 : index
      %c6_413 = arith.constant 6 : index
      %c2_414 = arith.constant 2 : index
      %594 = vector.load %arg8[%c0_412, %c6_413, %c2_414] : memref<2x22x22xf32, #tpu.memory_space<vmem>>, vector<1x16x16xf32>
      %595 = vector.shape_cast %594 : vector<1x16x16xf32> to vector<16x16xf32>
      %596 = vector.broadcast %66 : f32 to vector<16x16xf32>
      %597 = arith.mulf %595, %596 : vector<16x16xf32>
      %598 = arith.addf %593, %597 : vector<16x16xf32>
      %c0_415 = arith.constant 0 : index
      %c6_416 = arith.constant 6 : index
      %c3_417 = arith.constant 3 : index
      %599 = vector.load %arg8[%c0_415, %c6_416, %c3_417] : memref<2x22x22xf32, #tpu.memory_space<vmem>>, vector<1x16x16xf32>
      %600 = vector.shape_cast %599 : vector<1x16x16xf32> to vector<16x16xf32>
      %601 = vector.broadcast %67 : f32 to vector<16x16xf32>
      %602 = arith.mulf %600, %601 : vector<16x16xf32>
      %603 = arith.addf %598, %602 : vector<16x16xf32>
      %c0_418 = arith.constant 0 : index
      %c6_419 = arith.constant 6 : index
      %c4_420 = arith.constant 4 : index
      %604 = vector.load %arg8[%c0_418, %c6_419, %c4_420] : memref<2x22x22xf32, #tpu.memory_space<vmem>>, vector<1x16x16xf32>
      %605 = vector.shape_cast %604 : vector<1x16x16xf32> to vector<16x16xf32>
      %606 = vector.broadcast %68 : f32 to vector<16x16xf32>
      %607 = arith.mulf %605, %606 : vector<16x16xf32>
      %608 = arith.addf %603, %607 : vector<16x16xf32>
      %c0_421 = arith.constant 0 : index
      %c6_422 = arith.constant 6 : index
      %c5_423 = arith.constant 5 : index
      %609 = vector.load %arg8[%c0_421, %c6_422, %c5_423] : memref<2x22x22xf32, #tpu.memory_space<vmem>>, vector<1x16x16xf32>
      %610 = vector.shape_cast %609 : vector<1x16x16xf32> to vector<16x16xf32>
      %611 = vector.broadcast %69 : f32 to vector<16x16xf32>
      %612 = arith.mulf %610, %611 : vector<16x16xf32>
      %613 = arith.addf %608, %612 : vector<16x16xf32>
      %c0_424 = arith.constant 0 : index
      %c6_425 = arith.constant 6 : index
      %c6_426 = arith.constant 6 : index
      %614 = vector.load %arg8[%c0_424, %c6_425, %c6_426] : memref<2x22x22xf32, #tpu.memory_space<vmem>>, vector<1x16x16xf32>
      %615 = vector.shape_cast %614 : vector<1x16x16xf32> to vector<16x16xf32>
      %616 = vector.broadcast %70 : f32 to vector<16x16xf32>
      %617 = arith.mulf %615, %616 : vector<16x16xf32>
      %618 = arith.addf %613, %617 : vector<16x16xf32>
      %c1_427 = arith.constant 1 : index
      %c0_428 = arith.constant 0 : index
      %c0_429 = arith.constant 0 : index
      %619 = vector.load %arg8[%c1_427, %c0_428, %c0_429] : memref<2x22x22xf32, #tpu.memory_space<vmem>>, vector<1x16x16xf32>
      %620 = vector.shape_cast %619 : vector<1x16x16xf32> to vector<16x16xf32>
      %621 = vector.broadcast %71 : f32 to vector<16x16xf32>
      %622 = arith.mulf %620, %621 : vector<16x16xf32>
      %623 = arith.addf %372, %622 : vector<16x16xf32>
      %c1_430 = arith.constant 1 : index
      %c0_431 = arith.constant 0 : index
      %c1_432 = arith.constant 1 : index
      %624 = vector.load %arg8[%c1_430, %c0_431, %c1_432] : memref<2x22x22xf32, #tpu.memory_space<vmem>>, vector<1x16x16xf32>
      %625 = vector.shape_cast %624 : vector<1x16x16xf32> to vector<16x16xf32>
      %626 = vector.broadcast %72 : f32 to vector<16x16xf32>
      %627 = arith.mulf %625, %626 : vector<16x16xf32>
      %628 = arith.addf %623, %627 : vector<16x16xf32>
      %c1_433 = arith.constant 1 : index
      %c0_434 = arith.constant 0 : index
      %c2_435 = arith.constant 2 : index
      %629 = vector.load %arg8[%c1_433, %c0_434, %c2_435] : memref<2x22x22xf32, #tpu.memory_space<vmem>>, vector<1x16x16xf32>
      %630 = vector.shape_cast %629 : vector<1x16x16xf32> to vector<16x16xf32>
      %631 = vector.broadcast %73 : f32 to vector<16x16xf32>
      %632 = arith.mulf %630, %631 : vector<16x16xf32>
      %633 = arith.addf %628, %632 : vector<16x16xf32>
      %c1_436 = arith.constant 1 : index
      %c0_437 = arith.constant 0 : index
      %c3_438 = arith.constant 3 : index
      %634 = vector.load %arg8[%c1_436, %c0_437, %c3_438] : memref<2x22x22xf32, #tpu.memory_space<vmem>>, vector<1x16x16xf32>
      %635 = vector.shape_cast %634 : vector<1x16x16xf32> to vector<16x16xf32>
      %636 = vector.broadcast %74 : f32 to vector<16x16xf32>
      %637 = arith.mulf %635, %636 : vector<16x16xf32>
      %638 = arith.addf %633, %637 : vector<16x16xf32>
      %c1_439 = arith.constant 1 : index
      %c0_440 = arith.constant 0 : index
      %c4_441 = arith.constant 4 : index
      %639 = vector.load %arg8[%c1_439, %c0_440, %c4_441] : memref<2x22x22xf32, #tpu.memory_space<vmem>>, vector<1x16x16xf32>
      %640 = vector.shape_cast %639 : vector<1x16x16xf32> to vector<16x16xf32>
      %641 = vector.broadcast %75 : f32 to vector<16x16xf32>
      %642 = arith.mulf %640, %641 : vector<16x16xf32>
      %643 = arith.addf %638, %642 : vector<16x16xf32>
      %c1_442 = arith.constant 1 : index
      %c0_443 = arith.constant 0 : index
      %c5_444 = arith.constant 5 : index
      %644 = vector.load %arg8[%c1_442, %c0_443, %c5_444] : memref<2x22x22xf32, #tpu.memory_space<vmem>>, vector<1x16x16xf32>
      %645 = vector.shape_cast %644 : vector<1x16x16xf32> to vector<16x16xf32>
      %646 = vector.broadcast %76 : f32 to vector<16x16xf32>
      %647 = arith.mulf %645, %646 : vector<16x16xf32>
      %648 = arith.addf %643, %647 : vector<16x16xf32>
      %c1_445 = arith.constant 1 : index
      %c0_446 = arith.constant 0 : index
      %c6_447 = arith.constant 6 : index
      %649 = vector.load %arg8[%c1_445, %c0_446, %c6_447] : memref<2x22x22xf32, #tpu.memory_space<vmem>>, vector<1x16x16xf32>
      %650 = vector.shape_cast %649 : vector<1x16x16xf32> to vector<16x16xf32>
      %651 = vector.broadcast %77 : f32 to vector<16x16xf32>
      %652 = arith.mulf %650, %651 : vector<16x16xf32>
      %653 = arith.addf %648, %652 : vector<16x16xf32>
      %c1_448 = arith.constant 1 : index
      %c1_449 = arith.constant 1 : index
      %c0_450 = arith.constant 0 : index
      %654 = vector.load %arg8[%c1_448, %c1_449, %c0_450] : memref<2x22x22xf32, #tpu.memory_space<vmem>>, vector<1x16x16xf32>
      %655 = vector.shape_cast %654 : vector<1x16x16xf32> to vector<16x16xf32>
      %656 = vector.broadcast %78 : f32 to vector<16x16xf32>
      %657 = arith.mulf %655, %656 : vector<16x16xf32>
      %658 = arith.addf %373, %657 : vector<16x16xf32>
      %c1_451 = arith.constant 1 : index
      %c1_452 = arith.constant 1 : index
      %c1_453 = arith.constant 1 : index
      %659 = vector.load %arg8[%c1_451, %c1_452, %c1_453] : memref<2x22x22xf32, #tpu.memory_space<vmem>>, vector<1x16x16xf32>
      %660 = vector.shape_cast %659 : vector<1x16x16xf32> to vector<16x16xf32>
      %661 = vector.broadcast %79 : f32 to vector<16x16xf32>
      %662 = arith.mulf %660, %661 : vector<16x16xf32>
      %663 = arith.addf %658, %662 : vector<16x16xf32>
      %c1_454 = arith.constant 1 : index
      %c1_455 = arith.constant 1 : index
      %c2_456 = arith.constant 2 : index
      %664 = vector.load %arg8[%c1_454, %c1_455, %c2_456] : memref<2x22x22xf32, #tpu.memory_space<vmem>>, vector<1x16x16xf32>
      %665 = vector.shape_cast %664 : vector<1x16x16xf32> to vector<16x16xf32>
      %666 = vector.broadcast %80 : f32 to vector<16x16xf32>
      %667 = arith.mulf %665, %666 : vector<16x16xf32>
      %668 = arith.addf %663, %667 : vector<16x16xf32>
      %c1_457 = arith.constant 1 : index
      %c1_458 = arith.constant 1 : index
      %c3_459 = arith.constant 3 : index
      %669 = vector.load %arg8[%c1_457, %c1_458, %c3_459] : memref<2x22x22xf32, #tpu.memory_space<vmem>>, vector<1x16x16xf32>
      %670 = vector.shape_cast %669 : vector<1x16x16xf32> to vector<16x16xf32>
      %671 = vector.broadcast %81 : f32 to vector<16x16xf32>
      %672 = arith.mulf %670, %671 : vector<16x16xf32>
      %673 = arith.addf %668, %672 : vector<16x16xf32>
      %c1_460 = arith.constant 1 : index
      %c1_461 = arith.constant 1 : index
      %c4_462 = arith.constant 4 : index
      %674 = vector.load %arg8[%c1_460, %c1_461, %c4_462] : memref<2x22x22xf32, #tpu.memory_space<vmem>>, vector<1x16x16xf32>
      %675 = vector.shape_cast %674 : vector<1x16x16xf32> to vector<16x16xf32>
      %676 = vector.broadcast %82 : f32 to vector<16x16xf32>
      %677 = arith.mulf %675, %676 : vector<16x16xf32>
      %678 = arith.addf %673, %677 : vector<16x16xf32>
      %c1_463 = arith.constant 1 : index
      %c1_464 = arith.constant 1 : index
      %c5_465 = arith.constant 5 : index
      %679 = vector.load %arg8[%c1_463, %c1_464, %c5_465] : memref<2x22x22xf32, #tpu.memory_space<vmem>>, vector<1x16x16xf32>
      %680 = vector.shape_cast %679 : vector<1x16x16xf32> to vector<16x16xf32>
      %681 = vector.broadcast %83 : f32 to vector<16x16xf32>
      %682 = arith.mulf %680, %681 : vector<16x16xf32>
      %683 = arith.addf %678, %682 : vector<16x16xf32>
      %c1_466 = arith.constant 1 : index
      %c1_467 = arith.constant 1 : index
      %c6_468 = arith.constant 6 : index
      %684 = vector.load %arg8[%c1_466, %c1_467, %c6_468] : memref<2x22x22xf32, #tpu.memory_space<vmem>>, vector<1x16x16xf32>
      %685 = vector.shape_cast %684 : vector<1x16x16xf32> to vector<16x16xf32>
      %686 = vector.broadcast %84 : f32 to vector<16x16xf32>
      %687 = arith.mulf %685, %686 : vector<16x16xf32>
      %688 = arith.addf %683, %687 : vector<16x16xf32>
      %c1_469 = arith.constant 1 : index
      %c2_470 = arith.constant 2 : index
      %c0_471 = arith.constant 0 : index
      %689 = vector.load %arg8[%c1_469, %c2_470, %c0_471] : memref<2x22x22xf32, #tpu.memory_space<vmem>>, vector<1x16x16xf32>
      %690 = vector.shape_cast %689 : vector<1x16x16xf32> to vector<16x16xf32>
      %691 = vector.broadcast %85 : f32 to vector<16x16xf32>
      %692 = arith.mulf %690, %691 : vector<16x16xf32>
      %693 = arith.addf %653, %692 : vector<16x16xf32>
      %c1_472 = arith.constant 1 : index
      %c2_473 = arith.constant 2 : index
      %c1_474 = arith.constant 1 : index
      %694 = vector.load %arg8[%c1_472, %c2_473, %c1_474] : memref<2x22x22xf32, #tpu.memory_space<vmem>>, vector<1x16x16xf32>
      %695 = vector.shape_cast %694 : vector<1x16x16xf32> to vector<16x16xf32>
      %696 = vector.broadcast %86 : f32 to vector<16x16xf32>
      %697 = arith.mulf %695, %696 : vector<16x16xf32>
      %698 = arith.addf %693, %697 : vector<16x16xf32>
      %c1_475 = arith.constant 1 : index
      %c2_476 = arith.constant 2 : index
      %c2_477 = arith.constant 2 : index
      %699 = vector.load %arg8[%c1_475, %c2_476, %c2_477] : memref<2x22x22xf32, #tpu.memory_space<vmem>>, vector<1x16x16xf32>
      %700 = vector.shape_cast %699 : vector<1x16x16xf32> to vector<16x16xf32>
      %701 = vector.broadcast %87 : f32 to vector<16x16xf32>
      %702 = arith.mulf %700, %701 : vector<16x16xf32>
      %703 = arith.addf %698, %702 : vector<16x16xf32>
      %c1_478 = arith.constant 1 : index
      %c2_479 = arith.constant 2 : index
      %c3_480 = arith.constant 3 : index
      %704 = vector.load %arg8[%c1_478, %c2_479, %c3_480] : memref<2x22x22xf32, #tpu.memory_space<vmem>>, vector<1x16x16xf32>
      %705 = vector.shape_cast %704 : vector<1x16x16xf32> to vector<16x16xf32>
      %706 = vector.broadcast %88 : f32 to vector<16x16xf32>
      %707 = arith.mulf %705, %706 : vector<16x16xf32>
      %708 = arith.addf %703, %707 : vector<16x16xf32>
      %c1_481 = arith.constant 1 : index
      %c2_482 = arith.constant 2 : index
      %c4_483 = arith.constant 4 : index
      %709 = vector.load %arg8[%c1_481, %c2_482, %c4_483] : memref<2x22x22xf32, #tpu.memory_space<vmem>>, vector<1x16x16xf32>
      %710 = vector.shape_cast %709 : vector<1x16x16xf32> to vector<16x16xf32>
      %711 = vector.broadcast %89 : f32 to vector<16x16xf32>
      %712 = arith.mulf %710, %711 : vector<16x16xf32>
      %713 = arith.addf %708, %712 : vector<16x16xf32>
      %c1_484 = arith.constant 1 : index
      %c2_485 = arith.constant 2 : index
      %c5_486 = arith.constant 5 : index
      %714 = vector.load %arg8[%c1_484, %c2_485, %c5_486] : memref<2x22x22xf32, #tpu.memory_space<vmem>>, vector<1x16x16xf32>
      %715 = vector.shape_cast %714 : vector<1x16x16xf32> to vector<16x16xf32>
      %716 = vector.broadcast %90 : f32 to vector<16x16xf32>
      %717 = arith.mulf %715, %716 : vector<16x16xf32>
      %718 = arith.addf %713, %717 : vector<16x16xf32>
      %c1_487 = arith.constant 1 : index
      %c2_488 = arith.constant 2 : index
      %c6_489 = arith.constant 6 : index
      %719 = vector.load %arg8[%c1_487, %c2_488, %c6_489] : memref<2x22x22xf32, #tpu.memory_space<vmem>>, vector<1x16x16xf32>
      %720 = vector.shape_cast %719 : vector<1x16x16xf32> to vector<16x16xf32>
      %721 = vector.broadcast %91 : f32 to vector<16x16xf32>
      %722 = arith.mulf %720, %721 : vector<16x16xf32>
      %723 = arith.addf %718, %722 : vector<16x16xf32>
      %c1_490 = arith.constant 1 : index
      %c3_491 = arith.constant 3 : index
      %c0_492 = arith.constant 0 : index
      %724 = vector.load %arg8[%c1_490, %c3_491, %c0_492] : memref<2x22x22xf32, #tpu.memory_space<vmem>>, vector<1x16x16xf32>
      %725 = vector.shape_cast %724 : vector<1x16x16xf32> to vector<16x16xf32>
      %726 = vector.broadcast %92 : f32 to vector<16x16xf32>
      %727 = arith.mulf %725, %726 : vector<16x16xf32>
      %728 = arith.addf %688, %727 : vector<16x16xf32>
      %c1_493 = arith.constant 1 : index
      %c3_494 = arith.constant 3 : index
      %c1_495 = arith.constant 1 : index
      %729 = vector.load %arg8[%c1_493, %c3_494, %c1_495] : memref<2x22x22xf32, #tpu.memory_space<vmem>>, vector<1x16x16xf32>
      %730 = vector.shape_cast %729 : vector<1x16x16xf32> to vector<16x16xf32>
      %731 = vector.broadcast %93 : f32 to vector<16x16xf32>
      %732 = arith.mulf %730, %731 : vector<16x16xf32>
      %733 = arith.addf %728, %732 : vector<16x16xf32>
      %c1_496 = arith.constant 1 : index
      %c3_497 = arith.constant 3 : index
      %c2_498 = arith.constant 2 : index
      %734 = vector.load %arg8[%c1_496, %c3_497, %c2_498] : memref<2x22x22xf32, #tpu.memory_space<vmem>>, vector<1x16x16xf32>
      %735 = vector.shape_cast %734 : vector<1x16x16xf32> to vector<16x16xf32>
      %736 = vector.broadcast %94 : f32 to vector<16x16xf32>
      %737 = arith.mulf %735, %736 : vector<16x16xf32>
      %738 = arith.addf %733, %737 : vector<16x16xf32>
      %c1_499 = arith.constant 1 : index
      %c3_500 = arith.constant 3 : index
      %c3_501 = arith.constant 3 : index
      %739 = vector.load %arg8[%c1_499, %c3_500, %c3_501] : memref<2x22x22xf32, #tpu.memory_space<vmem>>, vector<1x16x16xf32>
      %740 = vector.shape_cast %739 : vector<1x16x16xf32> to vector<16x16xf32>
      %741 = vector.broadcast %95 : f32 to vector<16x16xf32>
      %742 = arith.mulf %740, %741 : vector<16x16xf32>
      %743 = arith.addf %738, %742 : vector<16x16xf32>
      %c1_502 = arith.constant 1 : index
      %c3_503 = arith.constant 3 : index
      %c4_504 = arith.constant 4 : index
      %744 = vector.load %arg8[%c1_502, %c3_503, %c4_504] : memref<2x22x22xf32, #tpu.memory_space<vmem>>, vector<1x16x16xf32>
      %745 = vector.shape_cast %744 : vector<1x16x16xf32> to vector<16x16xf32>
      %746 = vector.broadcast %96 : f32 to vector<16x16xf32>
      %747 = arith.mulf %745, %746 : vector<16x16xf32>
      %748 = arith.addf %743, %747 : vector<16x16xf32>
      %c1_505 = arith.constant 1 : index
      %c3_506 = arith.constant 3 : index
      %c5_507 = arith.constant 5 : index
      %749 = vector.load %arg8[%c1_505, %c3_506, %c5_507] : memref<2x22x22xf32, #tpu.memory_space<vmem>>, vector<1x16x16xf32>
      %750 = vector.shape_cast %749 : vector<1x16x16xf32> to vector<16x16xf32>
      %751 = vector.broadcast %97 : f32 to vector<16x16xf32>
      %752 = arith.mulf %750, %751 : vector<16x16xf32>
      %753 = arith.addf %748, %752 : vector<16x16xf32>
      %c1_508 = arith.constant 1 : index
      %c3_509 = arith.constant 3 : index
      %c6_510 = arith.constant 6 : index
      %754 = vector.load %arg8[%c1_508, %c3_509, %c6_510] : memref<2x22x22xf32, #tpu.memory_space<vmem>>, vector<1x16x16xf32>
      %755 = vector.shape_cast %754 : vector<1x16x16xf32> to vector<16x16xf32>
      %756 = vector.broadcast %98 : f32 to vector<16x16xf32>
      %757 = arith.mulf %755, %756 : vector<16x16xf32>
      %758 = arith.addf %753, %757 : vector<16x16xf32>
      %c1_511 = arith.constant 1 : index
      %c4_512 = arith.constant 4 : index
      %c0_513 = arith.constant 0 : index
      %759 = vector.load %arg8[%c1_511, %c4_512, %c0_513] : memref<2x22x22xf32, #tpu.memory_space<vmem>>, vector<1x16x16xf32>
      %760 = vector.shape_cast %759 : vector<1x16x16xf32> to vector<16x16xf32>
      %761 = vector.broadcast %99 : f32 to vector<16x16xf32>
      %762 = arith.mulf %760, %761 : vector<16x16xf32>
      %763 = arith.addf %723, %762 : vector<16x16xf32>
      %c1_514 = arith.constant 1 : index
      %c4_515 = arith.constant 4 : index
      %c1_516 = arith.constant 1 : index
      %764 = vector.load %arg8[%c1_514, %c4_515, %c1_516] : memref<2x22x22xf32, #tpu.memory_space<vmem>>, vector<1x16x16xf32>
      %765 = vector.shape_cast %764 : vector<1x16x16xf32> to vector<16x16xf32>
      %766 = vector.broadcast %100 : f32 to vector<16x16xf32>
      %767 = arith.mulf %765, %766 : vector<16x16xf32>
      %768 = arith.addf %763, %767 : vector<16x16xf32>
      %c1_517 = arith.constant 1 : index
      %c4_518 = arith.constant 4 : index
      %c2_519 = arith.constant 2 : index
      %769 = vector.load %arg8[%c1_517, %c4_518, %c2_519] : memref<2x22x22xf32, #tpu.memory_space<vmem>>, vector<1x16x16xf32>
      %770 = vector.shape_cast %769 : vector<1x16x16xf32> to vector<16x16xf32>
      %771 = vector.broadcast %101 : f32 to vector<16x16xf32>
      %772 = arith.mulf %770, %771 : vector<16x16xf32>
      %773 = arith.addf %768, %772 : vector<16x16xf32>
      %c1_520 = arith.constant 1 : index
      %c4_521 = arith.constant 4 : index
      %c3_522 = arith.constant 3 : index
      %774 = vector.load %arg8[%c1_520, %c4_521, %c3_522] : memref<2x22x22xf32, #tpu.memory_space<vmem>>, vector<1x16x16xf32>
      %775 = vector.shape_cast %774 : vector<1x16x16xf32> to vector<16x16xf32>
      %776 = vector.broadcast %102 : f32 to vector<16x16xf32>
      %777 = arith.mulf %775, %776 : vector<16x16xf32>
      %778 = arith.addf %773, %777 : vector<16x16xf32>
      %c1_523 = arith.constant 1 : index
      %c4_524 = arith.constant 4 : index
      %c4_525 = arith.constant 4 : index
      %779 = vector.load %arg8[%c1_523, %c4_524, %c4_525] : memref<2x22x22xf32, #tpu.memory_space<vmem>>, vector<1x16x16xf32>
      %780 = vector.shape_cast %779 : vector<1x16x16xf32> to vector<16x16xf32>
      %781 = vector.broadcast %103 : f32 to vector<16x16xf32>
      %782 = arith.mulf %780, %781 : vector<16x16xf32>
      %783 = arith.addf %778, %782 : vector<16x16xf32>
      %c1_526 = arith.constant 1 : index
      %c4_527 = arith.constant 4 : index
      %c5_528 = arith.constant 5 : index
      %784 = vector.load %arg8[%c1_526, %c4_527, %c5_528] : memref<2x22x22xf32, #tpu.memory_space<vmem>>, vector<1x16x16xf32>
      %785 = vector.shape_cast %784 : vector<1x16x16xf32> to vector<16x16xf32>
      %786 = vector.broadcast %104 : f32 to vector<16x16xf32>
      %787 = arith.mulf %785, %786 : vector<16x16xf32>
      %788 = arith.addf %783, %787 : vector<16x16xf32>
      %c1_529 = arith.constant 1 : index
      %c4_530 = arith.constant 4 : index
      %c6_531 = arith.constant 6 : index
      %789 = vector.load %arg8[%c1_529, %c4_530, %c6_531] : memref<2x22x22xf32, #tpu.memory_space<vmem>>, vector<1x16x16xf32>
      %790 = vector.shape_cast %789 : vector<1x16x16xf32> to vector<16x16xf32>
      %791 = vector.broadcast %105 : f32 to vector<16x16xf32>
      %792 = arith.mulf %790, %791 : vector<16x16xf32>
      %793 = arith.addf %788, %792 : vector<16x16xf32>
      %c1_532 = arith.constant 1 : index
      %c5_533 = arith.constant 5 : index
      %c0_534 = arith.constant 0 : index
      %794 = vector.load %arg8[%c1_532, %c5_533, %c0_534] : memref<2x22x22xf32, #tpu.memory_space<vmem>>, vector<1x16x16xf32>
      %795 = vector.shape_cast %794 : vector<1x16x16xf32> to vector<16x16xf32>
      %796 = vector.broadcast %106 : f32 to vector<16x16xf32>
      %797 = arith.mulf %795, %796 : vector<16x16xf32>
      %798 = arith.addf %758, %797 : vector<16x16xf32>
      %c1_535 = arith.constant 1 : index
      %c5_536 = arith.constant 5 : index
      %c1_537 = arith.constant 1 : index
      %799 = vector.load %arg8[%c1_535, %c5_536, %c1_537] : memref<2x22x22xf32, #tpu.memory_space<vmem>>, vector<1x16x16xf32>
      %800 = vector.shape_cast %799 : vector<1x16x16xf32> to vector<16x16xf32>
      %801 = vector.broadcast %107 : f32 to vector<16x16xf32>
      %802 = arith.mulf %800, %801 : vector<16x16xf32>
      %803 = arith.addf %798, %802 : vector<16x16xf32>
      %c1_538 = arith.constant 1 : index
      %c5_539 = arith.constant 5 : index
      %c2_540 = arith.constant 2 : index
      %804 = vector.load %arg8[%c1_538, %c5_539, %c2_540] : memref<2x22x22xf32, #tpu.memory_space<vmem>>, vector<1x16x16xf32>
      %805 = vector.shape_cast %804 : vector<1x16x16xf32> to vector<16x16xf32>
      %806 = vector.broadcast %108 : f32 to vector<16x16xf32>
      %807 = arith.mulf %805, %806 : vector<16x16xf32>
      %808 = arith.addf %803, %807 : vector<16x16xf32>
      %c1_541 = arith.constant 1 : index
      %c5_542 = arith.constant 5 : index
      %c3_543 = arith.constant 3 : index
      %809 = vector.load %arg8[%c1_541, %c5_542, %c3_543] : memref<2x22x22xf32, #tpu.memory_space<vmem>>, vector<1x16x16xf32>
      %810 = vector.shape_cast %809 : vector<1x16x16xf32> to vector<16x16xf32>
      %811 = vector.broadcast %109 : f32 to vector<16x16xf32>
      %812 = arith.mulf %810, %811 : vector<16x16xf32>
      %813 = arith.addf %808, %812 : vector<16x16xf32>
      %c1_544 = arith.constant 1 : index
      %c5_545 = arith.constant 5 : index
      %c4_546 = arith.constant 4 : index
      %814 = vector.load %arg8[%c1_544, %c5_545, %c4_546] : memref<2x22x22xf32, #tpu.memory_space<vmem>>, vector<1x16x16xf32>
      %815 = vector.shape_cast %814 : vector<1x16x16xf32> to vector<16x16xf32>
      %816 = vector.broadcast %110 : f32 to vector<16x16xf32>
      %817 = arith.mulf %815, %816 : vector<16x16xf32>
      %818 = arith.addf %813, %817 : vector<16x16xf32>
      %c1_547 = arith.constant 1 : index
      %c5_548 = arith.constant 5 : index
      %c5_549 = arith.constant 5 : index
      %819 = vector.load %arg8[%c1_547, %c5_548, %c5_549] : memref<2x22x22xf32, #tpu.memory_space<vmem>>, vector<1x16x16xf32>
      %820 = vector.shape_cast %819 : vector<1x16x16xf32> to vector<16x16xf32>
      %821 = vector.broadcast %111 : f32 to vector<16x16xf32>
      %822 = arith.mulf %820, %821 : vector<16x16xf32>
      %823 = arith.addf %818, %822 : vector<16x16xf32>
      %c1_550 = arith.constant 1 : index
      %c5_551 = arith.constant 5 : index
      %c6_552 = arith.constant 6 : index
      %824 = vector.load %arg8[%c1_550, %c5_551, %c6_552] : memref<2x22x22xf32, #tpu.memory_space<vmem>>, vector<1x16x16xf32>
      %825 = vector.shape_cast %824 : vector<1x16x16xf32> to vector<16x16xf32>
      %826 = vector.broadcast %112 : f32 to vector<16x16xf32>
      %827 = arith.mulf %825, %826 : vector<16x16xf32>
      %828 = arith.addf %823, %827 : vector<16x16xf32>
      %c1_553 = arith.constant 1 : index
      %c6_554 = arith.constant 6 : index
      %c0_555 = arith.constant 0 : index
      %829 = vector.load %arg8[%c1_553, %c6_554, %c0_555] : memref<2x22x22xf32, #tpu.memory_space<vmem>>, vector<1x16x16xf32>
      %830 = vector.shape_cast %829 : vector<1x16x16xf32> to vector<16x16xf32>
      %831 = vector.broadcast %113 : f32 to vector<16x16xf32>
      %832 = arith.mulf %830, %831 : vector<16x16xf32>
      %833 = arith.addf %793, %832 : vector<16x16xf32>
      %c1_556 = arith.constant 1 : index
      %c6_557 = arith.constant 6 : index
      %c1_558 = arith.constant 1 : index
      %834 = vector.load %arg8[%c1_556, %c6_557, %c1_558] : memref<2x22x22xf32, #tpu.memory_space<vmem>>, vector<1x16x16xf32>
      %835 = vector.shape_cast %834 : vector<1x16x16xf32> to vector<16x16xf32>
      %836 = vector.broadcast %114 : f32 to vector<16x16xf32>
      %837 = arith.mulf %835, %836 : vector<16x16xf32>
      %838 = arith.addf %833, %837 : vector<16x16xf32>
      %c1_559 = arith.constant 1 : index
      %c6_560 = arith.constant 6 : index
      %c2_561 = arith.constant 2 : index
      %839 = vector.load %arg8[%c1_559, %c6_560, %c2_561] : memref<2x22x22xf32, #tpu.memory_space<vmem>>, vector<1x16x16xf32>
      %840 = vector.shape_cast %839 : vector<1x16x16xf32> to vector<16x16xf32>
      %841 = vector.broadcast %115 : f32 to vector<16x16xf32>
      %842 = arith.mulf %840, %841 : vector<16x16xf32>
      %843 = arith.addf %838, %842 : vector<16x16xf32>
      %c1_562 = arith.constant 1 : index
      %c6_563 = arith.constant 6 : index
      %c3_564 = arith.constant 3 : index
      %844 = vector.load %arg8[%c1_562, %c6_563, %c3_564] : memref<2x22x22xf32, #tpu.memory_space<vmem>>, vector<1x16x16xf32>
      %845 = vector.shape_cast %844 : vector<1x16x16xf32> to vector<16x16xf32>
      %846 = vector.broadcast %116 : f32 to vector<16x16xf32>
      %847 = arith.mulf %845, %846 : vector<16x16xf32>
      %848 = arith.addf %843, %847 : vector<16x16xf32>
      %c1_565 = arith.constant 1 : index
      %c6_566 = arith.constant 6 : index
      %c4_567 = arith.constant 4 : index
      %849 = vector.load %arg8[%c1_565, %c6_566, %c4_567] : memref<2x22x22xf32, #tpu.memory_space<vmem>>, vector<1x16x16xf32>
      %850 = vector.shape_cast %849 : vector<1x16x16xf32> to vector<16x16xf32>
      %851 = vector.broadcast %117 : f32 to vector<16x16xf32>
      %852 = arith.mulf %850, %851 : vector<16x16xf32>
      %853 = arith.addf %848, %852 : vector<16x16xf32>
      %c1_568 = arith.constant 1 : index
      %c6_569 = arith.constant 6 : index
      %c5_570 = arith.constant 5 : index
      %854 = vector.load %arg8[%c1_568, %c6_569, %c5_570] : memref<2x22x22xf32, #tpu.memory_space<vmem>>, vector<1x16x16xf32>
      %855 = vector.shape_cast %854 : vector<1x16x16xf32> to vector<16x16xf32>
      %856 = vector.broadcast %118 : f32 to vector<16x16xf32>
      %857 = arith.mulf %855, %856 : vector<16x16xf32>
      %858 = arith.addf %853, %857 : vector<16x16xf32>
      %c1_571 = arith.constant 1 : index
      %c6_572 = arith.constant 6 : index
      %c6_573 = arith.constant 6 : index
      %859 = vector.load %arg8[%c1_571, %c6_572, %c6_573] : memref<2x22x22xf32, #tpu.memory_space<vmem>>, vector<1x16x16xf32>
      %860 = vector.shape_cast %859 : vector<1x16x16xf32> to vector<16x16xf32>
      %861 = vector.broadcast %119 : f32 to vector<16x16xf32>
      %862 = arith.mulf %860, %861 : vector<16x16xf32>
      %863 = arith.addf %858, %862 : vector<16x16xf32>
      %864 = arith.addf %618, %583 : vector<16x16xf32>
      %865 = arith.addf %863, %828 : vector<16x16xf32>
      %866 = arith.addf %864, %865 : vector<16x16xf32>
      %867 = vector.broadcast %20 : f32 to vector<16x16xf32>
      %868 = arith.mulf %866, %867 : vector<16x16xf32>
      %869 = vector.broadcast %21 : f32 to vector<16x16xf32>
      %870 = arith.addf %868, %869 : vector<16x16xf32>
      %871 = arith.negf %870 : vector<16x16xf32>
      %872 = math.exp %871 : vector<16x16xf32>
      %cst_574 = arith.constant 1.000000e+00 : f32
      %873 = vector.broadcast %cst_574 : f32 to vector<16x16xf32>
      %874 = arith.addf %873, %872 : vector<16x16xf32>
      %875 = arith.divf %873, %874 : vector<16x16xf32>
      %c0_575 = arith.constant 0 : index
      %c0_576 = arith.constant 0 : index
      %c0_577 = arith.constant 0 : index
      %c0_578 = arith.constant 0 : index
      %876 = vector.load %arg5[%c0_575, %c0_576, %c0_577, %c0_578] : memref<1x1x16x16xf32, #tpu.memory_space<vmem>>, vector<1x1x16x16xf32>
      %877 = vector.shape_cast %876 : vector<1x1x16x16xf32> to vector<16x16xf32>
      %878 = vector.shape_cast %875 : vector<16x16xf32> to vector<1x1x16x16xf32>
      tpu.vector_store %arg5[%c0_575, %c0_576, %c0_577, %c0_578], %878 {strides = array<i32>} : memref<1x1x16x16xf32, #tpu.memory_space<vmem>>, vector<1x1x16x16xf32>,
    } else {
    }
    return
  }
  func.func @transform_0(%arg0: i32, %arg1: i32) -> (i32, i32, i32) {
    %c0_i32 = arith.constant 0 : i32
    %c0_i32_0 = arith.constant 0 : i32
    return %arg0, %arg1, %c0_i32 : i32, i32, i32
  }
  func.func @transform_1(%arg0: i32, %arg1: i32) -> i32 {
    %c0_i32 = arith.constant 0 : i32
    %c0_i32_0 = arith.constant 0 : i32
    return %c0_i32 : i32
  }
  func.func @transform_2(%arg0: i32, %arg1: i32) -> i32 {
    %c0_i32 = arith.constant 0 : i32
    %c0_i32_0 = arith.constant 0 : i32
    return %c0_i32 : i32
  }
  func.func @transform_3(%arg0: i32, %arg1: i32) -> (i32, i32, i32, i32) {
    %c0_i32 = arith.constant 0 : i32
    %c0_i32_0 = arith.constant 0 : i32
    %c0_i32_1 = arith.constant 0 : i32
    %c0_i32_2 = arith.constant 0 : i32
    return %arg0, %c0_i32, %c0_i32_0, %c0_i32_1 : i32, i32, i32, i32
  }
}

</mosaic_0001>

<bundles_post_ra>
// kernel: tpu_custom_call.1
= control target key start
LH: loop header
LB: loop body
LE: loop exit
PB: predicated region body
PF: predicated region fallthrough
CT: control target
= control target key end

     0   :  { %s4058_s0 = inlined_call_operand.hbm [shape: f32[2,4,256], index: 0, kind: input, shape index: {}]   ;;  %s4059_s1 = inlined_call_operand.vmem [shape: f32[98], index: 1, kind: input, shape index: {}]   ;;  %s4060_s2 = inlined_call_operand.vmem [shape: f32[2], index: 2, kind: input, shape index: {}]   ;;  %s4061_s3 = inlined_call_operand.hbm [shape: f32[2,1,16,16], index: 3, kind: output, shape index: {}]  }
   0x1   :  { %4081 = sst [smem:[#allocation21_spill]] %s4058_s0 }
   0x2   :  { %4082 = sst [smem:[#allocation22_spill]] %s4059_s1 }
   0x3   :  { %4083 = sst [smem:[#allocation23_spill]] %s4060_s2 }
   0x4   :  { %8 = vsyncpa [#allocation6], 0 }
   0x5   :  { %10 = vsyncpa [#allocation6 + $0x1], 0 }
   0x6   :  { %11 = vsyncpa [#allocation8], 0 }
   0x7   :  { %12 = vsyncpa [#allocation11], 0 }
   0x8   :  { %13 = vsyncpa [#allocation7], 0 }
   0x9   :  { %15 = vsyncpa [#allocation7 + $0x1], 0  ;;  %s2581_s12 = smov 0   ;;  %s2583_s13 = smov 0  }
   0xa   :  { %s2585_s14 = smov 0   ;;  %s2587_s15 = smov 0  }
   0xb   :  { %s2589_s16 = smov 0   ;;  %s2591_s17 = smov 0  }
   0xc LB: > { %4084 = sst [smem:[#allocation17_spill]] %s2525_s14  ;;  %s2156_s18 = sadd.s32 4294967295, %s2537_s17   ;;  %s2537_s17 = sphi %s2591_s17, %s21_s17   ;;  %s2533_s16 = sphi %s2589_s16, %s4114_s16   ;;  %s2529_s15 = sphi %s2587_s15, %s4113_s15   ;;  %s2525_s14 = sphi %s2585_s14, %s4112_s14   ;;  %s2521_s13 = sphi %s2583_s13, %s4116_s13   ;;  %s2517_s12 = sphi %s2581_s12, %s4115_s12  }
   0xd   : > { %4085 = sst [smem:[#allocation18_spill]] %s2533_s16  ;;  %s2157_s19 = sadd.s32 4294967294, %s2537_s17  }
   0xe   : > { %p55_p0 = scmp.ne.s32.totalorder %s2521_s13, %s2517_s12  ;;  %p2615_p1 = scmp.eq.s32.totalorder %s2156_s18, 0 }
   0xf   : > { %p2619_p2 = scmp.eq.s32.totalorder %s2156_s18, 1  ;;  %p127_p3 = scmp.eq.s32.totalorder %s2157_s19, 1 }
  0x10   : > { %s4086_s20 = scalar_select %p2615_p1, 1, 0 }
  0x11   : > { %s4087_s21 = scalar_select %p2619_p2, 1, 0 }
  0x12   : > { %p2625_p4 = por %p2615_p1, %p55_p0  ;;  %p2158_p5 = scmp.ge.s32.totalorder %s2537_s17, 1 }
  0x13   : > { %p2630_p6 = por %p127_p3, %p55_p0  ;;  %p134_p7 = scmp.lt.s32.totalorder %s2537_s17, 3 }
  0x14   : > { %s4088_s22 = scalar_select %p2625_p4, 1, 0 }
  0x15   : > { %s4089_s23 = scalar_select %p2630_p6, 1, 0 }
  0x16   : > { %s4090_s1 = sld [smem:[#allocation22_spill]]  ;;  %p2638_p8 = pnand %p2158_p5, %p134_p7 }
  0x17   : > { %s4092_s2 = sld [smem:[#allocation23_spill]] }
  0x18   : > { %s4091_s27 = scalar_select %p2638_p8, 1, 0 }
  0x19   : > { %p2289_p10 = pneg %p2638_p8 }
  0x1b   : > { %p2650_p11 = pnand %p2289_p10, %p2615_p1 }
  0x1c   : > { %s147_s26 = sshll.u32 %s4090_s1, 4  ;;  %s148_s26 = int_to_ptr.vmem [resolvable:$true] %s147_s26 }
  0x1d   : > { %s158_s30 = sshll.u32 %s4092_s2, 4  ;;  %s2387_s5 = scalar_lea.vmem %s148_s26, 16  ;;  %s159_s30 = int_to_ptr.vmem [resolvable:$true] %s158_s30 }
  0x1e   : > { %p2388_p12 = scmp.ne.s32.totalorder %s148_s26, %s2387_s5  ;;  %p2389_p13 = pneg %p2650_p11 }
  0x1f   : > { %p2395_p5 = scmp.lt.s32.totalorder %s148_s26, %s148_s26  ;;  %p2396_p7 = scmp.lt.s32.totalorder %s2387_s5, %s2387_s5 }
  0x20   : > { %p2390_p0 = pnand %p2389_p13, %p2388_p12 }
  0x21   : > { %p2397_p9 = por %p2396_p7, %p2395_p5 }
  0x22   : > { %p2391_p3 = pneg %p2390_p0 }
  0x24   : > { %p2398_p6 = pnand %p2397_p9, %p2391_p3 }
  0x26   : > { %2401 = shalt.err (!%p2398_p6)
}
  0x27   : > { %s2539_s6 = smov [#allocation9]   ;;  %s2402_s7 = scalar_lea.vmem %s159_s30, 16 }
  0x28   : > { %2292 = dma.vmem_to_smem (!%p2650_p11), %s148_s26, 16, %s2539_s6, [#allocation8]  }
  0x29   : > { %p2403_p10 = scmp.ne.s32.totalorder %s159_s30, %s2402_s7  ;;  %p2410_p8 = scmp.lt.s32.totalorder %s159_s30, %s159_s30 }
  0x2a   : > { %p2411_p2 = scmp.lt.s32.totalorder %s2402_s7, %s2402_s7 }
  0x2b   : > { %p2405_p1 = pnand %p2403_p10, %p2389_p13 }
  0x2c   : > { %p2412_p12 = por %p2411_p2, %p2410_p8 }
  0x2d   : > { %p2406_p4 = pneg %p2405_p1 }
  0x2f   : > { %p2413_p0 = pnand %p2412_p12, %p2406_p4 }
  0x31   : > { %2416 = shalt.err (!%p2413_p0)
}
  0x32   : > { %s2540_s8 = smov [#allocation10]   ;;  %s33_s9 = sadd.s32 1, %s2533_s16 }
  0x33   : > { %2295 = dma.vmem_to_smem (!%p2650_p11), %s159_s30, 16, %s2540_s8, [#allocation11]  }
  0x34   : > { %s42_s10 = sadd.s32 1, %s2525_s14  ;;  %p35_p1 = scmp.ge.s32.totalorder %s33_s9, 2 }
  0x35   : > { %p49_p2 = scmp.ne.s32.totalorder %s2525_s14, %s2521_s13  ;;  %p50_p4 = scmp.eq.s32.totalorder %s2537_s17, 0 }
  0x36   : > { %p2306_p6 = scmp.lt.s32.totalorder %s2537_s17, 2  ;;  %s4118_s9 = smov (%p35_p1, %s33_s9), 0 }
  0x37   : > { %4094 = sst [smem:[#allocation19_spill]] %s4118_s9  ;;  %p51_p8 = por %p50_p4, %p49_p2 }
  0x38   : > { %p4095_p9 = scmp.ne.s32.totalorder %s4087_s21, 0  ;;  %s37_s18 = ssub.s32 %s2533_s16, %s4118_s9 }
  0x39   : > { %s169_s19 = sand.u32 1, %s2525_s14   ;;  %p40_p3 = scmp.eq.s32.totalorder %s37_s18, 0 }
  0x3a   : > { %p2670_p13 = por %p4095_p9, %p49_p2  ;;  %s2162_s24 = sshll.u32 %s169_s19, 3 }
  0x3b   : > { %s2275_s25 = sshll.u32 %s2533_s16, 7  ;;  %s4098_s0 = sld [smem:[#allocation21_spill]] }
  0x3c   : > { %s2679_s26 = scalar_select %p40_p3, %s2525_s14, %s42_s10  }
  0x3d   : > { %s173_s21 = scalar_lea.vmem [#allocation5], %s2162_s24  ;;  %p2688_p11 = pnand %p2306_p6, %p51_p8 }
  0x3e   : > { %4097 = sst [smem:[#allocation20_spill]] %s2679_s26  ;;  %s183_s4 = sshll.u32 %s173_s21, 4  ;;  %s2692_s4 = int_to_ptr.vmem [resolvable:$true] %s183_s4 }
  0x3f   : > { %s170_s6 = scalar_lea.sflag [#allocation6], %s169_s19  ;;  %p2419_p7 = pneg %p2688_p11 }
  0x41   : > { %s2684_s30 = scalar_lea.hbm %s4098_s0, %s2275_s25  ;;  %s2422_s18 = scalar_lea.hbm %s4098_s0, 256 }
  0x42   : > { %s2417_s7 = scalar_lea.hbm %s2684_s30, 128  ;;  %p2423_p0 = scmp.lt.u32.totalorder %s2684_s30, %s4098_s0 }
  0x43   : > { %p2418_p5 = scmp.ne.s32.totalorder %s2684_s30, %s2417_s7  ;;  %p2424_p1 = scmp.lt.u32.totalorder %s2422_s18, %s2417_s7 }
  0x44   : > { %p2426_p4 = scmp.lt.u32.totalorder %s2417_s7, %s2684_s30 }
  0x45   : > { %p2420_p10 = pnand %p2419_p7, %p2418_p5  ;;  %p2425_p2 = por %p2424_p1, %p2423_p0 }
  0x47   : > { %p2421_p12 = pneg %p2420_p10  ;;  %p2427_p6 = por %p2426_p4, %p2425_p2 }
  0x49   : > { %p2428_p8 = pnand %p2427_p6, %p2421_p12 }
  0x4b   : > { %2431 = shalt.err (!%p2428_p8)
}
  0x4c   : > { %s2432_s19 = scalar_lea.vmem %s2692_s4, 128  ;;  %s2541_s28 = smov [#allocation5]  }
  0x4d   : > { %p2433_p9 = scmp.ne.s32.totalorder %s2692_s4, %s2432_s19  ;;  %s2437_s29 = sshll.u32 %s2541_s28, 4  ;;  %s2438_s29 = int_to_ptr.vmem [resolvable:$false] %s2437_s29 }
  0x4e   : > { %s2439_s21 = scalar_lea.vmem %s2438_s29, 256  ;;  %p2440_p10 = scmp.lt.s32.totalorder %s2692_s4, %s2438_s29 }
  0x4f   : > { %p2435_p3 = pnand %p2433_p9, %p2419_p7  ;;  %p2441_p0 = scmp.lt.s32.totalorder %s2439_s21, %s2432_s19 }
  0x51   : > { %p2436_p5 = pneg %p2435_p3  ;;  %p2442_p1 = por %p2441_p0, %p2440_p10 }
  0x53   : > { %p2443_p2 = pnand %p2442_p1, %p2436_p5 }
  0x55   : > { %2446 = shalt.err (!%p2443_p2)
}
  0x56   : > { %2299 = dma.hbm_to_vmem [thread:$0]  (!%p2688_p11), %s2684_s30, 128, %s2692_s4, %s170_s6  }
  0x57   : > { %p4100_p12 = scmp.ne.s32.totalorder %s4091_s27, 0 }
  0x58   : > { %s2722_s7 = sand.u32 (!%p4100_p12), 1, %s2521_s13   ;;  %p4101_p7 = scmp.ne.s32.totalorder (!%p4100_p12), %s4088_s22, 0 }
  0x59   : > { %192 = sbr.rel (%p4100_p12) target bundleno = 807 (0x327), region = 32  ;;  %s2166_s8 = sshll.u32 (!%p4100_p12), %s2722_s7, 3 }
  0x5a   : > { %s195_s10 = scalar_lea.sflag (!%p4100_p12), [#allocation6], %s2722_s7  ;;  %s198_s18 = scalar_lea.vmem (!%p4100_p12), [#allocation5], %s2166_s8 }
  0x60   : > { %2500 = dma.done.wait (%p4101_p7), %s195_s10, 128  }
  0x61   : > { %2502 = vsyncadd (%p4101_p7), %s195_s10, 4294967168  ;;  %p4102_p4 = scmp.ne.s32.totalorder %s4086_s20, 0 }
  0x63   : > { %2504 = dma.done.wait (%p4102_p4), [#allocation8], 16  }
  0x64   : > { %2506 = vsyncadd (%p4102_p4), [#allocation8], 4294967280 }
  0x65   : > { %2508 = dma.done.wait (%p4102_p4), [#allocation11], 16  }
  0x66   : > { %2510 = vsyncadd (%p4102_p4), [#allocation11], 4294967280 }
  0x67   : > { %211 = sfence }
  0x68   : > { %v2542_v0 = vmov -inf   ;;  %v2543_v1 = vmov 0.0   ;;  %vm357_vm0 = vcmask 174080   ;;  %vm360_vm1 = vcmask 23552   ;;  %v238_v2 = vld [vmem:[%s198_s18] sm:$0xff]  ;;  %s2544_s20 = smov 3  }
  0x69   : > { %234 = vst [vmem:[#allocation2] sm:$0xff] %v2542_v0  ;;  %235 = vst [vmem:[#allocation2 + $0x8] sm:$0xff] %v2542_v0  ;;  %vm365_vm2 = vcmask 179352   ;;  %v242_v3 = vcombine.high %v238_v2, %v238_v2  ;;  %vm381_vm3 = vcmask 130048   ;;  %vm410_vm4 = vcmask 261248   ;;  %s2545_s22 = smov 115  }
  0x6a   : > { %236 = vst [vmem:[#allocation3] sm:$0xff] %v2543_v1  ;;  %237 = vst [vmem:[#allocation3 + $0x8] sm:$0xff] %v2543_v1  ;;  %vm438_vm5 = vcmask 392448   ;;  %vm466_vm6 = vcmask 523648   ;;  %vm494_vm7 = vcmask 654848   ;;  %vm522_vm8 = vcmask 786048  }
  0x6b   : > { %358 = vst.msk [vmem:[#allocation4] sm:$0x7] %vm357_vm0, %v2543_v1  ;;  %359 = vst.msk [vmem:[#allocation4 + $0x13] sm:$0x7] %vm357_vm0, %v2543_v1  ;;  %vm550_vm9 = vcmask 917248   ;;  %vm578_vm10 = vcmask 1048448  }
  0x6c   : > { %362 = vst.msk [vmem:[#allocation4 + $0x8] sm:$0xff] %vm360_vm1, %v2543_v1  ;;  %374 = vst.msk [vmem:[#allocation4 + $0x20] sm:$0xff] %vm360_vm1, %v2543_v1  ;;  %s2546_s27 = smov 99   ;;  %s2547_s30 = smov 83   ;;  %vm363_vm11 = vcmask 21504   ;;  %vm368_vm12 = vcmask 177304  }
  0x6d   : > { %371 = vst.msk [vmem:[#allocation4 + $0x18] sm:$0x7] %vm357_vm0, %v2543_v1  ;;  %372 = vst.msk [vmem:[#allocation4 + $0x2b] sm:$0x7] %vm357_vm0, %v2543_v1  ;;  %s2548_s4 = smov 67   ;;  %s2549_s5 = smov 51  }
  0x6e   : > { %361 = vst.msk [vmem:[#allocation4] sm:$0xff] %vm360_vm1, %v2543_v1  ;;  %373 = vst.msk [vmem:[#allocation4 + $0x18] sm:$0xff] %vm360_vm1, %v2543_v1  ;;  %s2550_s6 = smov 35   ;;  %s2551_s24 = smov 19   ;;  %vm393_vm13 = vcmask 147480  }
  0x6f   : > { %367 = vst.msk [vmem:[#allocation4 + $0x8] sm:$0xff] %vm365_vm2, %v2543_v1  ;;  %377 = vst.msk [vmem:[#allocation4 + $0x20] sm:$0xff] %vm365_vm2, %v2543_v1  ;;  %s2856_s25 = sld [smem:[#allocation9 + $0x1]]  ;;  %s2860_s19 = sld [smem:[#allocation9 + $0x2]] }
  0x70   : > { %366 = vst.msk [vmem:[#allocation4] sm:$0xff] %vm365_vm2, %v2543_v1  ;;  %376 = vst.msk [vmem:[#allocation4 + $0x18] sm:$0xff] %vm365_vm2, %v2543_v1  ;;  %v239_v4 = vld [vmem:[#allocation2] sm:$0xf]  ;;  %v240_v5 = vld [vmem:[#allocation2 + $0x8] sm:$0xf] }
  0x71   : > { %v244_v6 = vmax.f32 %v239_v4, %v238_v2  ;;  %v248_v7 = vld [vmem:[#allocation3] sm:$0xf]  ;;  %v245_v8 = vmax.f32 %v240_v5, %v242_v3  ;;  %v249_v9 = vld [vmem:[#allocation3 + $0x8] sm:$0xf]  ;;  %364 = vst.msk [vmem:[#allocation4 + $0x10] sm:$0x3f] %vm363_vm11, %v2543_v1 }
  0x72   : > { %v250_v10 = vadd.f32 %v248_v7, %v238_v2  ;;  %v251_v11 = vadd.f32 %v249_v9, %v242_v3  ;;  %375 = vst.msk [vmem:[#allocation4 + $0x28] sm:$0x3f] %vm363_vm11, %v2543_v1  ;;  %s2865_s28 = sld [smem:[#allocation9 + $0x3]]  ;;  %s2875_s29 = sld [smem:[#allocation9 + $0x4]] }
  0x73   : > { %246 = vst [vmem:[#allocation2] sm:$0xf] %v244_v6  ;;  %247 = vst [vmem:[#allocation2 + $0x8] sm:$0xf] %v245_v8  ;;  %s4074_s21 = smov 127   ;;  %s2884_s8 = sld [smem:[#allocation9 + $0x5]] }
  0x74   : > { %252 = vst [vmem:[#allocation3] sm:$0xf] %v250_v10  ;;  %253 = vst [vmem:[#allocation3 + $0x8] sm:$0xf] %v251_v11  ;;  %s4076_s10 = smov 126   ;;  %s2893_s18 = sld [smem:[#allocation9 + $0x6]] }
  0x75   : > { %369 = vst.msk [vmem:[#allocation4 + $0x10] sm:$0x3f] %vm368_vm12, %v2543_v1  ;;  %378 = vst.msk [vmem:[#allocation4 + $0x28] sm:$0x3f] %vm368_vm12, %v2543_v1  ;;  %s4106_s0 = smov 127   ;;  %s4107_s1 = smov 124  }
  0x76   : > { %s4108_s2 = smov 126   ;;  %s3022_s9 = sld [smem:[#allocation9 + $0x14]] }
  0x77   : > { %s3211_s16 = sld [smem:[#allocation9 + $0xe]]  ;;  %s3252_s26 = sld [smem:[#allocation9 + $0x7]] }
  0x78   : > { %s3295_s14 = sld [smem:[#allocation9 + $0x15]] }
  0x7a   : > { %v2752_v12 = vld [vmem:[#allocation2] sm:$0xff] }
  0x7b   : > { %v382_v13 = vsel %vm381_vm3, %v2752_v12, -inf  ;;  %v411_v14 = vsel %vm410_vm4, %v2752_v12, -inf  ;;  %v439_v15 = vsel %vm438_vm5, %v2752_v12, -inf  ;;  %v2760_v16 = vld [vmem:[#allocation3] sm:$0xff]  ;;  %v467_v17 = vsel %vm466_vm6, %v2752_v12, -inf }
  0x7c   : > { %v383_v18 = vrot.slane %v382_v13, 4  ;;  %v412_v19 = vrot.slane %v411_v14, 4  ;;  %v440_v20 = vrot.slane %v439_v15, 4  ;;  %v423_v21 = vsel %vm410_vm4, %v2760_v16, 0.0 }
  0x7d   : > { %v424_v22 = vrot.slane %v423_v21, 4  ;;  %v468_v23 = vrot.slane %v467_v17, 4  ;;  %v451_v24 = vsel %vm438_vm5, %v2760_v16, 0.0  ;;  %v495_v25 = vsel %vm494_vm7, %v2752_v12, -inf }
  0x7e   : > { %v384_v26 = vmax.f32 %v382_v13, %v383_v18  ;;  %v413_v27 = vmax.f32 %v411_v14, %v412_v19  ;;  %v441_v28 = vmax.f32 %v439_v15, %v440_v20  ;;  %v452_v29 = vrot.slane %v451_v24, 4 }
  0x7f   : > { %v425_v30 = vadd.f32 %v424_v22, %v423_v21  ;;  %v469_v31 = vmax.f32 %v467_v17, %v468_v23  ;;  %v496_v32 = vrot.slane %v495_v25, 4  ;;  %v479_v33 = vsel %vm466_vm6, %v2760_v16, 0.0  ;;  %v2784_v21 = vld [vmem:[#allocation2 + $0x8] sm:$0xff] }
  0x80   : > { %v385_v34 = vrot.slane %v384_v26, 2  ;;  %v414_v35 = vrot.slane %v413_v27, 2  ;;  %v442_v36 = vrot.slane %v441_v28, 2  ;;  %v453_v37 = vadd.f32 %v452_v29, %v451_v24 }
  0x81   : > { %v426_v38 = vrot.slane %v425_v30, 2  ;;  %v470_v39 = vrot.slane %v469_v31, 2  ;;  %v497_v40 = vmax.f32 %v495_v25, %v496_v32  ;;  %v480_v41 = vrot.slane %v479_v33, 4 }
  0x82   : > { %v386_v42 = vmax.f32 %v384_v26, %v385_v34  ;;  %v415_v43 = vmax.f32 %v413_v27, %v414_v35  ;;  %v443_v44 = vmax.f32 %v441_v28, %v442_v36  ;;  %v454_v45 = vrot.slane %v453_v37, 2 }
  0x83   : > { %v427_v46 = vadd.f32 %v426_v38, %v425_v30  ;;  %v471_v47 = vmax.f32 %v469_v31, %v470_v39  ;;  %v498_v48 = vrot.slane %v497_v40, 2  ;;  %v481_v49 = vadd.f32 %v480_v41, %v479_v33 }
  0x84   : > { %v387_v50 = vrot.slane %v386_v42, 1  ;;  %v416_v51 = vrot.slane %v415_v43, 1  ;;  %v444_v52 = vrot.slane %v443_v44, 1  ;;  %v455_v53 = vadd.f32 %v454_v45, %v453_v37 }
  0x85   : > { %v428_v54 = vrot.slane %v427_v46, 1  ;;  %v472_v55 = vrot.slane %v471_v47, 1  ;;  %v499_v56 = vmax.f32 %v497_v40, %v498_v48  ;;  %v482_v57 = vrot.slane %v481_v49, 2 }
  0x86   : > { %v388_v58 = vmax.f32 %v386_v42, %v387_v50  ;;  %v417_v59 = vmax.f32 %v415_v43, %v416_v51  ;;  %v445_v60 = vmax.f32 %v443_v44, %v444_v52  ;;  %v456_v61 = vrot.slane %v455_v53, 1 }
  0x87   : > { %v429_v62 = vadd.f32 %v428_v54, %v427_v46  ;;  %v473_v63 = vmax.f32 %v471_v47, %v472_v55  ;;  %v500_v0 = vrot.slane %v499_v56, 1  ;;  %v483_v2 = vadd.f32 %v482_v57, %v481_v49 }
  0x88   : > { %390 = vrot.lane.b32.xlu0 %v388_v58, %s2544_s20  ;;  %419 = vrot.lane.b32.xlu1 %v417_v59, %s2545_s22  ;;  %v457_v3 = vadd.f32 %v456_v61, %v455_v53  ;;  %v523_v4 = vsel %vm522_vm8, %v2752_v12, -inf  ;;  %v507_v5 = vsel %vm494_vm7, %v2760_v16, 0.0  ;;  %v551_v6 = vsel %vm550_vm9, %v2752_v12, -inf }
  0x89   : > { %v430_v7 = vmul.f32 0.25, %v429_v62  ;;  %v501_v8 = vmax.f32 %v499_v56, %v500_v0  ;;  %v484_v9 = vrot.slane %v483_v2, 1  ;;  %v524_v10 = vrot.slane %v523_v4, 4 }
  0x8a   : > { %v458_v11 = vmul.f32 0.25, %v457_v3  ;;  %v508_v13 = vrot.slane %v507_v5, 4  ;;  %v552_v14 = vrot.slane %v551_v6, 4  ;;  %v535_v15 = vsel %vm522_vm8, %v2760_v16, 0.0 }
  0x8b   : > { %v485_v17 = vadd.f32 %v484_v9, %v483_v2  ;;  %v525_v18 = vmax.f32 %v523_v4, %v524_v10  ;;  %v536_v19 = vrot.slane %v535_v15, 4  ;;  %v579_v20 = vsel %vm578_vm10, %v2752_v12, -inf }
  0x8c   : > { %447 = vrot.lane.b32.xlu0 %v445_v60, %s2546_s27  ;;  %432 = vrot.lane.b32.xlu1 %v430_v7, %s2545_s22  ;;  %v509_v22 = vadd.f32 %v508_v13, %v507_v5  ;;  %v553_v23 = vmax.f32 %v551_v6, %v552_v14  ;;  %v580_v24 = vrot.slane %v579_v20, 4  ;;  %v563_v25 = vsel %vm550_vm9, %v2760_v16, 0.0 }
  0x8d   : > { %v486_v26 = vmul.f32 0.25, %v485_v17  ;;  %v526_v27 = vrot.slane %v525_v18, 2  ;;  %v537_v28 = vadd.f32 %v536_v19, %v535_v15  ;;  %v564_v29 = vrot.slane %v563_v25, 4 }
  0x8e   : > { %v510_v30 = vrot.slane %v509_v22, 2  ;;  %v554_v31 = vrot.slane %v553_v23, 2  ;;  %v581_v12 = vmax.f32 %v579_v20, %v580_v24  ;;  %v606_v32 = vsel %vm381_vm3, %v2784_v21, -inf }
  0x8f   : > { %v527_v33 = vmax.f32 %v525_v18, %v526_v27  ;;  %v538_v34 = vrot.slane %v537_v28, 2  ;;  %v565_v35 = vadd.f32 %v564_v29, %v563_v25  ;;  %v607_v36 = vrot.slane %v606_v32, 4 }
  0x90   : > { %475 = vrot.lane.b32.xlu0 %v473_v63, %s2547_s30  ;;  %460 = vrot.lane.b32.xlu1 %v458_v11, %s2546_s27  ;;  %v511_v37 = vadd.f32 %v510_v30, %v509_v22  ;;  %v555_v38 = vmax.f32 %v553_v23, %v554_v31  ;;  %v582_v39 = vrot.slane %v581_v12, 2  ;;  %v591_v40 = vsel %vm578_vm10, %v2760_v16, 0.0 }
  0x91   : > { %v528_v41 = vrot.slane %v527_v33, 1  ;;  %v539_v42 = vadd.f32 %v538_v34, %v537_v28  ;;  %v566_v43 = vrot.slane %v565_v35, 2  ;;  %v608_v44 = vmax.f32 %v606_v32, %v607_v36 }
  0x92   : > { %v512_v45 = vrot.slane %v511_v37, 1  ;;  %v556_v46 = vrot.slane %v555_v38, 1  ;;  %v583_v47 = vmax.f32 %v581_v12, %v582_v39  ;;  %v592_v48 = vrot.slane %v591_v40, 4 }
  0x93   : > { %v540_v49 = vrot.slane %v539_v42, 1  ;;  %v567_v50 = vadd.f32 %v566_v43, %v565_v35  ;;  %v609_v51 = vrot.slane %v608_v44, 2  ;;  %v529_v52 = vmax.f32 %v527_v33, %v528_v41 }
  0x94   : > { %503 = vrot.lane.b32.xlu0 %v501_v8, %s2548_s4  ;;  %488 = vrot.lane.b32.xlu1 %v486_v26, %s2547_s30  ;;  %v513_v53 = vadd.f32 %v512_v45, %v511_v37  ;;  %v584_v54 = vrot.slane %v583_v47, 1  ;;  %v593_v55 = vadd.f32 %v592_v48, %v591_v40  ;;  %v395_v59 = vsel %vm381_vm3, %v2760_v16, 0.0  ;;  %v605_v37 = vld [vmem:[#allocation3 + $0x8] sm:$0xff] }
  0x95   : > { %v541_v56 = vadd.f32 %v540_v49, %v539_v42  ;;  %v568_v57 = vrot.slane %v567_v50, 1  ;;  %v610_v58 = vmax.f32 %v608_v44, %v609_v51  ;;  %v557_v61 = vmax.f32 %v555_v38, %v556_v46 }
  0x96   : > { %v514_v60 = vmul.f32 0.25, %v513_v53  ;;  %v594_v62 = vrot.slane %v593_v55, 2  ;;  %v396_v63 = vrot.slane %v395_v59, 4  ;;  %v585_v2 = vmax.f32 %v583_v47, %v584_v54 }
  0x97   : > { %v542_v0 = vmul.f32 0.25, %v541_v56  ;;  %v569_v3 = vadd.f32 %v568_v57, %v567_v50  ;;  %v633_v4 = vsel %vm410_vm4, %v2784_v21, -inf  ;;  %v660_v16 = vsel %vm438_vm5, %v2784_v21, -inf }
  0x98   : > { %531 = vrot.lane.b32.xlu0 %v529_v52, %s2549_s5  ;;  %516 = vrot.lane.b32.xlu1 %v514_v60, %s2548_s4  ;;  %v595_v5 = vadd.f32 %v594_v62, %v593_v55  ;;  %v397_v6 = vadd.f32 %v396_v63, %v395_v59  ;;  %v634_v7 = vrot.slane %v633_v4, 4  ;;  %v611_v9 = vrot.slane %v610_v58, 1 }
  0x99   : > { %v570_v8 = vmul.f32 0.25, %v569_v3  ;;  %v661_v10 = vrot.slane %v660_v16, 4  ;;  %v687_v11 = vsel %vm466_vm6, %v2784_v21, -inf  ;;  %v714_v19 = vsel %vm494_vm7, %v2784_v21, -inf }
  0x9a   : > { %v596_v13 = vrot.slane %v595_v5, 1  ;;  %v398_v14 = vrot.slane %v397_v6, 2  ;;  %v635_v15 = vmax.f32 %v633_v4, %v634_v7  ;;  %v688_v17 = vrot.slane %v687_v11, 4 }
  0x9b   : > { %v662_v18 = vmax.f32 %v660_v16, %v661_v10  ;;  %v741_v20 = vsel %vm522_vm8, %v2784_v21, -inf  ;;  %v768_v22 = vsel %vm550_vm9, %v2784_v21, -inf  ;;  %v715_v29 = vrot.slane %v714_v19, 4 }
  0x9c   : > { %559 = vrot.lane.b32.xlu0 %v557_v61, %s2550_s6  ;;  %544 = vrot.lane.b32.xlu1 %v542_v0, %s2549_s5  ;;  %v597_v23 = vadd.f32 %v596_v13, %v595_v5  ;;  %v399_v24 = vadd.f32 %v398_v14, %v397_v6  ;;  %v636_v25 = vrot.slane %v635_v15, 2  ;;  %v689_v26 = vmax.f32 %v687_v11, %v688_v17 }
  0x9d   : > { %v663_v27 = vrot.slane %v662_v18, 2  ;;  %v742_v31 = vrot.slane %v741_v20, 4  ;;  %v769_v12 = vrot.slane %v768_v22, 4  ;;  %v612_v32 = vmax.f32 %v610_v58, %v611_v9 }
  0x9e   : > { %v400_v28 = vrot.slane %v399_v24, 1  ;;  %v637_v30 = vmax.f32 %v635_v15, %v636_v25  ;;  %v598_v33 = vmul.f32 0.25, %v597_v23  ;;  %v690_v35 = vrot.slane %v689_v26, 2 }
  0x9f   : > { %v664_v36 = vmax.f32 %v662_v18, %v663_v27  ;;  %v716_v38 = vmax.f32 %v714_v19, %v715_v29  ;;  %v743_v40 = vmax.f32 %v741_v20, %v742_v31  ;;  %v770_v41 = vmax.f32 %v768_v22, %v769_v12 }
  0xa0   : > { %587 = vrot.lane.b32.xlu0 %v585_v2, %s2551_s24  ;;  %572 = vrot.lane.b32.xlu1 %v570_v8, %s2550_s6  ;;  %v401_v34 = vadd.f32 %v400_v28, %v399_v24  ;;  %v638_v39 = vrot.slane %v637_v30, 1  ;;  %v691_v43 = vmax.f32 %v689_v26, %v690_v35  ;;  %v618_v44 = vsel %vm381_vm3, %v605_v37, 0.0 }
  0xa1   : > { %v645_v45 = vsel %vm410_vm4, %v605_v37, 0.0  ;;  %v665_v46 = vrot.slane %v664_v36, 1  ;;  %v795_v47 = vsel %vm578_vm10, %v2784_v21, -inf  ;;  %v619_v48 = vrot.slane %v618_v44, 4 }
  0xa2   : > { %v402_v42 = vmul.f32 0.25, %v401_v34  ;;  %v717_v49 = vrot.slane %v716_v38, 2  ;;  %v646_v50 = vrot.slane %v645_v45, 4  ;;  %v672_v51 = vsel %vm438_vm5, %v605_v37, 0.0 }
  0xa3   : > { %v699_v52 = vsel %vm466_vm6, %v605_v37, 0.0  ;;  %v639_v53 = vmax.f32 %v637_v30, %v638_v39  ;;  %v744_v54 = vrot.slane %v743_v40, 2  ;;  %v771_v55 = vrot.slane %v770_v41, 2 }
  0xa4   : > { %614 = vrot.lane.b32.xlu0 %v612_v32, %s2544_s20  ;;  %600 = vrot.lane.b32.xlu1 %v598_v33, %s2551_s24  ;;  %v620_v56 = vadd.f32 %v619_v48, %v618_v44  ;;  %v692_v57 = vrot.slane %v691_v43, 1  ;;  %v647_v58 = vadd.f32 %v646_v50, %v645_v45  ;;  %v673_v59 = vrot.slane %v672_v51, 4 }
  0xa5   : > { %v700_v60 = vrot.slane %v699_v52, 4  ;;  %v796_v61 = vrot.slane %v795_v47, 4  ;;  %v726_v21 = vsel %vm494_vm7, %v605_v37, 0.0  ;;  %v753_v63 = vsel %vm522_vm8, %v605_v37, 0.0 }
  0xa6   : > { %v621_v62 = vrot.slane %v620_v56, 2  ;;  %v648_v0 = vrot.slane %v647_v58, 2  ;;  %v674_v2 = vadd.f32 %v673_v59, %v672_v51  ;;  %v780_v4 = vsel %vm550_vm9, %v605_v37, 0.0 }
  0xa7   : > { %v701_v3 = vadd.f32 %v700_v60, %v699_v52  ;;  %v666_v5 = vmax.f32 %v664_v36, %v665_v46  ;;  %v727_v7 = vrot.slane %v726_v21, 4  ;;  %v754_v16 = vrot.slane %v753_v63, 4 }
  0xa8   : > { %404 = vrot.lane.b32.xlu0 %v402_v42, %s2544_s20  ;;  %v622_v6 = vadd.f32 %v621_v62, %v620_v56  ;;  %v718_v8 = vmax.f32 %v716_v38, %v717_v49  ;;  %v649_v9 = vadd.f32 %v648_v0, %v647_v58  ;;  %v675_v10 = vrot.slane %v674_v2, 2 }
  0xa9   : > { %v702_v11 = vrot.slane %v701_v3, 2  ;;  %v745_v13 = vmax.f32 %v743_v40, %v744_v54  ;;  %v728_v15 = vadd.f32 %v727_v7, %v726_v21  ;;  %v781_v17 = vrot.slane %v780_v4, 4 }
  0xaa   : > { %v623_v14 = vrot.slane %v622_v6, 1  ;;  %v650_v18 = vrot.slane %v649_v9, 1  ;;  %v676_v19 = vadd.f32 %v675_v10, %v674_v2  ;;  %v755_v22 = vadd.f32 %v754_v16, %v753_v63 }
  0xab   : > { %v703_v20 = vadd.f32 %v702_v11, %v701_v3  ;;  %v693_v23 = vmax.f32 %v691_v43, %v692_v57  ;;  %v797_v24 = vmax.f32 %v795_v47, %v796_v61  ;;  %v729_v26 = vrot.slane %v728_v15, 2 }
  0xac   : > { %641 = vrot.lane.b32.xlu0 %v639_v53, %s2545_s22  ;;  %v624_v25 = vadd.f32 %v623_v14, %v622_v6  ;;  %v719_v27 = vrot.slane %v718_v8, 1  ;;  %v651_v28 = vadd.f32 %v650_v18, %v649_v9  ;;  %v677_v29 = vrot.slane %v676_v19, 1 }
  0xad   : > { %v807_v30 = vsel %vm578_vm10, %v605_v37, 0.0  ;;  %v772_v12 = vmax.f32 %v770_v41, %v771_v55  ;;  %v704_v32 = vrot.slane %v703_v20, 1  ;;  %v756_v33 = vrot.slane %v755_v22, 2 }
  0xae   : > { %v625_v31 = vmul.f32 0.25, %v624_v25  ;;  %v782_v34 = vadd.f32 %v781_v17, %v780_v4  ;;  %v652_v35 = vmul.f32 0.25, %v651_v28  ;;  %v678_v36 = vadd.f32 %v677_v29, %v676_v19 }
  0xaf   : > { %v730_v38 = vadd.f32 %v729_v26, %v728_v15  ;;  %v808_v39 = vrot.slane %v807_v30, 4  ;;  %v720_v40 = vmax.f32 %v718_v8, %v719_v27  ;;  %v746_v42 = vrot.slane %v745_v13, 1 }
  0xb0   : > { %668 = vrot.lane.b32.xlu0 %v666_v5, %s2546_s27  ;;  %627 = vrot.lane.b32.xlu1 %v625_v31, %s2544_s20  ;;  %v798_v43 = vrot.slane %v797_v24, 2  ;;  %v773_v44 = vrot.slane %v772_v12, 1  ;;  %v757_v45 = vadd.f32 %v756_v33, %v755_v22  ;;  %v783_v46 = vrot.slane %v782_v34, 2  ;;  %s4070_s20 = smov 125  }
  0xb1   : > { %v679_v37 = vmul.f32 0.25, %v678_v36  ;;  %v705_v41 = vadd.f32 %v704_v32, %v703_v20  ;;  %v731_v47 = vrot.slane %v730_v38, 1  ;;  %v809_v48 = vadd.f32 %v808_v39, %v807_v30 }
  0xb2   : > { %v747_v49 = vmax.f32 %v745_v13, %v746_v42  ;;  %v799_v50 = vmax.f32 %v797_v24, %v798_v43  ;;  %v784_v51 = vadd.f32 %v783_v46, %v782_v34  ;;  %v758_v54 = vrot.slane %v757_v45, 1 }
  0xb3   : > { %v706_v52 = vmul.f32 0.25, %v705_v41  ;;  %v732_v53 = vadd.f32 %v731_v47, %v730_v38  ;;  %v810_v55 = vrot.slane %v809_v48, 2  ;;  %v774_v56 = vmax.f32 %v772_v12, %v773_v44 }
  0xb4   : > { %695 = vrot.lane.b32.xlu0 %v693_v23, %s2547_s30  ;;  %654 = vrot.lane.b32.xlu1 %v652_v35, %s2545_s22  ;;  %v800_v57 = vrot.slane %v799_v50, 1  ;;  %v759_v59 = vadd.f32 %v758_v54, %v757_v45  ;;  %v785_v60 = vrot.slane %v784_v51, 1  ;;  %v827_v14 = vstv %s2856_s25  ;;  %s2901_s22 = sld [smem:[#allocation9 + $0x8]] }
  0xb5   : > { %v733_v58 = vmul.f32 0.25, %v732_v53  ;;  %v811_v61 = vadd.f32 %v810_v55, %v809_v48  ;;  %v840_v20 = vstv %s2860_s19  ;;  %v853_v25 = vstv %s2865_s28  ;;  %s2973_s25 = sld [smem:[#allocation9 + $0x10]]  ;;  %s2987_s19 = sld [smem:[#allocation9 + $0x11]] }
  0xb6   : > { %v801_v62 = vmax.f32 %v799_v50, %v800_v57  ;;  %v760_v1 = vmul.f32 0.25, %v759_v59  ;;  %v786_v21 = vadd.f32 %v785_v60, %v784_v51  ;;  %v866_v29 = vstv %s2875_s29  ;;  %s2999_s28 = sld [smem:[#allocation9 + $0x12]]  ;;  %s3011_s29 = sld [smem:[#allocation9 + $0x13]] }
  0xb7   : > { %v812_v63 = vrot.slane %v811_v61, 1  ;;  %v879_v12 = vstv %s2884_s8  ;;  %v892_v34 = vstv %s2893_s18  ;;  %s3033_s8 = sld [smem:[#allocation9 + $0x16]]  ;;  %s3042_s18 = sld [smem:[#allocation9 + $0x17]] }
  0xb8   : > { %722 = vrot.lane.b32.xlu0 %v720_v40, %s2548_s4  ;;  %681 = vrot.lane.b32.xlu1 %v679_v37, %s2546_s27  ;;  %v787_v0 = vmul.f32 0.25, %v786_v21  ;;  %s4072_s27 = smov 124  }
  0xb9   : > { %v813_v2 = vadd.f32 %v812_v63, %v811_v61 }
  0xba   : > { %v912_v39 = vstv %s2901_s22  ;;  %s3053_s22 = sld [smem:[#allocation9 + $0x18]] }
  0xbb   : > { %v814_v3 = vmul.f32 0.25, %v813_v2 }
  0xbc   : > { %749 = vrot.lane.b32.xlu0 %v747_v49, %s2549_s5  ;;  %708 = vrot.lane.b32.xlu1 %v706_v52, %s2547_s30  ;;  %s2909_s30 = sld [smem:[#allocation9 + $0x9]] }
  0xc0   : > { %776 = vrot.lane.b32.xlu0 %v774_v56, %s2550_s6  ;;  %735 = vrot.lane.b32.xlu1 %v733_v58, %s2548_s4  ;;  %s4068_s4 = smov 123  }
  0xc2   : > { %v925_v44 = vstv %s2909_s30  ;;  %s3071_s30 = sld [smem:[#allocation9 + $0x1a]] }
  0xc4   : > { %803 = vrot.lane.b32.xlu0 %v801_v62, %s2551_s24  ;;  %762 = vrot.lane.b32.xlu1 %v760_v1, %s2549_s5  ;;  %s2919_s5 = sld [smem:[#allocation9 + $0xa]] }
  0xc8   : > { %789 = vrot.lane.b32.xlu1 %v787_v0, %s2550_s6  ;;  %s4066_s6 = smov 122  }
  0xca   : > { %v938_v41 = vstv %s2919_s5  ;;  %s3084_s5 = sld [smem:[#allocation9 + $0x1b]] }
  0xcc   : > { %816 = vrot.lane.b32.xlu1 %v814_v3, %s2551_s24  ;;  %s2928_s24 = sld [smem:[#allocation9 + $0xb]] }
  0xd2   : > { %v951_v50 = vstv %s2928_s24  ;;  %s3128_s24 = sld [smem:[#allocation9 + $0x20]] }
  0xfa   : > { %v391_v4 = vpop.permute.xlu0 %390  ;;  %v420_v5 = vpop.permute.xlu1 %419 }
  0xfb   : > { %394 = vst.msk [vmem:[#allocation4 + $0x3] sm:$0x1] %vm393_vm13, %v391_v4  ;;  %422 = vst.msk [vmem:[#allocation4 + $0x4] sm:$0x1] %vm393_vm13, %v420_v5  ;;  %v1010_v5 = vstv %s2973_s25  ;;  %s3137_s25 = sld [smem:[#allocation9 + $0x21]] }
  0xfe   : > { %v448_v6 = vpop.permute.xlu0 %447  ;;  %v433_v7 = vpop.permute.xlu1 %432 }
  0xff   : > { %450 = vst.msk [vmem:[#allocation4 + $0x5] sm:$0x1] %vm393_vm13, %v448_v6  ;;  %435 = vst.msk [vmem:[#allocation4 + $0x1c] sm:$0x1] %vm393_vm13, %v433_v7 }
 0x102   : > { %v476_v16 = vpop.permute.xlu0 %475  ;;  %v461_v8 = vpop.permute.xlu1 %460 }
 0x103   : > { %478 = vst.msk [vmem:[#allocation4 + $0x6] sm:$0x1] %vm393_vm13, %v476_v16  ;;  %463 = vst.msk [vmem:[#allocation4 + $0x1d] sm:$0x1] %vm393_vm13, %v461_v8  ;;  %v1023_v8 = vstv %s2987_s19  ;;  %s3148_s19 = sld [smem:[#allocation9 + $0x22]] }
 0x106   : > { %v504_v9 = vpop.permute.xlu0 %503  ;;  %v489_v10 = vpop.permute.xlu1 %488 }
 0x107   : > { %506 = vst.msk [vmem:[#allocation4 + $0x7] sm:$0x1] %vm393_vm13, %v504_v9  ;;  %491 = vst.msk [vmem:[#allocation4 + $0x1e] sm:$0x1] %vm393_vm13, %v489_v10 }
 0x10a   : > { %v532_v11 = vpop.permute.xlu0 %531  ;;  %v517_v13 = vpop.permute.xlu1 %516 }
 0x10b   : > { %534 = vst.msk [vmem:[#allocation4 + $0x8] sm:$0x1] %vm393_vm13, %v532_v11  ;;  %519 = vst.msk [vmem:[#allocation4 + $0x1f] sm:$0x1] %vm393_vm13, %v517_v13  ;;  %v1036_v11 = vstv %s2999_s28  ;;  %s3157_s28 = sld [smem:[#allocation9 + $0x24]] }
 0x10e   : > { %v560_v15 = vpop.permute.xlu0 %559  ;;  %v2867_v17 = vld [vmem:[#allocation4] sm:$0xff]  ;;  %v545_v18 = vpop.permute.xlu1 %544 }
 0x10f   : > { %562 = vst.msk [vmem:[#allocation4 + $0x9] sm:$0x1] %vm393_vm13, %v560_v15  ;;  %v828_v19 = vmul.f32 %v827_v14, %v2867_v17  ;;  %547 = vst.msk [vmem:[#allocation4 + $0x20] sm:$0x1] %vm393_vm13, %v545_v18  ;;  %v841_v24 = vmul.f32 %v840_v20, %v2867_v17  ;;  %v854_v28 = vmul.f32 %v853_v25, %v2867_v17  ;;  %v1049_v18 = vstv %s3011_s29  ;;  %s3166_s29 = sld [smem:[#allocation9 + $0x25]] }
 0x110   : > { %v867_v31 = vmul.f32 %v866_v29, %v2867_v17  ;;  %v880_v33 = vmul.f32 %v879_v12, %v2867_v17  ;;  %v893_v36 = vmul.f32 %v892_v34, %v2867_v17 }
 0x111   : > { %832 = vrot.lane.b32.xlu0 %v828_v19, %s4074_s21 }
 0x112   : > { %v588_v22 = vpop.permute.xlu0 %587  ;;  %v573_v23 = vpop.permute.xlu1 %572  ;;  %v2916_v38 = vld [vmem:[#allocation4 + $0x1] sm:$0xff] }
 0x113   : > { %590 = vst.msk [vmem:[#allocation4 + $0xa] sm:$0x1] %vm393_vm13, %v588_v22  ;;  %575 = vst.msk [vmem:[#allocation4 + $0x21] sm:$0x1] %vm393_vm13, %v573_v23  ;;  %v913_v43 = vmul.f32 %v912_v39, %v2916_v38  ;;  %v926_v37 = vmul.f32 %v925_v44, %v2916_v38  ;;  %v939_v49 = vmul.f32 %v938_v41, %v2916_v38  ;;  %v1062_v22 = vstv %s3022_s9  ;;  %s3062_s9 = sld [smem:[#allocation9 + $0x19]] }
 0x114   : > { %v952_v54 = vmul.f32 %v951_v50, %v2916_v38 }
 0x115   : > { %845 = vrot.lane.b32.xlu0 %v841_v24, %s4076_s10 }
 0x116   : > { %v615_v26 = vpop.permute.xlu0 %614  ;;  %v601_v27 = vpop.permute.xlu1 %600  ;;  %v2984_v63 = vld [vmem:[#allocation4 + $0x2] sm:$0xff] }
 0x117   : > { %617 = vst.msk [vmem:[#allocation4 + $0xb] sm:$0x1] %vm393_vm13, %v615_v26  ;;  %603 = vst.msk [vmem:[#allocation4 + $0x22] sm:$0x1] %vm393_vm13, %v601_v27  ;;  %v1011_v7 = vmul.f32 %v1010_v5, %v2984_v63  ;;  %v1024_v9 = vmul.f32 %v1023_v8, %v2984_v63  ;;  %v1050_v19 = vmul.f32 %v1049_v18, %v2984_v63  ;;  %v1082_v26 = vstv %s3033_s8  ;;  %s3170_s8 = sld [smem:[#allocation9]] }
 0x118   : > { %v1063_v23 = vmul.f32 %v1062_v22, %v2984_v63 }
 0x119   : > { %858 = vrot.lane.b32.xlu0 %v854_v28, %s4070_s20 }
 0x11a   : > { %v405_v30 = vpop.permute.xlu0 %404 }
 0x11b   : > { %407 = vst.msk [vmem:[#allocation4 + $0x1b] sm:$0x1] %vm393_vm13, %v405_v30 }
 0x11d   : > { %871 = vrot.lane.b32.xlu0 %v867_v31, %s4072_s27 }
 0x11e   : > { %v642_v32 = vpop.permute.xlu0 %641 }
 0x11f   : > { %644 = vst.msk [vmem:[#allocation4 + $0xc] sm:$0x1] %vm393_vm13, %v642_v32 }
 0x121   : > { %884 = vrot.lane.b32.xlu0 %v880_v33, %s4068_s4  ;;  %s2946_s4 = sld [smem:[#allocation9 + $0xd]] }
 0x122   : > { %v669_v35 = vpop.permute.xlu0 %668  ;;  %v628_v40 = vpop.permute.xlu1 %627 }
 0x123   : > { %671 = vst.msk [vmem:[#allocation4 + $0xd] sm:$0x1] %vm393_vm13, %v669_v35  ;;  %630 = vst.msk [vmem:[#allocation4 + $0x23] sm:$0x1] %vm393_vm13, %v628_v40  ;;  %v1134_v40 = vstv %s3071_s30  ;;  %s3222_s30 = sld [smem:[#allocation9 + $0x29]] }
 0x125   : > { %897 = vrot.lane.b32.xlu0 %v893_v36, %s4066_s6  ;;  %s2937_s6 = sld [smem:[#allocation9 + $0xc]] }
 0x126   : > { %v696_v42 = vpop.permute.xlu0 %695  ;;  %v655_v45 = vpop.permute.xlu1 %654 }
 0x127   : > { %698 = vst.msk [vmem:[#allocation4 + $0xe] sm:$0x1] %vm393_vm13, %v696_v42  ;;  %657 = vst.msk [vmem:[#allocation4 + $0x24] sm:$0x1] %vm393_vm13, %v655_v45  ;;  %v977_v61 = vstv %s2946_s4  ;;  %s3095_s4 = sld [smem:[#allocation9 + $0x1d]] }
 0x128   : > { %v978_v1 = vmul.f32 %v977_v61, %v2916_v38 }
 0x129   : > { %917 = vrot.lane.b32.xlu0 %v913_v43, %s4074_s21 }
 0x12a   : > { %v723_v46 = vpop.permute.xlu0 %722  ;;  %v682_v47 = vpop.permute.xlu1 %681 }
 0x12b   : > { %725 = vst.msk [vmem:[#allocation4 + $0xf] sm:$0x1] %vm393_vm13, %v723_v46  ;;  %684 = vst.msk [vmem:[#allocation4 + $0x25] sm:$0x1] %vm393_vm13, %v682_v47  ;;  %v964_v56 = vstv %s2937_s6  ;;  %s3106_s6 = sld [smem:[#allocation9 + $0x1e]] }
 0x12c   : > { %v965_v59 = vmul.f32 %v964_v56, %v2916_v38 }
 0x12d   : > { %930 = vrot.lane.b32.xlu0 %v926_v37, %s4076_s10  ;;  %v3114_v37 = vld [vmem:[#allocation4 + $0x4] sm:$0xff] }
 0x12e   : > { %v750_v48 = vpop.permute.xlu0 %749  ;;  %v709_v51 = vpop.permute.xlu1 %708 }
 0x12f   : > { %752 = vst.msk [vmem:[#allocation4 + $0x10] sm:$0x1] %vm393_vm13, %v750_v48  ;;  %711 = vst.msk [vmem:[#allocation4 + $0x26] sm:$0x1] %vm393_vm13, %v709_v51 }
 0x131   : > { %943 = vrot.lane.b32.xlu0 %v939_v49, %s4070_s20  ;;  %s2960_s20 = sld [smem:[#allocation9 + $0xf]]  ;;  %v1180_v49 = vstv %s3106_s6  ;;  %s3265_s6 = sld [smem:[#allocation9 + $0x2d]] }
 0x132   : > { %v777_v52 = vpop.permute.xlu0 %776  ;;  %v2949_v53 = vld [vmem:[#allocation4 + $0x8] sm:$0xff]  ;;  %v736_v57 = vpop.permute.xlu1 %735 }
 0x133   : > { %779 = vst.msk [vmem:[#allocation4 + $0x11] sm:$0x1] %vm393_vm13, %v777_v52  ;;  %v829_v55 = vmul.f32 %v827_v14, %v2949_v53  ;;  %738 = vst.msk [vmem:[#allocation4 + $0x27] sm:$0x1] %vm393_vm13, %v736_v57  ;;  %v842_v60 = vmul.f32 %v840_v20, %v2949_v53  ;;  %v855_v21 = vmul.f32 %v853_v25, %v2949_v53  ;;  %v3050_v25 = vld [vmem:[#allocation4 + $0x3] sm:$0xff] }
 0x134   : > { %v868_v4 = vmul.f32 %v866_v29, %v2949_v53  ;;  %v881_v16 = vmul.f32 %v879_v12, %v2949_v53  ;;  %v894_v10 = vmul.f32 %v892_v34, %v2949_v53  ;;  %v1037_v14 = vmul.f32 %v1036_v11, %v2984_v63 }
 0x135   : > { %956 = vrot.lane.b32.xlu0 %v952_v54, %s4072_s27  ;;  %834 = vrot.lane.b32.xlu1 %v829_v55, %s4074_s21  ;;  %s4103_s27 = smov 123   ;;  %s4104_s21 = smov 122   ;;  %v1083_v27 = vmul.f32 %v1082_v26, %v3050_v25  ;;  %v1095_v29 = vstv %s3042_s18  ;;  %v1108_v12 = vstv %s3053_s22  ;;  %v1135_v42 = vmul.f32 %v1134_v40, %v3050_v25 }
 0x136   : > { %v804_v58 = vpop.permute.xlu0 %803  ;;  %v763_v62 = vpop.permute.xlu1 %762  ;;  %v3020_v13 = vld [vmem:[#allocation4 + $0x9] sm:$0xff]  ;;  %v1096_v30 = vmul.f32 %v1095_v29, %v3050_v25  ;;  %v1109_v32 = vmul.f32 %v1108_v12, %v3050_v25  ;;  %v1121_v34 = vstv %s3062_s9  ;;  %s3181_s18 = sld [smem:[#allocation9 + $0x26]]  ;;  %s3192_s22 = sld [smem:[#allocation9 + $0x27]] }
 0x137   : > { %806 = vst.msk [vmem:[#allocation4 + $0x12] sm:$0x1] %vm393_vm13, %v804_v58  ;;  %765 = vst.msk [vmem:[#allocation4 + $0x28] sm:$0x1] %vm393_vm13, %v763_v62  ;;  %v997_v0 = vstv %s2960_s20  ;;  %v914_v15 = vmul.f32 %v912_v39, %v3020_v13  ;;  %v927_v20 = vmul.f32 %v925_v44, %v3020_v13  ;;  %v940_v24 = vmul.f32 %v938_v41, %v3020_v13  ;;  %s3117_s20 = sld [smem:[#allocation9 + $0x1f]]  ;;  %s3207_s9 = sld [smem:[#allocation9 + $0x28]] }
 0x138   : > { %v998_v3 = vmul.f32 %v997_v0, %v2984_v63  ;;  %v953_v28 = vmul.f32 %v951_v50, %v3020_v13  ;;  %v966_v31 = vmul.f32 %v964_v56, %v3020_v13  ;;  %v979_v33 = vmul.f32 %v977_v61, %v3020_v13 }
 0x139   : > { %969 = vrot.lane.b32.xlu0 %v965_v59, %s4103_s27  ;;  %847 = vrot.lane.b32.xlu1 %v842_v60, %s4076_s10  ;;  %s4105_s10 = smov 125   ;;  %v1122_v36 = vmul.f32 %v1121_v34, %v3050_v25  ;;  %v1147_v44 = vstv %s3084_s5  ;;  %v1167_v41 = vstv %s3095_s4  ;;  %v1181_v50 = vmul.f32 %v1180_v49, %v3114_v37  ;;  %s3233_s5 = sld [smem:[#allocation9 + $0x2b]] }
 0x13a   : > { %v790_v2 = vpop.permute.xlu1 %789  ;;  %v3082_v35 = vld [vmem:[#allocation4 + $0xa] sm:$0xff]  ;;  %v1148_v45 = vmul.f32 %v1147_v44, %v3050_v25  ;;  %v1168_v47 = vmul.f32 %v1167_v41, %v3114_v37  ;;  %v1206_v56 = vstv %s3128_s24  ;;  %v1219_v60 = vstv %s3137_s25  ;;  %s3245_s4 = sld [smem:[#allocation9 + $0x2c]]  ;;  %s3291_s24 = sld [smem:[#allocation9 + $0x2f]] }
 0x13b   : > { %792 = vst.msk [vmem:[#allocation4 + $0x29] sm:$0x1] %vm393_vm13, %v790_v2  ;;  %v999_v39 = vmul.f32 %v997_v0, %v3082_v35  ;;  %v1012_v43 = vmul.f32 %v1010_v5, %v3082_v35  ;;  %v1025_v46 = vmul.f32 %v1023_v8, %v3082_v35  ;;  %v1038_v48 = vmul.f32 %v1036_v11, %v3082_v35  ;;  %s3306_s25 = sld [smem:[#allocation9 + $0x30]] }
 0x13c   : > { %v1051_v51 = vmul.f32 %v1049_v18, %v3082_v35  ;;  %v1064_v55 = vmul.f32 %v1062_v22, %v3082_v35  ;;  %v1207_v58 = vmul.f32 %v1206_v56, %v3114_v37  ;;  %v1220_v61 = vmul.f32 %v1219_v60, %v3114_v37 }
 0x13d   : > { %982 = vrot.lane.b32.xlu0 %v978_v1, %s4104_s21  ;;  %860 = vrot.lane.b32.xlu1 %v855_v21, %s4105_s10  ;;  %v1193_v52 = vstv %s3117_s20  ;;  %v1232_v1 = vstv %s3148_s19  ;;  %s3276_s20 = sld [smem:[#allocation9 + $0x2e]]  ;;  %s3317_s19 = sld [smem:[#allocation9 + $0x32]] }
 0x13e   : > { %v817_v6 = vpop.permute.xlu1 %816  ;;  %v1194_v54 = vmul.f32 %v1193_v52, %v3114_v37  ;;  %v3146_v57 = vld [vmem:[#allocation4 + $0xb] sm:$0xff]  ;;  %v1233_v0 = vmul.f32 %v1232_v1, %v3114_v37  ;;  %v822_v8 = vstv %s3170_s8  ;;  %s3361_s8 = sld [smem:[#allocation9 + $0x35]] }
 0x13f   : > { %819 = vst.msk [vmem:[#allocation4 + $0x2a] sm:$0x1] %vm393_vm13, %v817_v6  ;;  %v1084_v59 = vmul.f32 %v1082_v26, %v3146_v57  ;;  %v1097_v62 = vmul.f32 %v1095_v29, %v3146_v57  ;;  %v1110_v2 = vmul.f32 %v1108_v12, %v3146_v57  ;;  %v1136_v11 = vmul.f32 %v1134_v40, %v3146_v57 }
 0x140   : > { %v992_v12 = vstv %s3211_s16  ;;  %v1317_v40 = vstv %s3222_s30  ;;  %s3393_s16 = sld [smem:[#allocation9 + $0x37]]  ;;  %s3419_s30 = sld [smem:[#allocation9 + $0x3a]] }
 0x141   : > { %1002 = vrot.lane.b32.xlu0 %v998_v3, %s4106_s0  ;;  %873 = vrot.lane.b32.xlu1 %v868_v4, %s4107_s1  ;;  %v3178_v3 = vld [vmem:[#allocation4 + $0x5] sm:$0xff]  ;;  %v1252_v4 = vstv %s3157_s28  ;;  %s3332_s28 = sld [smem:[#allocation9 + $0x33]] }
 0x142   : > { %v1253_v6 = vmul.f32 %v1252_v4, %v3178_v3 }
 0x145   : > { %1015 = vrot.lane.b32.xlu0 %v1011_v7, %s4108_s2  ;;  %886 = vrot.lane.b32.xlu1 %v881_v16, %s4103_s27  ;;  %v1123_v7 = vmul.f32 %v1121_v34, %v3146_v57  ;;  %v1265_v16 = vstv %s3166_s29  ;;  %s3350_s29 = sld [smem:[#allocation9 + $0x34]] }
 0x149   : > { %1028 = vrot.lane.b32.xlu0 %v1024_v9, %s4105_s10  ;;  %899 = vrot.lane.b32.xlu1 %v894_v10, %s4104_s21  ;;  %v1266_v10 = vmul.f32 %v1265_v16, %v3178_v3 }
 0x14d   : > { %1041 = vrot.lane.b32.xlu0 %v1037_v14, %s4107_s1  ;;  %919 = vrot.lane.b32.xlu1 %v914_v15, %s4106_s0  ;;  %v823_v14 = vmul.f32 %v822_v8, %v2867_v17  ;;  %v1278_v15 = vstv %s3181_s18  ;;  %v1149_v17 = vmul.f32 %v1147_v44, %v3146_v57  ;;  %s3372_s18 = sld [smem:[#allocation9 + $0x36]] }
 0x151   : > { %1054 = vrot.lane.b32.xlu0 %v1050_v19, %s4103_s27  ;;  %932 = vrot.lane.b32.xlu1 %v927_v20, %s4108_s2  ;;  %v1279_v20 = vmul.f32 %v1278_v15, %v3178_v3 }
 0x155   : > { %1067 = vrot.lane.b32.xlu0 %v1063_v23, %s4104_s21  ;;  %945 = vrot.lane.b32.xlu1 %v940_v24, %s4105_s10  ;;  %v1291_v23 = vstv %s3192_s22  ;;  %v3220_v24 = vld [vmem:[#allocation4 + $0xc] sm:$0xff]  ;;  %s3379_s22 = sld [smem:[#allocation9 + $0x1c]] }
 0x156   : > { %v1169_v29 = vmul.f32 %v1167_v41, %v3220_v24  ;;  %v1337_v41 = vstv %s3233_s5  ;;  %s3448_s5 = sld [smem:[#allocation9 + $0x40]] }
 0x159   : > { %1087 = vrot.lane.b32.xlu0 %v1083_v27, %s4106_s0  ;;  %958 = vrot.lane.b32.xlu1 %v953_v28, %s4107_s1  ;;  %v1292_v28 = vmul.f32 %v1291_v23, %v3178_v3 }
 0x15d   : > { %1100 = vrot.lane.b32.xlu0 %v1096_v30, %s4108_s2  ;;  %971 = vrot.lane.b32.xlu1 %v966_v31, %s4103_s27  ;;  %v1304_v31 = vstv %s3207_s9  ;;  %s3404_s9 = sld [smem:[#allocation9 + $0x39]] }
 0x15e   : > { %v1305_v34 = vmul.f32 %v1304_v31, %v3178_v3 }
 0x161   : > { %1113 = vrot.lane.b32.xlu0 %v1109_v32, %s4105_s10  ;;  %984 = vrot.lane.b32.xlu1 %v979_v33, %s4104_s21 }
 0x165   : > { %1126 = vrot.lane.b32.xlu0 %v1122_v36, %s4107_s1  ;;  %1004 = vrot.lane.b32.xlu1 %v999_v39, %s4106_s0  ;;  %v1182_v36 = vmul.f32 %v1180_v49, %v3220_v24  ;;  %v1208_v49 = vmul.f32 %v1206_v56, %v3220_v24 }
 0x169   : > { %1139 = vrot.lane.b32.xlu0 %v1135_v42, %s4103_s27  ;;  %1017 = vrot.lane.b32.xlu1 %v1012_v43, %s4108_s2  ;;  %v993_v42 = vmul.f32 %v992_v12, %v2984_v63  ;;  %v3262_v63 = vld [vmem:[#allocation4 + $0x6] sm:$0xff] }
 0x16d   : > { %1152 = vrot.lane.b32.xlu0 %v1148_v45, %s4104_s21  ;;  %1030 = vrot.lane.b32.xlu1 %v1025_v46, %s4105_s10  ;;  %v1318_v45 = vmul.f32 %v1317_v40, %v3178_v3  ;;  %v1195_v46 = vmul.f32 %v1193_v52, %v3220_v24 }
 0x171   : > { %1172 = vrot.lane.b32.xlu0 %v1168_v47, %s4106_s0  ;;  %1043 = vrot.lane.b32.xlu1 %v1038_v48, %s4107_s1  ;;  %v1338_v48 = vmul.f32 %v1337_v41, %v3262_v63 }
 0x175   : > { %1185 = vrot.lane.b32.xlu0 %v1181_v50, %s4108_s2  ;;  %1056 = vrot.lane.b32.xlu1 %v1051_v51, %s4103_s27  ;;  %v1350_v50 = vstv %s3245_s4  ;;  %v907_v51 = vstv %s3252_s26  ;;  %s3437_s26 = sld [smem:[#allocation9 + $0x3b]]  ;;  %s3459_s4 = sld [smem:[#allocation9 + $0x41]] }
 0x176   : > { %v908_v56 = vmul.f32 %v907_v51, %v2916_v38  ;;  %v1234_v38 = vmul.f32 %v1232_v1, %v3220_v24 }
 0x179   : > { %1198 = vrot.lane.b32.xlu0 %v1194_v54, %s4105_s10  ;;  %1069 = vrot.lane.b32.xlu1 %v1064_v55, %s4104_s21  ;;  %v1351_v54 = vmul.f32 %v1350_v50, %v3262_v63  ;;  %v1221_v55 = vmul.f32 %v1219_v60, %v3220_v24 }
 0x17d   : > { %1211 = vrot.lane.b32.xlu0 %v1207_v58, %s4107_s1  ;;  %1089 = vrot.lane.b32.xlu1 %v1084_v59, %s4106_s0  ;;  %v1363_v58 = vstv %s3265_s6  ;;  %s3466_s6 = sld [smem:[#allocation9 + $0x23]] }
 0x17e   : > { %v1364_v60 = vmul.f32 %v1363_v58, %v3262_v63 }
 0x181   : > { %1224 = vrot.lane.b32.xlu0 %v1220_v61, %s4103_s27  ;;  %1102 = vrot.lane.b32.xlu1 %v1097_v62, %s4108_s2 }
 0x183   : > { %v833_v21 = vpop.permute.xlu0 %832 }
 0x184   : > { %v838_v18 = vadd.f32 %v833_v21, %v823_v14  ;;  %v1077_v14 = vstv %s3295_s14  ;;  %s3482_s14 = sld [smem:[#allocation9 + $0x42]] }
 0x185   : > { %1237 = vrot.lane.b32.xlu0 %v1233_v0, %s4104_s21  ;;  %1115 = vrot.lane.b32.xlu1 %v1110_v2, %s4105_s10  ;;  %v1376_v0 = vstv %s3276_s20  ;;  %v3304_v2 = vld [vmem:[#allocation4 + $0xd] sm:$0xff]  ;;  %s3493_s20 = sld [smem:[#allocation9 + $0x3c]] }
 0x186   : > { %v1377_v1 = vmul.f32 %v1376_v0, %v3262_v63 }
 0x187   : > { %v846_v5 = vpop.permute.xlu0 %845 }
 0x188   : > { %v851_v22 = vadd.f32 %v846_v5, %v838_v18 }
 0x189   : > { %1257 = vrot.lane.b32.xlu0 %v1253_v6, %s4106_s0  ;;  %1128 = vrot.lane.b32.xlu1 %v1123_v7, %s4107_s1 }
 0x18b   : > { %v859_v9 = vpop.permute.xlu0 %858 }
 0x18c   : > { %v864_v26 = vadd.f32 %v859_v9, %v851_v22  ;;  %v1254_v9 = vmul.f32 %v1252_v4, %v3304_v2  ;;  %v1267_v4 = vmul.f32 %v1265_v16, %v3304_v2  ;;  %v824_v22 = vmul.f32 %v822_v8, %v2949_v53 }
 0x18d   : > { %1270 = vrot.lane.b32.xlu0 %v1266_v10, %s4108_s2  ;;  %1141 = vrot.lane.b32.xlu1 %v1136_v11, %s4103_s27  ;;  %v1389_v11 = vstv %s3291_s24  ;;  %v1280_v8 = vmul.f32 %v1278_v15, %v3304_v2  ;;  %s3505_s24 = sld [smem:[#allocation9 + $0x43]] }
 0x18f   : > { %v872_v19 = vpop.permute.xlu0 %871 }
 0x190   : > { %v877_v30 = vadd.f32 %v872_v19, %v864_v26 }
 0x191   : > { %1283 = vrot.lane.b32.xlu0 %v1279_v20, %s4105_s10  ;;  %1154 = vrot.lane.b32.xlu1 %v1149_v17, %s4104_s21  ;;  %v1390_v17 = vmul.f32 %v1389_v11, %v3262_v63 }
 0x193   : > { %v885_v27 = vpop.permute.xlu0 %884 }
 0x194   : > { %v890_v32 = vadd.f32 %v885_v27, %v877_v30  ;;  %v1402_v27 = vstv %s3306_s25  ;;  %s3522_s25 = sld [smem:[#allocation9 + $0x3d]] }
 0x195   : > { %1296 = vrot.lane.b32.xlu0 %v1292_v28, %s4107_s1  ;;  %1174 = vrot.lane.b32.xlu1 %v1169_v29, %s4106_s0  ;;  %v1078_v28 = vmul.f32 %v1077_v14, %v3050_v25  ;;  %v1403_v53 = vmul.f32 %v1402_v27, %v3262_v63  ;;  %v3347_v25 = vld [vmem:[#allocation4 + $0x18] sm:$0xff] }
 0x197   : > { %v898_v33 = vpop.permute.xlu0 %897 }
 0x198   : > { %v903_v39 = vadd.f32 %v898_v33, %v890_v32 }
 0x199   : > { %1309 = vrot.lane.b32.xlu0 %v1305_v34, %s4103_s27  ;;  %1187 = vrot.lane.b32.xlu1 %v1182_v36, %s4108_s2  ;;  %v1422_v34 = vstv %s3317_s19  ;;  %s3533_s19 = sld [smem:[#allocation9 + $0x44]] }
 0x19a   : > { %v3254_v43 = vadd.f32 %v993_v42, %v903_v39  ;;  %v1423_v15 = vmul.f32 %v1422_v34, %v3347_v25 }
 0x19b   : > { %v918_v44 = vpop.permute.xlu0 %917 }
 0x19c   : > { %v923_v59 = vadd.f32 %v918_v44, %v908_v56  ;;  %v1293_v44 = vmul.f32 %v1291_v23, %v3304_v2  ;;  %v1306_v23 = vmul.f32 %v1304_v31, %v3304_v2  ;;  %v994_v56 = vmul.f32 %v992_v12, %v3082_v35 }
 0x19d   : > { %1322 = vrot.lane.b32.xlu0 %v1318_v45, %s4104_s21  ;;  %1200 = vrot.lane.b32.xlu1 %v1195_v46, %s4105_s10  ;;  %v1435_v46 = vstv %s3332_s28  ;;  %v1319_v35 = vmul.f32 %v1317_v40, %v3304_v2  ;;  %s3544_s28 = sld [smem:[#allocation9 + $0x3e]] }
 0x19f   : > { %v931_v47 = vpop.permute.xlu0 %930 }
 0x1a0   : > { %v936_v21 = vadd.f32 %v931_v47, %v923_v59 }
 0x1a1   : > { %1342 = vrot.lane.b32.xlu0 %v1338_v48, %s4106_s0  ;;  %1213 = vrot.lane.b32.xlu1 %v1208_v49, %s4107_s1 }
 0x1a3   : > { %v944_v52 = vpop.permute.xlu0 %943 }
 0x1a4   : > { %v949_v5 = vadd.f32 %v944_v52, %v936_v21  ;;  %v1436_v52 = vmul.f32 %v1435_v46, %v3347_v25  ;;  %v3391_v21 = vld [vmem:[#allocation4 + $0xe] sm:$0xff] }
 0x1a5   : > { %1355 = vrot.lane.b32.xlu0 %v1351_v54, %s4108_s2  ;;  %1226 = vrot.lane.b32.xlu1 %v1221_v55, %s4103_s27  ;;  %v1448_v55 = vstv %s3350_s29  ;;  %s3551_s29 = sld [smem:[#allocation9 + $0x2a]] }
 0x1a7   : > { %v835_v61 = vpop.permute.xlu1 %834  ;;  %v957_v62 = vpop.permute.xlu0 %956 }
 0x1a8   : > { %v962_v10 = vadd.f32 %v957_v62, %v949_v5  ;;  %v839_v29 = vadd.f32 %v835_v61, %v824_v22 }
 0x1a9   : > { %1368 = vrot.lane.b32.xlu0 %v1364_v60, %s4105_s10  ;;  %1239 = vrot.lane.b32.xlu1 %v1234_v38, %s4104_s21  ;;  %v1449_v60 = vmul.f32 %v1448_v55, %v3347_v25  ;;  %v1461_v38 = vstv %s3361_s8  ;;  %s3565_s8 = sld [smem:[#allocation9 + $0x45]] }
 0x1aa   : > { %v1462_v40 = vmul.f32 %v1461_v38, %v3347_v25 }
 0x1ab   : > { %v848_v6 = vpop.permute.xlu1 %847  ;;  %v970_v7 = vpop.permute.xlu0 %969 }
 0x1ac   : > { %v975_v18 = vadd.f32 %v970_v7, %v962_v10  ;;  %v852_v33 = vadd.f32 %v848_v6, %v839_v29  ;;  %v1339_v7 = vmul.f32 %v1337_v41, %v3391_v21  ;;  %v1162_v10 = vstv %s3379_s22  ;;  %s3588_s22 = sld [smem:[#allocation9 + $0x4e]] }
 0x1ad   : > { %1381 = vrot.lane.b32.xlu0 %v1377_v1, %s4107_s1  ;;  %1259 = vrot.lane.b32.xlu1 %v1254_v9, %s4106_s0  ;;  %v1474_v9 = vstv %s3372_s18  ;;  %v1352_v41 = vmul.f32 %v1350_v50, %v3391_v21  ;;  %s3576_s18 = sld [smem:[#allocation9 + $0x47]] }
 0x1af   : > { %v861_v19 = vpop.permute.xlu1 %860  ;;  %v983_v20 = vpop.permute.xlu0 %982 }
 0x1b0   : > { %v988_v26 = vadd.f32 %v983_v20, %v975_v18  ;;  %v865_v36 = vadd.f32 %v861_v19, %v852_v33 }
 0x1b1   : > { %1394 = vrot.lane.b32.xlu0 %v1390_v17, %s4103_s27  ;;  %1272 = vrot.lane.b32.xlu1 %v1267_v4, %s4108_s2  ;;  %v1475_v17 = vmul.f32 %v1474_v9, %v3347_v25  ;;  %v909_v4 = vmul.f32 %v907_v51, %v3020_v13  ;;  %v1365_v51 = vmul.f32 %v1363_v58, %v3391_v21 }
 0x1b2   : > { %v3339_v30 = vadd.f32 %v1078_v28, %v988_v26  ;;  %v1487_v26 = vstv %s3393_s16  ;;  %v1163_v28 = vmul.f32 %v1162_v10, %v3114_v37  ;;  %v3434_v37 = vld [vmem:[#allocation4 + $0x19] sm:$0xff]  ;;  %v1378_v58 = vmul.f32 %v1376_v0, %v3391_v21  ;;  %s3609_s16 = sld [smem:[#allocation9 + $0x48]] }
 0x1b3   : > { %v874_v16 = vpop.permute.xlu1 %873  ;;  %v1003_v32 = vpop.permute.xlu0 %1002  ;;  %v1488_v13 = vmul.f32 %v1487_v26, %v3347_v25 }
 0x1b4   : > { %v878_v45 = vadd.f32 %v874_v16, %v865_v36  ;;  %v1008_v59 = vadd.f32 %v1003_v32, %v3254_v43 }
 0x1b5   : > { %1407 = vrot.lane.b32.xlu0 %v1403_v53, %s4104_s21  ;;  %1285 = vrot.lane.b32.xlu1 %v1280_v8, %s4105_s10  ;;  %v1507_v8 = vstv %s3404_s9  ;;  %s3622_s9 = sld [smem:[#allocation9 + $0x4f]] }
 0x1b7   : > { %v887_v39 = vpop.permute.xlu1 %886  ;;  %v1016_v42 = vpop.permute.xlu0 %1015 }
 0x1b8   : > { %v891_v47 = vadd.f32 %v887_v39, %v878_v45  ;;  %v1021_v12 = vadd.f32 %v1016_v42, %v1008_v59  ;;  %v1508_v42 = vmul.f32 %v1507_v8, %v3434_v37 }
 0x1b9   : > { %1427 = vrot.lane.b32.xlu0 %v1423_v15, %s4106_s0  ;;  %1298 = vrot.lane.b32.xlu1 %v1293_v44, %s4107_s1  ;;  %v1520_v44 = vstv %s3419_s30  ;;  %s3633_s30 = sld [smem:[#allocation9 + $0x49]] }
 0x1ba   : > { %v1521_v0 = vmul.f32 %v1520_v44, %v3434_v37 }
 0x1bb   : > { %v900_v48 = vpop.permute.xlu1 %899  ;;  %v1029_v49 = vpop.permute.xlu0 %1028 }
 0x1bc   : > { %v904_v54 = vadd.f32 %v900_v48, %v891_v47  ;;  %v1034_v43 = vadd.f32 %v1029_v49, %v1021_v12  ;;  %v1391_v49 = vmul.f32 %v1389_v11, %v3391_v21 }
 0x1bd   : > { %1440 = vrot.lane.b32.xlu0 %v1436_v52, %s4108_s2  ;;  %1311 = vrot.lane.b32.xlu1 %v1306_v23, %s4103_s27  ;;  %v1533_v23 = vstv %s3437_s26  ;;  %s3650_s26 = sld [smem:[#allocation9 + $0x50]] }
 0x1be   : > { %v3382_v61 = vadd.f32 %v994_v56, %v904_v54  ;;  %v1079_v54 = vmul.f32 %v1077_v14, %v3146_v57  ;;  %v1534_v57 = vmul.f32 %v1533_v23, %v3434_v37 }
 0x1bf   : > { %v920_v31 = vpop.permute.xlu1 %919  ;;  %v1042_v62 = vpop.permute.xlu0 %1041 }
 0x1c0   : > { %v1047_v1 = vadd.f32 %v1042_v62, %v1034_v43  ;;  %v924_v29 = vadd.f32 %v920_v31, %v909_v4  ;;  %v1404_v62 = vmul.f32 %v1402_v27, %v3391_v21  ;;  %v1618_v4 = vstv %s3482_s14  ;;  %s3698_s14 = sld [smem:[#allocation9 + $0x52]] }
 0x1c1   : > { %1453 = vrot.lane.b32.xlu0 %v1449_v60, %s4105_s10  ;;  %1324 = vrot.lane.b32.xlu1 %v1319_v35, %s4104_s21  ;;  %v3477_v60 = vld [vmem:[#allocation4 + $0x20] sm:$0xff] }
 0x1c2   : > { %v3479_v35 = vld [vmem:[#allocation4 + $0x1a] sm:$0xff] }
 0x1c3   : > { %v933_v5 = vpop.permute.xlu1 %932  ;;  %v1055_v6 = vpop.permute.xlu0 %1054 }
 0x1c4   : > { %v1060_v18 = vadd.f32 %v1055_v6, %v1047_v1  ;;  %v937_v53 = vadd.f32 %v933_v5, %v924_v29  ;;  %v1424_v5 = vmul.f32 %v1422_v34, %v3477_v60  ;;  %v1247_v1 = vstv %s3466_s6  ;;  %s3687_s6 = sld [smem:[#allocation9 + $0x4b]] }
 0x1c5   : > { %1466 = vrot.lane.b32.xlu0 %v1462_v40, %s4107_s1  ;;  %1344 = vrot.lane.b32.xlu1 %v1339_v7, %s4106_s0  ;;  %v1605_v7 = vstv %s3459_s4  ;;  %v1437_v34 = vmul.f32 %v1435_v46, %v3477_v60  ;;  %s3674_s4 = sld [smem:[#allocation9 + $0x51]] }
 0x1c7   : > { %v946_v19 = vpop.permute.xlu1 %945  ;;  %v1068_v20 = vpop.permute.xlu0 %1067 }
 0x1c8   : > { %v1073_v22 = vadd.f32 %v1068_v20, %v1060_v18  ;;  %v950_v33 = vadd.f32 %v946_v19, %v937_v53 }
 0x1c9   : > { %1479 = vrot.lane.b32.xlu0 %v1475_v17, %s4103_s27  ;;  %1357 = vrot.lane.b32.xlu1 %v1352_v41, %s4108_s2  ;;  %v1606_v17 = vmul.f32 %v1605_v7, %v3479_v35 }
 0x1ca   : > { %v3426_v16 = vadd.f32 %v1163_v28, %v1073_v22  ;;  %v1248_v22 = vmul.f32 %v1247_v1, %v3178_v3 }
 0x1cb   : > { %v959_v50 = vpop.permute.xlu1 %958  ;;  %v1088_v32 = vpop.permute.xlu0 %1087 }
 0x1cc   : > { %v963_v15 = vadd.f32 %v959_v50, %v950_v33  ;;  %v1093_v56 = vadd.f32 %v1088_v32, %v3339_v30  ;;  %v1592_v30 = vstv %s3448_s5  ;;  %v1450_v32 = vmul.f32 %v1448_v55, %v3477_v60  ;;  %s3661_s5 = sld [smem:[#allocation9 + $0x4a]] }
 0x1cd   : > { %1492 = vrot.lane.b32.xlu0 %v1488_v13, %s4104_s21  ;;  %1370 = vrot.lane.b32.xlu1 %v1365_v51, %s4105_s10  ;;  %v1593_v6 = vmul.f32 %v1592_v30, %v3479_v35  ;;  %v1619_v13 = vmul.f32 %v1618_v4, %v3479_v35  ;;  %v1546_v51 = vstv %s3493_s20  ;;  %v1463_v55 = vmul.f32 %v1461_v38, %v3477_v60  ;;  %s3709_s20 = sld [smem:[#allocation9 + $0x4c]] }
 0x1cf   : > { %v972_v36 = vpop.permute.xlu1 %971  ;;  %v1101_v39 = vpop.permute.xlu0 %1100 }
 0x1d0   : > { %v976_v45 = vadd.f32 %v972_v36, %v963_v15  ;;  %v1106_v14 = vadd.f32 %v1101_v39, %v1093_v56  ;;  %v1547_v36 = vmul.f32 %v1546_v51, %v3434_v37 }
 0x1d1   : > { %1383 = vrot.lane.b32.xlu1 %v1378_v58, %s4107_s1  ;;  %1512 = vrot.lane.b32.xlu0 %v1508_v42, %s4106_s0  ;;  %v1631_v58 = vstv %s3505_s24  ;;  %s3724_s24 = sld [smem:[#allocation9 + $0x31]] }
 0x1d2   : > { %v1632_v38 = vmul.f32 %v1631_v58, %v3479_v35 }
 0x1d3   : > { %v985_v47 = vpop.permute.xlu1 %984  ;;  %v1114_v48 = vpop.permute.xlu0 %1113 }
 0x1d4   : > { %v989_v52 = vadd.f32 %v985_v47, %v976_v45  ;;  %v1119_v12 = vadd.f32 %v1114_v48, %v1106_v14  ;;  %v1476_v47 = vmul.f32 %v1474_v9, %v3477_v60 }
 0x1d5   : > { %1396 = vrot.lane.b32.xlu1 %v1391_v49, %s4103_s27  ;;  %1525 = vrot.lane.b32.xlu0 %v1521_v0, %s4108_s2  ;;  %v1559_v49 = vstv %s3522_s25  ;;  %v1164_v0 = vmul.f32 %v1162_v10, %v3220_v24  ;;  %s3729_s25 = sld [smem:[#allocation9 + $0x53]] }
 0x1d6   : > { %v3469_v11 = vadd.f32 %v1079_v54, %v989_v52  ;;  %v1560_v24 = vmul.f32 %v1559_v49, %v3434_v37 }
 0x1d7   : > { %v1005_v59 = vpop.permute.xlu1 %1004  ;;  %v1127_v31 = vpop.permute.xlu0 %1126 }
 0x1d8   : > { %v1132_v40 = vadd.f32 %v1127_v31, %v1119_v12  ;;  %v1009_v28 = vadd.f32 %v1005_v59, %v3382_v61  ;;  %v1489_v59 = vmul.f32 %v1487_v26, %v3477_v60  ;;  %v3562_v31 = vld [vmem:[#allocation4 + $0x21] sm:$0xff] }
 0x1d9   : > { %1409 = vrot.lane.b32.xlu1 %v1404_v62, %s4104_s21  ;;  %1538 = vrot.lane.b32.xlu0 %v1534_v57, %s4105_s10  ;;  %v1644_v62 = vstv %s3533_s19  ;;  %v1509_v14 = vmul.f32 %v1507_v8, %v3562_v31  ;;  %v1522_v8 = vmul.f32 %v1520_v44, %v3562_v31  ;;  %s3742_s19 = sld [smem:[#allocation9 + $0x55]] }
 0x1da   : > { %v1645_v12 = vmul.f32 %v1644_v62, %v3479_v35 }
 0x1db   : > { %v1018_v27 = vpop.permute.xlu1 %1017  ;;  %v1140_v43 = vpop.permute.xlu0 %1139 }
 0x1dc   : > { %v1145_v18 = vadd.f32 %v1140_v43, %v1132_v40  ;;  %v1022_v3 = vadd.f32 %v1018_v27, %v1009_v28  ;;  %v1572_v43 = vstv %s3544_s28  ;;  %s3754_s28 = sld [smem:[#allocation9 + $0x5c]] }
 0x1dd   : > { %1429 = vrot.lane.b32.xlu1 %v1424_v5, %s4106_s0  ;;  %1597 = vrot.lane.b32.xlu0 %v1593_v6, %s4106_s0  ;;  %v1332_v5 = vstv %s3551_s29  ;;  %s3774_s29 = sld [smem:[#allocation9 + $0x56]] }
 0x1df   : > { %v1031_v19 = vpop.permute.xlu1 %1030  ;;  %v1153_v20 = vpop.permute.xlu0 %1152 }
 0x1e0   : > { %v1158_v41 = vadd.f32 %v1153_v20, %v1145_v18  ;;  %v1035_v61 = vadd.f32 %v1031_v19, %v1022_v3  ;;  %v1573_v19 = vmul.f32 %v1572_v43, %v3434_v37  ;;  %v1677_v3 = vstv %s3576_s18  ;;  %s3800_s18 = sld [smem:[#allocation9 + $0x57]] }
 0x1e1   : > { %1442 = vrot.lane.b32.xlu1 %v1437_v34, %s4108_s2  ;;  %1610 = vrot.lane.b32.xlu0 %v1606_v17, %s4108_s2  ;;  %v1657_v34 = vstv %s3565_s8  ;;  %v1333_v17 = vmul.f32 %v1332_v5, %v3262_v63  ;;  %s3787_s8 = sld [smem:[#allocation9 + $0x5d]] }
 0x1e2   : > { %v3513_v29 = vadd.f32 %v1248_v22, %v1158_v41 }
 0x1e3   : > { %v1044_v46 = vpop.permute.xlu1 %1043  ;;  %v1173_v50 = vpop.permute.xlu0 %1172 }
 0x1e4   : > { %v1048_v39 = vadd.f32 %v1044_v46, %v1035_v61  ;;  %v1178_v9 = vadd.f32 %v1173_v50, %v3426_v16  ;;  %v1535_v46 = vmul.f32 %v1533_v23, %v3562_v31  ;;  %v1658_v50 = vmul.f32 %v1657_v34, %v3479_v35 }
 0x1e5   : > { %1455 = vrot.lane.b32.xlu1 %v1450_v32, %s4105_s10  ;;  %1623 = vrot.lane.b32.xlu0 %v1619_v13, %s4105_s10  ;;  %v3604_v32 = vld [vmem:[#allocation4 + $0x22] sm:$0xff] }
 0x1e6   : > { %v3606_v13 = vld [vmem:[#allocation4 + $0x1b] sm:$0xff] }
 0x1e7   : > { %v1057_v53 = vpop.permute.xlu1 %1056  ;;  %v1186_v33 = vpop.permute.xlu0 %1185 }
 0x1e8   : > { %v1061_v42 = vadd.f32 %v1057_v53, %v1048_v39  ;;  %v1191_v10 = vadd.f32 %v1186_v33, %v1178_v9  ;;  %v1594_v53 = vmul.f32 %v1592_v30, %v3604_v32  ;;  %v1678_v33 = vmul.f32 %v1677_v3, %v3606_v13 }
 0x1e9   : > { %1468 = vrot.lane.b32.xlu1 %v1463_v55, %s4107_s1  ;;  %1551 = vrot.lane.b32.xlu0 %v1547_v36, %s4107_s1  ;;  %v3619_v36 = vld [vmem:[#allocation4 + $0x1c] sm:$0xff]  ;;  %v1762_v39 = vstv %s3588_s22  ;;  %v1607_v30 = vmul.f32 %v1605_v7, %v3604_v32  ;;  %s3804_s22 = sld [smem:[#allocation9 + $0x3f]] }
 0x1eb   : > { %v1070_v15 = vpop.permute.xlu1 %1069  ;;  %v1199_v45 = vpop.permute.xlu0 %1198 }
 0x1ec   : > { %v1074_v48 = vadd.f32 %v1070_v15, %v1061_v42  ;;  %v1204_v16 = vadd.f32 %v1199_v45, %v1191_v10 }
 0x1ed   : > { %1481 = vrot.lane.b32.xlu1 %v1476_v47, %s4103_s27  ;;  %1636 = vrot.lane.b32.xlu0 %v1632_v38, %s4107_s1  ;;  %v1763_v47 = vmul.f32 %v1762_v39, %v3619_v36 }
 0x1ee   : > { %v3554_v52 = vadd.f32 %v1164_v0, %v1074_v48  ;;  %v1690_v48 = vstv %s3609_s16  ;;  %v1249_v0 = vmul.f32 %v1247_v1, %v3304_v2  ;;  %v1775_v1 = vstv %s3622_s9  ;;  %s3812_s16 = sld [smem:[#allocation9 + $0x38]]  ;;  %s3816_s9 = sld [smem:[#allocation9 + $0x5e]] }
 0x1ef   : > { %v1090_v54 = vpop.permute.xlu1 %1089  ;;  %v1212_v56 = vpop.permute.xlu0 %1211 }
 0x1f0   : > { %v1217_v27 = vadd.f32 %v1212_v56, %v1204_v16  ;;  %v1094_v41 = vadd.f32 %v1090_v54, %v3469_v11 }
 0x1f1   : > { %1494 = vrot.lane.b32.xlu1 %v1489_v59, %s4104_s21  ;;  %1564 = vrot.lane.b32.xlu0 %v1560_v24, %s4103_s27  ;;  %v1620_v59 = vmul.f32 %v1618_v4, %v3604_v32  ;;  %v1691_v24 = vmul.f32 %v1690_v48, %v3606_v13  ;;  %v1548_v4 = vmul.f32 %v1546_v51, %v3562_v31 }
 0x1f2   : > { %v1633_v51 = vmul.f32 %v1631_v58, %v3604_v32  ;;  %v1561_v58 = vmul.f32 %v1559_v49, %v3562_v31  ;;  %v1646_v49 = vmul.f32 %v1644_v62, %v3604_v32  ;;  %v1574_v62 = vmul.f32 %v1572_v43, %v3562_v31 }
 0x1f3   : > { %v1103_v57 = vpop.permute.xlu1 %1102  ;;  %v1225_v26 = vpop.permute.xlu0 %1224 }
 0x1f4   : > { %v1230_v6 = vadd.f32 %v1225_v26, %v1217_v27  ;;  %v1107_v63 = vadd.f32 %v1103_v57, %v1094_v41  ;;  %v1776_v57 = vmul.f32 %v1775_v1, %v3619_v36 }
 0x1f5   : > { %1514 = vrot.lane.b32.xlu1 %v1509_v14, %s4106_s0  ;;  %1649 = vrot.lane.b32.xlu0 %v1645_v12, %s4103_s27  ;;  %v1703_v14 = vstv %s3633_s30  ;;  %s3827_s30 = sld [smem:[#allocation9 + $0x58]] }
 0x1f7   : > { %v1116_v40 = vpop.permute.xlu1 %1115  ;;  %v1238_v18 = vpop.permute.xlu0 %1237 }
 0x1f8   : > { %v1243_v20 = vadd.f32 %v1238_v18, %v1230_v6  ;;  %v1120_v11 = vadd.f32 %v1116_v40, %v1107_v63  ;;  %v1704_v40 = vmul.f32 %v1703_v14, %v3606_v13 }
 0x1f9   : > { %1527 = vrot.lane.b32.xlu1 %v1522_v8, %s4108_s2  ;;  %1577 = vrot.lane.b32.xlu0 %v1573_v19, %s4104_s21  ;;  %v1788_v8 = vstv %s3650_s26  ;;  %s3840_s26 = sld [smem:[#allocation9 + $0x5f]] }
 0x1fa   : > { %v3596_v22 = vadd.f32 %v1333_v17, %v1243_v20  ;;  %v1789_v41 = vmul.f32 %v1788_v8, %v3619_v36 }
 0x1fb   : > { %v1129_v44 = vpop.permute.xlu1 %1128  ;;  %v1258_v28 = vpop.permute.xlu0 %1257 }
 0x1fc   : > { %v1133_v55 = vadd.f32 %v1129_v44, %v1120_v11  ;;  %v1263_v9 = vadd.f32 %v1258_v28, %v3513_v29 }
 0x1fd   : > { %1540 = vrot.lane.b32.xlu1 %v1535_v46, %s4105_s10  ;;  %1662 = vrot.lane.b32.xlu0 %v1658_v50, %s4104_s21  ;;  %v1716_v46 = vstv %s3661_s5  ;;  %s3857_s5 = sld [smem:[#allocation9 + $0x59]] }
 0x1fe   : > { %v1717_v11 = vmul.f32 %v1716_v46, %v3606_v13 }
 0x1ff   : > { %v1142_v23 = vpop.permute.xlu1 %1141  ;;  %v1271_v61 = vpop.permute.xlu0 %1270 }
 0x200   : > { %v1146_v42 = vadd.f32 %v1142_v23, %v1133_v55  ;;  %v1276_v2 = vadd.f32 %v1271_v61, %v1263_v9  ;;  %v1801_v61 = vstv %s3674_s4  ;;  %v1659_v9 = vmul.f32 %v1657_v34, %v3604_v32  ;;  %s3868_s4 = sld [smem:[#allocation9 + $0x60]] }
 0x201   : > { %1599 = vrot.lane.b32.xlu1 %v1594_v53, %s4106_s0  ;;  %1682 = vrot.lane.b32.xlu0 %v1678_v33, %s4106_s0 }
 0x203   : > { %v1155_v15 = vpop.permute.xlu1 %1154  ;;  %v1284_v45 = vpop.permute.xlu0 %1283 }
 0x204   : > { %v1159_v38 = vadd.f32 %v1155_v15, %v1146_v42  ;;  %v1289_v29 = vadd.f32 %v1284_v45, %v1276_v2  ;;  %v1802_v42 = vmul.f32 %v1801_v61, %v3619_v36 }
 0x205   : > { %1612 = vrot.lane.b32.xlu1 %v1607_v30, %s4108_s2  ;;  %1767 = vrot.lane.b32.xlu0 %v1763_v47, %s4106_s0  ;;  %v1729_v30 = vstv %s3687_s6  ;;  %v1334_v47 = vmul.f32 %v1332_v5, %v3391_v21  ;;  %v3726_v5 = vld [vmem:[#allocation4 + $0x23] sm:$0xff]  ;;  %s3879_s6 = sld [smem:[#allocation9 + $0x5a]] }
 0x206   : > { %v3641_v54 = vadd.f32 %v1249_v0, %v1159_v38 }
 0x207   : > { %v1175_v7 = vpop.permute.xlu1 %1174  ;;  %v1297_v56 = vpop.permute.xlu0 %1296 }
 0x208   : > { %v1302_v26 = vadd.f32 %v1297_v56, %v1289_v29  ;;  %v1179_v19 = vadd.f32 %v1175_v7, %v3554_v52  ;;  %v1730_v7 = vmul.f32 %v1729_v30, %v3606_v13  ;;  %v1814_v56 = vstv %s3698_s14  ;;  %s3898_s14 = sld [smem:[#allocation9 + $0x61]] }
 0x209   : > { %1625 = vrot.lane.b32.xlu1 %v1620_v59, %s4105_s10  ;;  %1695 = vrot.lane.b32.xlu0 %v1691_v24, %s4108_s2  ;;  %v1679_v24 = vmul.f32 %v1677_v3, %v3726_v5  ;;  %v1815_v2 = vmul.f32 %v1814_v56, %v3619_v36 }
 0x20b   : > { %v1188_v10 = vpop.permute.xlu1 %1187  ;;  %v1310_v16 = vpop.permute.xlu0 %1309 }
 0x20c   : > { %v1315_v12 = vadd.f32 %v1310_v16, %v1302_v26  ;;  %v1192_v44 = vadd.f32 %v1188_v10, %v1179_v19  ;;  %v3739_v10 = vld [vmem:[#allocation4 + $0x24] sm:$0xff]  ;;  %v1742_v16 = vstv %s3709_s20  ;;  %s3943_s20 = sld [smem:[#allocation9 + $0x4d]] }
 0x20d   : > { %1553 = vrot.lane.b32.xlu1 %v1548_v4, %s4107_s1  ;;  %1780 = vrot.lane.b32.xlu0 %v1776_v57, %s4108_s2  ;;  %v1764_v3 = vmul.f32 %v1762_v39, %v3739_v10  ;;  %v1743_v26 = vmul.f32 %v1742_v16, %v3606_v13 }
 0x20f   : > { %v1201_v27 = vpop.permute.xlu1 %1200  ;;  %v1323_v6 = vpop.permute.xlu0 %1322 }
 0x210   : > { %v3671_v18 = vadd.f32 %v1323_v6, %v1315_v12  ;;  %v1205_v52 = vadd.f32 %v1201_v27, %v1192_v44  ;;  %v1417_v12 = vstv %s3724_s24  ;;  %v1827_v6 = vstv %s3729_s25  ;;  %s2276_s25 = sshll.u32 %s2529_s15, 8  ;;  %s2558_s15 = smov [#allocation12]  }
 0x211   : > { %1638 = vrot.lane.b32.xlu1 %v1633_v51, %s4107_s1  ;;  %1708 = vrot.lane.b32.xlu0 %v1704_v40, %s4105_s10  ;;  %v1418_v39 = vmul.f32 %v1417_v12, %v3347_v25 }
 0x213   : > { %v1214_v20 = vpop.permute.xlu1 %1213  ;;  %v1343_v17 = vpop.permute.xlu0 %1342 }
 0x214   : > { %v1348_v28 = vadd.f32 %v1343_v17, %v3596_v22  ;;  %v1218_v22 = vadd.f32 %v1214_v20, %v1205_v52  ;;  %v1692_v17 = vmul.f32 %v1690_v48, %v3726_v5  ;;  %v1777_v52 = vmul.f32 %v1775_v1, %v3739_v10 }
 0x215   : > { %1566 = vrot.lane.b32.xlu1 %v1561_v58, %s4103_s27  ;;  %1793 = vrot.lane.b32.xlu0 %v1789_v41, %s4105_s10  ;;  %v1828_v58 = vmul.f32 %v1827_v6, %v3619_v36 }
 0x217   : > { %v1227_v50 = vpop.permute.xlu1 %1226  ;;  %v1356_v63 = vpop.permute.xlu0 %1355 }
 0x218   : > { %v1361_v23 = vadd.f32 %v1356_v63, %v1348_v28  ;;  %v1231_v53 = vadd.f32 %v1227_v50, %v1218_v22  ;;  %v1932_v22 = vstv %s3754_s28 }
 0x219   : > { %1651 = vrot.lane.b32.xlu1 %v1646_v49, %s4103_s27  ;;  %1721 = vrot.lane.b32.xlu0 %v1717_v11, %s4107_s1  ;;  %v3784_v11 = vld [vmem:[#allocation4 + $0x1e] sm:$0xff] }
 0x21b   : > { %v1240_v33 = vpop.permute.xlu1 %1239  ;;  %v1369_v55 = vpop.permute.xlu0 %1368 }
 0x21c   : > { %v1244_v15 = vadd.f32 %v1240_v33, %v1231_v53  ;;  %v1374_v45 = vadd.f32 %v1369_v55, %v1361_v23  ;;  %v1705_v33 = vmul.f32 %v1703_v14, %v3726_v5  ;;  %v1933_v55 = vmul.f32 %v1932_v22, %v3784_v11 }
 0x21d   : > { %1579 = vrot.lane.b32.xlu1 %v1574_v62, %s4104_s21  ;;  %1806 = vrot.lane.b32.xlu0 %v1802_v42, %s4107_s1 }
 0x21e   : > { %v3716_v38 = vadd.f32 %v1334_v47, %v1244_v15  ;;  %v1860_v15 = vstv %s3774_s29  ;;  %v1790_v47 = vmul.f32 %v1788_v8, %v3739_v10 }
 0x21f   : > { %v1260_v43 = vpop.permute.xlu1 %1259  ;;  %v1382_v0 = vpop.permute.xlu0 %1381 }
 0x220   : > { %v1387_v21 = vadd.f32 %v1382_v0, %v1374_v45  ;;  %v1264_v51 = vadd.f32 %v1260_v43, %v3641_v54  ;;  %v3771_v54 = vld [vmem:[#allocation4 + $0x1d] sm:$0xff] }
 0x221   : > { %1664 = vrot.lane.b32.xlu1 %v1659_v9, %s4104_s21  ;;  %1734 = vrot.lane.b32.xlu0 %v1730_v7, %s4103_s27  ;;  %v1861_v43 = vmul.f32 %v1860_v15, %v3771_v54  ;;  %v1945_v7 = vstv %s3787_s8  ;;  %s4006_s8 = scalar_lea.hbm %s4061_s3, %s2276_s25 }
 0x223   : > { %v1273_v59 = vpop.permute.xlu1 %1272  ;;  %v1395_v34 = vpop.permute.xlu0 %1394 }
 0x224   : > { %v1400_v29 = vadd.f32 %v1395_v34, %v1387_v21  ;;  %v1277_v41 = vadd.f32 %v1273_v59, %v1264_v51  ;;  %v1718_v59 = vmul.f32 %v1716_v46, %v3726_v5  ;;  %v1803_v46 = vmul.f32 %v1801_v61, %v3739_v10 }
 0x225   : > { %1684 = vrot.lane.b32.xlu1 %v1679_v24, %s4106_s0  ;;  %1819 = vrot.lane.b32.xlu0 %v1815_v2, %s4103_s27  ;;  %v1873_v2 = vstv %s3800_s18  ;;  %s2037_s18 = scalar_lea.sflag [#allocation7], %s2722_s7 }
 0x227   : > { %v1286_v4 = vpop.permute.xlu1 %1285  ;;  %v1408_v57 = vpop.permute.xlu0 %1407 }
 0x228   : > { %v1413_v27 = vadd.f32 %v1408_v57, %v1400_v29  ;;  %v1290_v25 = vadd.f32 %v1286_v4, %v1277_v41  ;;  %v1587_v29 = vstv %s3804_s22  ;;  %v1731_v41 = vmul.f32 %v1729_v30, %v3726_v5 }
 0x229   : > { %1769 = vrot.lane.b32.xlu1 %v1764_v3, %s4106_s0  ;;  %1747 = vrot.lane.b32.xlu0 %v1743_v26, %s4104_s21  ;;  %v1874_v3 = vmul.f32 %v1873_v2, %v3771_v54  ;;  %v1502_v26 = vstv %s3812_s16  ;;  %v1816_v30 = vmul.f32 %v1814_v56, %v3739_v10  ;;  %v1744_v56 = vmul.f32 %v1742_v16, %v3726_v5  ;;  %s2451_s16 = sshll.u32 %s2558_s15, 4  ;;  %s2452_s16 = int_to_ptr.vmem [resolvable:$false] %s2451_s16 }
 0x22a   : > { %v3760_v40 = vadd.f32 %v1413_v27, %v3671_v18  ;;  %v1847_v18 = vstv %s3742_s19  ;;  %v1503_v61 = vmul.f32 %v1502_v26, %v3434_v37  ;;  %v1419_v16 = vmul.f32 %v1417_v12, %v3477_v60 }
 0x22b   : > { %v1299_v19 = vpop.permute.xlu1 %1298  ;;  %v1428_v20 = vpop.permute.xlu0 %1427  ;;  %v1848_v50 = vmul.f32 %v1847_v18, %v3771_v54 }
 0x22c   : > { %v1433_v44 = vadd.f32 %v1428_v20, %v1418_v39  ;;  %v1303_v63 = vadd.f32 %v1299_v19, %v1290_v25  ;;  %v1958_v39 = vstv %s3816_s9  ;;  %v1588_v19 = vmul.f32 %v1587_v29, %v3479_v35  ;;  %s2453_s9 = scalar_lea.vmem %s2452_s16, 512 }
 0x22d   : > { %1697 = vrot.lane.b32.xlu1 %v1692_v17, %s4108_s2  ;;  %1832 = vrot.lane.b32.xlu0 %v1828_v58, %s4104_s21 }
 0x22f   : > { %v1312_v28 = vpop.permute.xlu1 %1311  ;;  %v1441_v48 = vpop.permute.xlu0 %1440 }
 0x230   : > { %v1446_v49 = vadd.f32 %v1441_v48, %v1433_v44  ;;  %v1316_v23 = vadd.f32 %v1312_v28, %v1303_v63  ;;  %v1959_v44 = vmul.f32 %v1958_v39, %v3784_v11  ;;  %v1886_v28 = vstv %s3827_s30 }
 0x231   : > { %1782 = vrot.lane.b32.xlu1 %v1777_v52, %s4108_s2  ;;  %1852 = vrot.lane.b32.xlu0 %v1848_v50, %s4106_s0  ;;  %v1887_v52 = vmul.f32 %v1886_v28, %v3771_v54 }
 0x233   : > { %v1325_v53 = vpop.permute.xlu1 %1324  ;;  %v1454_v1 = vpop.permute.xlu0 %1453 }
 0x234   : > { %v3797_v62 = vadd.f32 %v1325_v53, %v1316_v23  ;;  %v1459_v42 = vadd.f32 %v1454_v1, %v1446_v49  ;;  %v1971_v49 = vstv %s3840_s26 }
 0x235   : > { %1710 = vrot.lane.b32.xlu1 %v1705_v33, %s4105_s10  ;;  %1937 = vrot.lane.b32.xlu0 %v1933_v55, %s4106_s0  ;;  %v1972_v1 = vmul.f32 %v1971_v49, %v3784_v11 }
 0x237   : > { %v1345_v45 = vpop.permute.xlu1 %1344  ;;  %v1467_v14 = vpop.permute.xlu0 %1466 }
 0x238   : > { %v1349_v0 = vadd.f32 %v1345_v45, %v3716_v38  ;;  %v1472_v9 = vadd.f32 %v1467_v14, %v1459_v42  ;;  %v1946_v38 = vmul.f32 %v1945_v7, %v3784_v11  ;;  %v1899_v42 = vstv %s3857_s5 }
 0x239   : > { %1795 = vrot.lane.b32.xlu1 %v1790_v47, %s4105_s10  ;;  %1865 = vrot.lane.b32.xlu0 %v1861_v43, %s4108_s2  ;;  %v1829_v43 = vmul.f32 %v1827_v6, %v3739_v10 }
 0x23b   : > { %v1358_v8 = vpop.permute.xlu1 %1357  ;;  %v1480_v21 = vpop.permute.xlu0 %1479 }
 0x23c   : > { %v1362_v34 = vadd.f32 %v1358_v8, %v1349_v0  ;;  %v1485_v24 = vadd.f32 %v1480_v21, %v1472_v9  ;;  %v1900_v0 = vmul.f32 %v1899_v42, %v3771_v54  ;;  %v3895_v21 = vld [vmem:[#allocation4 + $0x25] sm:$0xff] }
 0x23d   : > { %1723 = vrot.lane.b32.xlu1 %v1718_v59, %s4107_s1  ;;  %1950 = vrot.lane.b32.xlu0 %v1946_v38, %s4108_s2  ;;  %v1984_v59 = vstv %s3868_s4  ;;  %v1849_v6 = vmul.f32 %v1847_v18, %v3895_v21 }
 0x23f   : > { %v1371_v4 = vpop.permute.xlu1 %1370  ;;  %v1493_v57 = vpop.permute.xlu0 %1492 }
 0x240   : > { %v1375_v27 = vadd.f32 %v1371_v4, %v1362_v34  ;;  %v1498_v51 = vadd.f32 %v1493_v57, %v1485_v24  ;;  %v3908_v24 = vld [vmem:[#allocation4 + $0x26] sm:$0xff]  ;;  %v1912_v4 = vstv %s3879_s6 }
 0x241   : > { %1808 = vrot.lane.b32.xlu1 %v1803_v46, %s4107_s1  ;;  %1878 = vrot.lane.b32.xlu0 %v1874_v3, %s4105_s10  ;;  %v1934_v3 = vmul.f32 %v1932_v22, %v3908_v24  ;;  %v1913_v18 = vmul.f32 %v1912_v4, %v3771_v54 }
 0x242   : > { %v1590_v20 = vadd.f32 %v1588_v19, %v1498_v51  ;;  %v1997_v19 = vstv %s3898_s14 }
 0x243   : > { %v1384_v17 = vpop.permute.xlu1 %1383  ;;  %v1513_v58 = vpop.permute.xlu0 %1512  ;;  %v1998_v22 = vmul.f32 %v1997_v19, %v3784_v11 }
 0x244   : > { %v1388_v35 = vadd.f32 %v1384_v17, %v1375_v27  ;;  %v1518_v25 = vadd.f32 %v1513_v58, %v1503_v61  ;;  %v1862_v17 = vmul.f32 %v1860_v15, %v3895_v21 }
 0x245   : > { %1736 = vrot.lane.b32.xlu1 %v1731_v41, %s4103_s27  ;;  %1963 = vrot.lane.b32.xlu0 %v1959_v44, %s4105_s10 }
 0x247   : > { %v1397_v37 = vpop.permute.xlu1 %1396  ;;  %v1526_v48 = vpop.permute.xlu0 %1525 }
 0x248   : > { %v1401_v50 = vadd.f32 %v1397_v37, %v1388_v35  ;;  %v1531_v63 = vadd.f32 %v1526_v48, %v1518_v25  ;;  %v1947_v25 = vmul.f32 %v1945_v7, %v3908_v24  ;;  %v1504_v7 = vmul.f32 %v1502_v26, %v3562_v31 }
 0x249   : > { %1821 = vrot.lane.b32.xlu1 %v1816_v30, %s4103_s27  ;;  %1891 = vrot.lane.b32.xlu0 %v1887_v52, %s4107_s1  ;;  %v1875_v52 = vmul.f32 %v1873_v2, %v3895_v21  ;;  %v1960_v2 = vmul.f32 %v1958_v39, %v3908_v24 }
 0x24b   : > { %v1410_v23 = vpop.permute.xlu1 %1409  ;;  %v1539_v53 = vpop.permute.xlu0 %1538 }
 0x24c   : > { %v1414_v33 = vadd.f32 %v1410_v23, %v1401_v50  ;;  %v1544_v55 = vadd.f32 %v1539_v53, %v1531_v63  ;;  %v1589_v23 = vmul.f32 %v1587_v29, %v3604_v32 }
 0x24d   : > { %1749 = vrot.lane.b32.xlu1 %v1744_v56, %s4104_s21  ;;  %1976 = vrot.lane.b32.xlu0 %v1972_v1, %s4107_s1 }
 0x24e   : > { %v3884_v45 = vadd.f32 %v1414_v33, %v3797_v62  ;;  %v1985_v62 = vmul.f32 %v1984_v59, %v3784_v11 }
 0x24f   : > { %v1430_v14 = vpop.permute.xlu1 %1429  ;;  %v1598_v47 = vpop.permute.xlu0 %1597 }
 0x250   : > { %v1434_v9 = vadd.f32 %v1430_v14, %v1419_v16  ;;  %v1603_v8 = vadd.f32 %v1598_v47, %v1590_v20  ;;  %v1888_v14 = vmul.f32 %v1886_v28, %v3895_v21 }
 0x251   : > { %1834 = vrot.lane.b32.xlu1 %v1829_v43, %s4104_s21  ;;  %1904 = vrot.lane.b32.xlu0 %v1900_v0, %s4103_s27  ;;  %v1757_v43 = vstv %s3943_s20 }
 0x253   : > { %v1443_v60 = vpop.permute.xlu1 %1442  ;;  %v1611_v12 = vpop.permute.xlu0 %1610 }
 0x254   : > { %v1447_v38 = vadd.f32 %v1443_v60, %v1434_v9  ;;  %v1616_v34 = vadd.f32 %v1611_v12, %v1603_v8  ;;  %v1973_v8 = vmul.f32 %v1971_v49, %v3908_v24 }
 0x255   : > { %1854 = vrot.lane.b32.xlu1 %v1849_v6, %s4106_s0  ;;  %1989 = vrot.lane.b32.xlu0 %v1985_v62, %s4103_s27  ;;  %v1758_v6 = vmul.f32 %v1757_v43, %v3619_v36 }
 0x257   : > { %v1456_v57 = vpop.permute.xlu1 %1455  ;;  %v1624_v46 = vpop.permute.xlu0 %1623 }
 0x258   : > { %v1460_v27 = vadd.f32 %v1456_v57, %v1447_v38  ;;  %v1629_v51 = vadd.f32 %v1624_v46, %v1616_v34  ;;  %v1901_v38 = vmul.f32 %v1899_v42, %v3895_v21 }
 0x259   : > { %1939 = vrot.lane.b32.xlu1 %v1934_v3, %s4106_s0  ;;  %1917 = vrot.lane.b32.xlu0 %v1913_v18, %s4104_s21  ;;  %s3934_s0 = sld [smem:[#allocation9 + $0x46]]  ;;  %v1986_v3 = vmul.f32 %v1984_v59, %v3908_v24 }
 0x25b   : > { %v1469_v61 = vpop.permute.xlu1 %1468  ;;  %v1552_v20 = vpop.permute.xlu0 %1551 }
 0x25c   : > { %v1473_v58 = vadd.f32 %v1469_v61, %v1460_v27  ;;  %v1557_v41 = vadd.f32 %v1552_v20, %v1544_v55  ;;  %v1914_v61 = vmul.f32 %v1912_v4, %v3895_v21 }
 0x25d   : > { %1867 = vrot.lane.b32.xlu1 %v1862_v17, %s4108_s2  ;;  %2002 = vrot.lane.b32.xlu0 %v1998_v22, %s4104_s21  ;;  %v1999_v22 = vmul.f32 %v1997_v19, %v3908_v24 }
 0x25f   : > { %v1482_v44 = vpop.permute.xlu1 %1481  ;;  %v1637_v35 = vpop.permute.xlu0 %1636  ;;  %v1672_v32 = vstv %s3934_s0 }
 0x260   : > { %v1486_v37 = vadd.f32 %v1482_v44, %v1473_v58  ;;  %v1642_v48 = vadd.f32 %v1637_v35, %v1629_v51  ;;  %v1673_v26 = vmul.f32 %v1672_v32, %v3606_v13 }
 0x261   : > { %1952 = vrot.lane.b32.xlu1 %v1947_v25, %s4108_s2  ;;  %s3984_s2 = sld [smem:[#allocation9 + $0x5b]] }
 0x263   : > { %v1495_v15 = vpop.permute.xlu1 %1494  ;;  %v1565_v30 = vpop.permute.xlu0 %1564 }
 0x264   : > { %v1499_v50 = vadd.f32 %v1495_v15, %v1486_v37  ;;  %v1570_v63 = vadd.f32 %v1565_v30, %v1557_v41 }
 0x265   : > { %1880 = vrot.lane.b32.xlu1 %v1875_v52, %s4105_s10 }
 0x266   : > { %v1591_v53 = vadd.f32 %v1589_v23, %v1499_v50 }
 0x267   : > { %v1515_v56 = vpop.permute.xlu1 %1514  ;;  %v1650_v1 = vpop.permute.xlu0 %1649 }
 0x268   : > { %v1519_v33 = vadd.f32 %v1515_v56, %v1504_v7  ;;  %v1655_v55 = vadd.f32 %v1650_v1, %v1642_v48  ;;  %v1759_v1 = vmul.f32 %v1757_v43, %v3739_v10  ;;  %v1927_v43 = vstv %s3984_s2 }
 0x269   : > { %1965 = vrot.lane.b32.xlu1 %v1960_v2, %s4105_s10  ;;  %s3994_s10 = sld [smem:[#allocation10 + $0x1]] }
 0x26b   : > { %v1528_v29 = vpop.permute.xlu1 %1527  ;;  %v1578_v16 = vpop.permute.xlu0 %1577 }
 0x26c   : > { %v1532_v47 = vadd.f32 %v1528_v29, %v1519_v33  ;;  %v1583_v31 = vadd.f32 %v1578_v16, %v1570_v63  ;;  %v1674_v63 = vmul.f32 %v1672_v32, %v3726_v5 }
 0x26d   : > { %1893 = vrot.lane.b32.xlu1 %v1888_v14, %s4107_s1 }
 0x26e   : > { %v1675_v39 = vadd.f32 %v1673_v26, %v1583_v31 }
 0x26f   : > { %v1541_v0 = vpop.permute.xlu1 %1540  ;;  %v1663_v9 = vpop.permute.xlu0 %1662 }
 0x270   : > { %v1545_v60 = vadd.f32 %v1541_v0, %v1532_v47  ;;  %v1668_v12 = vadd.f32 %v1663_v9, %v1655_v55 }
 0x271   : > { %1978 = vrot.lane.b32.xlu1 %v1973_v8, %s4107_s1  ;;  %s3981_s1 = sld [smem:[#allocation9 + $0x54]] }
 0x272   : > { %v1760_v28 = vadd.f32 %v1758_v6, %v1668_v12 }
 0x273   : > { %v1600_v62 = vpop.permute.xlu1 %1599  ;;  %v1683_v13 = vpop.permute.xlu0 %1682 }
 0x274   : > { %v1604_v34 = vadd.f32 %v1600_v62, %v1591_v53  ;;  %v1688_v57 = vadd.f32 %v1683_v13, %v1675_v39  ;;  %v1928_v13 = vmul.f32 %v1927_v43, %v3784_v11 }
 0x275   : > { %1906 = vrot.lane.b32.xlu1 %v1901_v38, %s4103_s27 }
 0x277   : > { %v1613_v46 = vpop.permute.xlu1 %1612  ;;  %v1768_v49 = vpop.permute.xlu0 %1767  ;;  %v1842_v32 = vstv %s3981_s1 }
 0x278   : > { %v1617_v36 = vadd.f32 %v1613_v46, %v1604_v34  ;;  %v1773_v18 = vadd.f32 %v1768_v49, %v1760_v28  ;;  %v1843_v10 = vmul.f32 %v1842_v32, %v3771_v54 }
 0x279   : > { %1991 = vrot.lane.b32.xlu1 %v1986_v3, %s4103_s27  ;;  %s2169_s27 = sshll.u32 %s2722_s7, 4 }
 0x27a   : > { %s229_s24 = scalar_lea.vmem [#allocation12], %s2169_s27 }
 0x27b   : > { %v1626_v27 = vpop.permute.xlu1 %1625  ;;  %v1696_v51 = vpop.permute.xlu0 %1695  ;;  %s2050_s19 = sshll.u32 %s229_s24, 4  ;;  %s4008_s19 = int_to_ptr.vmem [resolvable:$true] %s2050_s19 }
 0x27c   : > { %v1630_v42 = vadd.f32 %v1626_v27, %v1617_v36  ;;  %v1701_v53 = vadd.f32 %v1696_v51, %v1688_v57  ;;  %s2447_s22 = scalar_lea.vmem %s4008_s19, 256  ;;  %p2454_p9 = scmp.lt.s32.totalorder %s4008_s19, %s2452_s16 }
 0x27d   : > { %1919 = vrot.lane.b32.xlu1 %v1914_v61, %s4104_s21  ;;  %p2448_p11 = scmp.ne.s32.totalorder %s4008_s19, %s2447_s22  ;;  %p2455_p3 = scmp.lt.s32.totalorder %s2453_s9, %s2447_s22 }
 0x27f   : > { %v1554_v20 = vpop.permute.xlu1 %1553  ;;  %v1781_v17 = vpop.permute.xlu0 %1780  ;;  %p2449_p6 = pnand %p2448_p11, %p2670_p13  ;;  %p2456_p5 = por %p2455_p3, %p2454_p9 }
 0x280   : > { %v1558_v58 = vadd.f32 %v1554_v20, %v1545_v60  ;;  %v1786_v16 = vadd.f32 %v1781_v17, %v1773_v18 }
 0x281   : > { %2004 = vrot.lane.b32.xlu1 %v1999_v22, %s4104_s21  ;;  %s3992_s21 = sld [smem:[#allocation10]]  ;;  %p2450_p8 = pneg %p2449_p6 }
 0x283   : > { %v1639_v59 = vpop.permute.xlu1 %1638  ;;  %v1709_v41 = vpop.permute.xlu0 %1708  ;;  %p2457_p10 = pnand %p2456_p5, %p2450_p8 }
 0x284   : > { %v1643_v44 = vadd.f32 %v1639_v59, %v1630_v42  ;;  %v1714_v2 = vadd.f32 %v1709_v41, %v1701_v53 }
 0x287   : > { %v1567_v35 = vpop.permute.xlu1 %1566  ;;  %v1794_v25 = vpop.permute.xlu0 %1793 }
 0x288   : > { %v1571_v37 = vadd.f32 %v1567_v35, %v1558_v58  ;;  %v1799_v47 = vadd.f32 %v1794_v25, %v1786_v16 }
 0x28b   : > { %v1652_v48 = vpop.permute.xlu1 %1651  ;;  %v1722_v15 = vpop.permute.xlu0 %1721 }
 0x28c   : > { %v1656_v4 = vadd.f32 %v1652_v48, %v1643_v44  ;;  %v1727_v14 = vadd.f32 %v1722_v15, %v1714_v2  ;;  %v1844_v15 = vmul.f32 %v1842_v32, %v3895_v21 }
 0x28f   : > { %v1580_v30 = vpop.permute.xlu1 %1579  ;;  %v1807_v52 = vpop.permute.xlu0 %1806 }
 0x290   : > { %v1584_v50 = vadd.f32 %v1580_v30, %v1571_v37  ;;  %v1812_v0 = vadd.f32 %v1807_v52, %v1799_v47 }
 0x292   : > { %v1676_v19 = vadd.f32 %v1674_v63, %v1584_v50 }
 0x293   : > { %v1665_v23 = vpop.permute.xlu1 %1664  ;;  %v1735_v7 = vpop.permute.xlu0 %1734 }
 0x294   : > { %v1669_v56 = vadd.f32 %v1665_v23, %v1656_v4  ;;  %v1740_v31 = vadd.f32 %v1735_v7, %v1727_v14 }
 0x296   : > { %v1761_v33 = vadd.f32 %v1759_v1, %v1669_v56 }
 0x297   : > { %v1685_v55 = vpop.permute.xlu1 %1684  ;;  %v1820_v29 = vpop.permute.xlu0 %1819 }
 0x298   : > { %v1689_v5 = vadd.f32 %v1685_v55, %v1676_v19  ;;  %v1825_v60 = vadd.f32 %v1820_v29, %v1812_v0  ;;  %v1929_v19 = vmul.f32 %v1927_v43, %v3908_v24  ;;  %v2019_v43 = vstv %s3994_s10 }
 0x29b   : > { %v1770_v26 = vpop.permute.xlu1 %1769  ;;  %v1748_v39 = vpop.permute.xlu0 %1747 }
 0x29c   : > { %v1774_v9 = vadd.f32 %v1770_v26, %v1761_v33  ;;  %v1753_v8 = vadd.f32 %v1748_v39, %v1740_v31 }
 0x29e   : > { %v1845_v12 = vadd.f32 %v1843_v10, %v1753_v8 }
 0x29f   : > { %v1698_v6 = vpop.permute.xlu1 %1697  ;;  %v1833_v28 = vpop.permute.xlu0 %1832 }
 0x2a0   : > { %v1838_v62 = vadd.f32 %v1833_v28, %v1825_v60  ;;  %v1702_v20 = vadd.f32 %v1698_v6, %v1689_v5 }
 0x2a2   : > { %v1930_v38 = vadd.f32 %v1928_v13, %v1838_v62 }
 0x2a3   : > { %v1783_v34 = vpop.permute.xlu1 %1782  ;;  %v1853_v57 = vpop.permute.xlu0 %1852 }
 0x2a4   : > { %v1787_v59 = vadd.f32 %v1783_v34, %v1774_v9  ;;  %v1858_v23 = vadd.f32 %v1853_v57, %v1845_v12  ;;  %v2016_v9 = vstv %s3992_s21 }
 0x2a7   : > { %v1711_v46 = vpop.permute.xlu1 %1710  ;;  %v1938_v49 = vpop.permute.xlu0 %1937 }
 0x2a8   : > { %v1715_v17 = vadd.f32 %v1711_v46, %v1702_v20  ;;  %v1943_v7 = vadd.f32 %v1938_v49, %v1930_v38 }
 0x2ab   : > { %v1796_v3 = vpop.permute.xlu1 %1795  ;;  %v1866_v36 = vpop.permute.xlu0 %1865 }
 0x2ac   : > { %v1800_v11 = vadd.f32 %v1796_v3, %v1787_v59  ;;  %v1871_v2 = vadd.f32 %v1866_v36, %v1858_v23 }
 0x2af   : > { %v1724_v18 = vpop.permute.xlu1 %1723  ;;  %v1951_v27 = vpop.permute.xlu0 %1950 }
 0x2b0   : > { %v1728_v41 = vadd.f32 %v1724_v18, %v1715_v17  ;;  %v1956_v33 = vadd.f32 %v1951_v27, %v1943_v7 }
 0x2b3   : > { %v1809_v51 = vpop.permute.xlu1 %1808  ;;  %v1879_v61 = vpop.permute.xlu0 %1878 }
 0x2b4   : > { %v1813_v37 = vadd.f32 %v1809_v51, %v1800_v11  ;;  %v1884_v55 = vadd.f32 %v1879_v61, %v1871_v2 }
 0x2b7   : > { %v1737_v54 = vpop.permute.xlu1 %1736  ;;  %v1964_v42 = vpop.permute.xlu0 %1963 }
 0x2b8   : > { %v1741_v44 = vadd.f32 %v1737_v54, %v1728_v41  ;;  %v1969_v29 = vadd.f32 %v1964_v42, %v1956_v33 }
 0x2bb   : > { %v1822_v22 = vpop.permute.xlu1 %1821  ;;  %v1892_v58 = vpop.permute.xlu0 %1891 }
 0x2bc   : > { %v1826_v4 = vadd.f32 %v1822_v22, %v1813_v37  ;;  %v1897_v21 = vadd.f32 %v1892_v58, %v1884_v55 }
 0x2bf   : > { %v1750_v35 = vpop.permute.xlu1 %1749  ;;  %v1977_v25 = vpop.permute.xlu0 %1976 }
 0x2c0   : > { %v1754_v48 = vadd.f32 %v1750_v35, %v1741_v44  ;;  %v1982_v5 = vadd.f32 %v1977_v25, %v1969_v29 }
 0x2c2   : > { %v1846_v30 = vadd.f32 %v1844_v15, %v1754_v48 }
 0x2c3   : > { %v1835_v52 = vpop.permute.xlu1 %1834  ;;  %v1905_v50 = vpop.permute.xlu0 %1904 }
 0x2c4   : > { %v1839_v63 = vadd.f32 %v1835_v52, %v1826_v4  ;;  %v1910_v24 = vadd.f32 %v1905_v50, %v1897_v21 }
 0x2c6   : > { %v1931_v53 = vadd.f32 %v1929_v19, %v1839_v63 }
 0x2c7   : > { %v1855_v56 = vpop.permute.xlu1 %1854  ;;  %v1990_v1 = vpop.permute.xlu0 %1989 }
 0x2c8   : > { %v1995_v32 = vadd.f32 %v1990_v1, %v1982_v5  ;;  %v1859_v49 = vadd.f32 %v1855_v56, %v1846_v30 }
 0x2cb   : > { %v1940_v16 = vpop.permute.xlu1 %1939  ;;  %v1918_v14 = vpop.permute.xlu0 %1917 }
 0x2cc   : > { %v1923_v26 = vadd.f32 %v1918_v14, %v1910_v24  ;;  %v1944_v3 = vadd.f32 %v1940_v16, %v1931_v53 }
 0x2cf   : > { %v1868_v47 = vpop.permute.xlu1 %1867  ;;  %v2003_v31 = vpop.permute.xlu0 %2002 }
 0x2d0   : > { %v2008_v39 = vadd.f32 %v2003_v31, %v1995_v32  ;;  %v1872_v18 = vadd.f32 %v1868_v47, %v1859_v49 }
 0x2d2   : > { %v2012_v0 = vadd.f32 %v2008_v39, %v1923_v26 }
 0x2d3   : > { %v1953_v8 = vpop.permute.xlu1 %1952 }
 0x2d4   : > { %v2014_v10 = vadd.f32 %v2012_v0, %v3760_v40  ;;  %v1957_v27 = vadd.f32 %v1953_v8, %v1944_v3 }
 0x2d6   : > { %v2017_v60 = vmul.f32 %v2016_v9, %v2014_v10 }
 0x2d7   : > { %v1881_v12 = vpop.permute.xlu1 %1880 }
 0x2d8   : > { %v2020_v6 = vadd.f32 %v2019_v43, %v2017_v60  ;;  %v1885_v40 = vadd.f32 %v1881_v12, %v1872_v18 }
 0x2da   : > { %v2268_v28 = vmul.f32 -1.442695, %v2020_v6 }
 0x2db   : > { %v1966_v62 = vpop.permute.xlu1 %1965 }
 0x2dc   : > { %2379 = vpow2.f32 %v2268_v28  ;;  %v1970_v51 = vadd.f32 %v1966_v62, %v1957_v27 }
 0x2df   : > { %v1894_v13 = vpop.permute.xlu1 %1893 }
 0x2e0   : > { %v1898_v54 = vadd.f32 %v1894_v13, %v1885_v40 }
 0x2e3   : > { %v1979_v38 = vpop.permute.xlu1 %1978 }
 0x2e4   : > { %v1983_v42 = vadd.f32 %v1979_v38, %v1970_v51 }
 0x2e6   : > { %v2380_v34 = vpop.eup %2379 }
 0x2e7   : > { %v2028_v57 = vadd.f32 1.0, %v2380_v34  ;;  %v1907_v46 = vpop.permute.xlu1 %1906 }
 0x2e8   : > { %v1911_v20 = vadd.f32 %v1907_v46, %v1898_v54 }
 0x2e9   : > { %2381 = vrcp.f32 %v2028_v57 }
 0x2eb   : > { %v1992_v36 = vpop.permute.xlu1 %1991 }
 0x2ec   : > { %v1996_v17 = vadd.f32 %v1992_v36, %v1983_v42 }
 0x2ef   : > { %v1920_v61 = vpop.permute.xlu1 %1919 }
 0x2f0   : > { %v1924_v59 = vadd.f32 %v1920_v61, %v1911_v20 }
 0x2f3   : > { %v2382_v22 = vpop.eup %2381  ;;  %v2005_v58 = vpop.permute.xlu1 %2004 }
 0x2f4   : > { %v2009_v41 = vadd.f32 %v2005_v58, %v1996_v17  ;;  %2034 = vst.msk [vmem:[%s229_s24] sm:$0xff] %vm381_vm3, %v2382_v22 }
 0x2f6   : > { %v2013_v11 = vadd.f32 %v2009_v41, %v1924_v59 }
 0x2f8   : > { %v2015_v44 = vadd.f32 %v2013_v11, %v3884_v45 }
 0x2fa   : > { %v2018_v35 = vmul.f32 %v2016_v9, %v2015_v44 }
 0x2fc   : > { %v2021_v25 = vadd.f32 %v2019_v43, %v2018_v35 }
 0x2fe   : > { %v2269_v37 = vmul.f32 -1.442695, %v2021_v25 }
 0x300   : > { %2383 = vpow2.f32 %v2269_v37 }
 0x30a   : > { %v2384_v48 = vpop.eup %2383 }
 0x30b   : > { %v2029_v15 = vadd.f32 1.0, %v2384_v48 }
 0x30d   : > { %2385 = vrcp.f32 %v2029_v15 }
 0x317   : > { %v2386_v45 = vpop.eup %2385 }
 0x318   : > { %2035 = vst.msk [vmem:[%s229_s24 + $0x8] sm:$0xff] %vm381_vm3, %v2386_v45 }
 0x319   : > { %2460 = shalt.err (!%p2457_p10)
}
 0x31a   : > { %s2461_s30 = scalar_lea.hbm %s4006_s8, 256  ;;  %s2465_s4 = scalar_lea.hbm %s4061_s3, 512 }
 0x31b   : > { %p2462_p0 = scmp.ne.s32.totalorder %s4006_s8, %s2461_s30  ;;  %p2466_p12 = scmp.lt.u32.totalorder %s4006_s8, %s4061_s3 }
 0x31c   : > { %p2467_p7 = scmp.lt.u32.totalorder %s2465_s4, %s2461_s30  ;;  %p2469_p11 = scmp.lt.u32.totalorder %s2461_s30, %s4006_s8 }
 0x31d   : > { %p2463_p1 = pnand %p2462_p0, %p2670_p13 }
 0x31e   : > { %p2468_p4 = por %p2467_p7, %p2466_p12 }
 0x31f   : > { %p2464_p2 = pneg %p2463_p1 }
 0x320   : > { %p2470_p6 = por %p2469_p11, %p2468_p4 }
 0x322   : > { %p2471_p8 = pnand %p2470_p6, %p2464_p2 }
 0x324   : > { %2474 = shalt.err (!%p2471_p8)
}
 0x325   : > { %s2559_s0 = smov 128   ;;  %s2560_s20 = smov 8  }
 0x326   : > { %2287 = dma.vmem_to_hbm [thread:$0]  (%p2670_p13), %s4008_s19, 256, %s4006_s8, %s2037_s18, %s2559_s0, %s2559_s0, %s2560_s20  }
 0x327 PF: > { %s2065_s1 = sand.u32 1, %s2517_s12   ;;  %p4109_p9 = scmp.ne.s32.totalorder %s4089_s23, 0 }
 0x328   : > { %p4110_p3 = scmp.ge.s32.totalorder %s2537_s17, 2  ;;  %s2066_s2 = scalar_lea.sflag [#allocation7], %s2065_s1 }
 0x32a   : > { %p2301_p5 = pnand %p4110_p3, %p4109_p9 }
 0x32c   : > { %2512 = dma.done.wait (!%p2301_p5), %s2066_s2, 256  }
 0x32d   : > { %2514 = vsyncadd (!%p2301_p5), %s2066_s2, 4294967040  ;;  %s21_s17 = sadd.s32 1, %s2537_s17   ;;  %s4111_s21 = sld [smem:[#allocation17_spill]] }
 0x32e   : > { %p18_p10 = scmp.ge.s32.totalorder %s21_s17, 4   ;;  %s4112_s14 = sld [smem:[#allocation20_spill]] }
 0x32f   : > { %s4113_s15 = sld [smem:[#allocation18_spill]]  ;;  %s4114_s16 = sld [smem:[#allocation19_spill]] }
 0x330   : > { %s4115_s12 = smov %s2521_s13  ;;  %20 = sbr.rel (!%p18_p10) target bundleno = 12 (0xc), region = 95 }
 0x333   : > { %s4116_s13 = smov %s4111_s21 }
 0x337   :  { %2071 = vsyncpa [#allocation6], 1 }
 0x338   :  { %2073 = vsyncpa [#allocation6 + $0x1], 1 }
 0x339   :  { %2074 = vsyncpa [#allocation7], 1 }
 0x33a   :  { %2076 = vsyncpa [#allocation7 + $0x1], 1 }
 0x33b   :  { %2077 = vsyncpa [#allocation8], 1 }
 0x33c   :  { %2079 = vsyncpa [#allocation8 + $0x1], 1 }
 0x33d   :  { %2080 = vsyncpa [#allocation11], 1 }

</bundles_post_ra>
